<compile_context>
chip_gen: v5e
topology: v5e:2x2
jax: 0.10.0
libtpu: 0.0.40
codegen_flags: <defaults>
</compile_context>

<pallas_src>
from functools import partial

import numpy as np
import jax
import jax.numpy as jnp
from jax import lax
from jax.experimental import pallas as pl
from jax.experimental.pallas import tpu as pltpu


def _vmem_limit_bytes():
    # Generation-aware scoped-VMEM limit (~65% of physical; v7x only has 64MiB).
    try:
        cap = pltpu.get_tpu_info().vmem_capacity_bytes
        return int(min(0.65 * cap, 100 * 1024 * 1024))
    except Exception:
        return 48 * 1024 * 1024


# ----------------------------------------------------------------------------
# Fused per-batch kernel.  Internal layout per batch: (C, T*HW)  (lanes = T*HW)
# ----------------------------------------------------------------------------
def _fused_attention_kernel(x_ref, w3_ref, b3_ref, nrm3_ref, nrmo_ref,
                            pool_ref, poolT_ref, hmat5_ref, hmatT_ref,
                            gmat3_ref, gmat3T_ref, o_ref,
                            *, nheads, norm_groups, n_time, depth, smooth, eps,
                            approx_recip):
    C, THW = o_ref.shape
    C3 = 3 * C
    NP = pool_ref.shape[1]          # number of spatial patches
    G = norm_groups
    gs = C // G
    hc = C // nheads
    HW = THW // n_time
    P = HW // NP                    # pixels per patch
    NH = nheads
    inv_T = 1.0 / n_time
    inv_depth = 1.0 / depth
    inv_nn = 1.0 / (gs * THW)       # GroupNorm count: gs channels * T * HW

    # ---- fused q/k/v projection: ONE (3C,C)@(C,T*HW) bf16 MXU matmul -------
    proj = jnp.dot(w3_ref[...], x_ref[...],
                   preferred_element_type=jnp.float32)            # (3C, THW)
    proj = proj + b3_ref[...]                                     # bias (3C,1)

    # ---- GroupNorm (PyTorch semantics, biased var) over lane axis ----------
    def group_norm(y, gmat, gmatT, gamma, beta):
        # y: (Cx, THW); gmat: (Gx, Cx) 0/1 routing; gamma/beta: (Cx, 1)
        s1 = jnp.sum(y, axis=1, keepdims=True)                    # (Cx, 1)
        s2 = jnp.sum(y * y, axis=1, keepdims=True)                # (Cx, 1)
        st = jnp.concatenate([s1, s2], axis=1)                    # (Cx, 2)
        gst = jnp.dot(gmat, st, preferred_element_type=jnp.float32) * inv_nn
        cst = jnp.dot(gmatT, gst, preferred_element_type=jnp.float32)
        mean = cst[:, 0:1]
        var = cst[:, 1:2] - mean * mean
        scale = lax.rsqrt(var + eps) * gamma
        shift = beta - mean * scale
        return y * scale + shift

    # single fused GroupNorm of q/k/v via block-diagonal (3G, 3C) routing,
    # then one sigmoid pass over the whole 3C slab.
    nrm3 = nrm3_ref[...]
    qkv = jax.nn.sigmoid(group_norm(proj, gmat3_ref[...], gmat3T_ref[...],
                                    nrm3[:, 0:1], nrm3[:, 1:2]))  # (3C, THW)
    q = qkv[0:C]
    k = qkv[C:2 * C]
    v = qkv[2 * C:C3]

    # ---- fractal Tanimoto, strength-reduced depth recurrence ---------------
    # arg_d = 2^d*(s_sq - 2*tpl) + (tpl + smooth); arg_{d+1} = 2*arg_d - c0
    def ft(tpl, s_sq):
        c0 = tpl + smooth
        arg = (s_sq - 2.0 * tpl) + c0
        acc = pl.reciprocal(arg, approx=approx_recip)
        for _ in range(depth - 1):
            arg = 2.0 * arg - c0
            acc = acc + pl.reciprocal(arg, approx=approx_recip)
        return c0 * acc * inv_depth

    def ft_pair(s_ab, s_aa, s_bb, s_a, s_b, n_red):
        t_dir = ft(s_ab, s_aa + s_bb)
        # complement sums: sum((1-a)(1-b)) = N - sum a - sum b + sum ab, etc.
        c_ab = n_red - s_a - s_b + s_ab
        c_aa = n_red - 2.0 * s_a + s_aa
        c_bb = n_red - 2.0 * s_b + s_bb
        t_cmp = ft(c_ab, c_aa + c_bb)
        return 0.5 * (t_dir + t_cmp)

    # one (5C, THW) slab: {q*k, q*q, k*k, q, k} -> ONE reduction matmul per
    # attention branch instead of five.
    cat5 = jnp.concatenate([q * k, q * q, k * k, q, k], axis=0)   # (5C, THW)

    # ---- channel attention: per (channel, patch), sum over patch pixels,
    #      mean over time, broadcast back over (T, patch pixels) -------------
    chan5 = jnp.dot(cat5, pool_ref[...],
                    preferred_element_type=jnp.float32) * inv_T   # (5C, NP)
    att_c = ft_pair(chan5[0:C], chan5[C:2 * C], chan5[2 * C:3 * C],
                    chan5[3 * C:4 * C], chan5[4 * C:5 * C], float(P))  # (C,NP)
    att_c = jnp.dot(att_c, poolT_ref[...],
                    preferred_element_type=jnp.float32)           # (C, THW)

    # ---- spatial attention: per (time, head, pixel), sum over head channels,
    #      broadcast back to channels ----------------------------------------
    heads5 = jnp.dot(hmat5_ref[...], cat5,
                     preferred_element_type=jnp.float32)          # (5NH, THW)
    att_s = ft_pair(heads5[0:NH], heads5[NH:2 * NH], heads5[2 * NH:3 * NH],
                    heads5[3 * NH:4 * NH], heads5[4 * NH:5 * NH],
                    float(hc))                                    # (NH, THW)
    att_s = jnp.dot(hmatT_ref[...], att_s,
                    preferred_element_type=jnp.float32)           # (C, THW)

    # ---- combine, output GroupNorm, lane-dense store ------------------------
    out = 0.5 * (att_c + att_s) * v
    nrmo = nrmo_ref[...]
    # the output GroupNorm routing is the top-left (G, C) block of gmat3
    out = group_norm(out, gmat3_ref[0:G, 0:C], gmat3T_ref[0:C, 0:G],
                     nrmo[:, 0:1], nrmo[:, 1:2])
    o_ref[...] = out


# ----------------------------------------------------------------------------
# Wrapper: layout transform, routing matrices, param packing, pallas_call
# ----------------------------------------------------------------------------
def ptattention3d_tchw(x, params, *, nheads, scales, norm_groups, depth=10.0,
                       approx_recip=True):
    b, t, c, h, w = x.shape
    sh, sw = scales
    nh_, nw_ = h // sh, w // sw
    hw = h * w
    thw = t * hw
    n_patch = nh_ * nw_
    hc = c // nheads
    gs = c // norm_groups

    # bf16, channels-major (C, T*HW) per batch: one cheap XLA transpose in HBM
    # buys a single full-width projection matmul + lane-dense routing matmuls.
    x_cl = (x.astype(jnp.bfloat16)
             .reshape(b, t, c, hw)
             .transpose(0, 2, 1, 3)
             .reshape(b, c, thw))

    # fused projection weight (3C, C) bf16, bias (3C, 1) f32
    w3 = jnp.concatenate([params["Wq"].T, params["Wk"].T, params["Wv"].T],
                         axis=0).astype(jnp.bfloat16)
    b3 = jnp.concatenate([params["bq"], params["bk"], params["bv"]]
                         ).reshape(3 * c, 1).astype(jnp.float32)
    nrm3 = jnp.stack(
        [jnp.concatenate([params["gq_g"], params["gk_g"], params["gv_g"]]),
         jnp.concatenate([params["gq_b"], params["gk_b"], params["gv_b"]])],
        axis=1).astype(jnp.float32)                               # (3C, 2)
    nrmo = jnp.stack([params["go_g"], params["go_b"]],
                     axis=1).astype(jnp.float32)                  # (C, 2)

    # static 0/1 routing matrices (reductions / broadcasts via the MXU)
    # TODO(synk): for very large T*HW the (THW, NP) pool should be replaced by
    #             a per-time (HW, NP) pool inside a T-tiled multi-pass kernel.
    h_i = np.arange(h)[:, None]
    w_i = np.arange(w)[None, :]
    patch_of = ((h_i // sh) * nw_ + (w_i // sw)).reshape(hw)
    pool_s = (patch_of[:, None] == np.arange(n_patch)[None, :]).astype(np.float32)
    pool = np.tile(pool_s, (t, 1))                                # (THW, NP)
    poolT = np.ascontiguousarray(pool.T)                          # (NP, THW)
    head_of = np.arange(c) // hc
    hmat = (np.arange(nheads)[:, None] == head_of[None, :]).astype(np.float32)
    hmat5 = np.kron(np.eye(5, dtype=np.float32), hmat)            # (5NH, 5C)
    hmatT = np.ascontiguousarray(hmat.T)                          # (C, NH)
    grp_of = np.arange(c) // gs
    gmat = (np.arange(norm_groups)[:, None] == grp_of[None, :]).astype(np.float32)
    gmat3 = np.kron(np.eye(3, dtype=np.float32), gmat)            # (3G, 3C)
    gmat3T = np.ascontiguousarray(gmat3.T)                        # (3C, 3G)

    kern = partial(_fused_attention_kernel, nheads=nheads,
                   norm_groups=norm_groups, n_time=t, depth=int(depth),
                   smooth=1e-5, eps=1e-5, approx_recip=approx_recip)

    out_cl = pl.pallas_call(
        kern,
        out_shape=jax.ShapeDtypeStruct((b, c, thw), jnp.float32),
        grid=(b,),
        in_specs=[
            pl.BlockSpec((None, c, thw), lambda bi: (bi, 0, 0)),        # x bf16
            pl.BlockSpec((3 * c, c), lambda bi: (0, 0)),                # W3
            pl.BlockSpec((3 * c, 1), lambda bi: (0, 0)),                # bias
            pl.BlockSpec((3 * c, 2), lambda bi: (0, 0)),                # qkv gamma/beta
            pl.BlockSpec((c, 2), lambda bi: (0, 0)),                    # out gamma/beta
            pl.BlockSpec((thw, n_patch), lambda bi: (0, 0)),            # pool
            pl.BlockSpec((n_patch, thw), lambda bi: (0, 0)),            # pool^T
            pl.BlockSpec((5 * nheads, 5 * c), lambda bi: (0, 0)),       # block-diag head map
            pl.BlockSpec((c, nheads), lambda bi: (0, 0)),               # head map^T
            pl.BlockSpec((3 * norm_groups, 3 * c), lambda bi: (0, 0)),  # block-diag group map
            pl.BlockSpec((3 * c, 3 * norm_groups), lambda bi: (0, 0)),  # group map^T
        ],
        out_specs=pl.BlockSpec((None, c, thw), lambda bi: (bi, 0, 0)),
        compiler_params=pltpu.CompilerParams(
            dimension_semantics=("parallel",),
            vmem_limit_bytes=_vmem_limit_bytes()),
    )(x_cl, w3, b3, nrm3, nrmo,
      jnp.asarray(pool), jnp.asarray(poolT),
      jnp.asarray(hmat5), jnp.asarray(hmatT),
      jnp.asarray(gmat3), jnp.asarray(gmat3T))

    return out_cl.reshape(b, c, t, h, w).transpose(0, 2, 1, 3, 4)


# ----------------------------------------------------------------------------
# Deterministic parameter init + demo
# ----------------------------------------------------------------------------
def init_params(key, dim):
    ks = jax.random.split(key, 6)
    p = {
        "Wq": 0.1 * jax.random.normal(ks[0], (dim, dim), jnp.float32),
        "Wk": 0.1 * jax.random.normal(ks[1], (dim, dim), jnp.float32),
        "Wv": 0.1 * jax.random.normal(ks[2], (dim, dim), jnp.float32),
        "bq": 0.01 * jax.random.normal(ks[3], (dim,), jnp.float32),
        "bk": 0.01 * jax.random.normal(ks[4], (dim,), jnp.float32),
        "bv": 0.01 * jax.random.normal(ks[5], (dim,), jnp.float32),
    }
    for name in ("gq", "gk", "gv", "go"):
        p[name + "_g"] = jnp.ones((dim,), jnp.float32)
        p[name + "_b"] = jnp.zeros((dim,), jnp.float32)
    return p


if __name__ == "__main__":
    # T*HW = 256 -> lane-dense (multiple-of-128) last dim for the output store.
    B, T, C, H, W = 2, 4, 32, 8, 8
    NHEADS, SCALES = 8, (4, 4)
    NORM_GROUPS = C // 4

    key = jax.random.PRNGKey(0)
    kx, kp = jax.random.split(key)
    x = jax.random.normal(kx, (B, T, C, H, W), jnp.float32)
    params = init_params(kp, C)

    fwd = jax.jit(partial(ptattention3d_tchw, nheads=NHEADS, scales=SCALES,
                          norm_groups=NORM_GROUPS, depth=10.0))
    out = fwd(x, params)
    jax.block_until_ready(out)
    assert out.shape == (B, T, C, H, W), out.shape
    assert bool(jnp.all(jnp.isfinite(out)))
    print("KERNEL_OK")
</pallas_src>

<mosaic_0001>
module attributes {stable_mosaic.version = 11 : i64} {
  func.func @_fused_attention_kernel(%arg0: i32, %arg1: memref<1x32x256xbf16, #tpu.memory_space<vmem>>, %arg2: memref<96x32xbf16, #tpu.memory_space<vmem>>, %arg3: memref<96x1xf32, #tpu.memory_space<vmem>>, %arg4: memref<96x2xf32, #tpu.memory_space<vmem>>, %arg5: memref<32x2xf32, #tpu.memory_space<vmem>>, %arg6: memref<256x4xf32, #tpu.memory_space<vmem>>, %arg7: memref<4x256xf32, #tpu.memory_space<vmem>>, %arg8: memref<40x160xf32, #tpu.memory_space<vmem>>, %arg9: memref<32x8xf32, #tpu.memory_space<vmem>>, %arg10: memref<24x96xf32, #tpu.memory_space<vmem>>, %arg11: memref<96x24xf32, #tpu.memory_space<vmem>>, %arg12: memref<1x32x256xf32, #tpu.memory_space<vmem>>) attributes {dimension_semantics = [#tpu.dimension_semantics<parallel>], iteration_bounds = array<i64: 2>, scalar_prefetch = 0 : i64, scratch_operands = 0 : i64, tpu.core_type = #tpu.core_type<tc>, window_params = [{transform_indices = @transform_0, window_bounds = array<i64: 1, 32, 256>}, {pipeline_mode = #tpu.pipeline_mode<synchronous>, transform_indices = @transform_1, window_bounds = array<i64: 96, 32>}, {pipeline_mode = #tpu.pipeline_mode<synchronous>, transform_indices = @transform_2, window_bounds = array<i64: 96, 1>}, {pipeline_mode = #tpu.pipeline_mode<synchronous>, transform_indices = @transform_3, window_bounds = array<i64: 96, 2>}, {pipeline_mode = #tpu.pipeline_mode<synchronous>, transform_indices = @transform_4, window_bounds = array<i64: 32, 2>}, {pipeline_mode = #tpu.pipeline_mode<synchronous>, transform_indices = @transform_5, window_bounds = array<i64: 256, 4>}, {pipeline_mode = #tpu.pipeline_mode<synchronous>, transform_indices = @transform_6, window_bounds = array<i64: 4, 256>}, {pipeline_mode = #tpu.pipeline_mode<synchronous>, transform_indices = @transform_7, window_bounds = array<i64: 40, 160>}, {pipeline_mode = #tpu.pipeline_mode<synchronous>, transform_indices = @transform_8, window_bounds = array<i64: 32, 8>}, {pipeline_mode = #tpu.pipeline_mode<synchronous>, transform_indices = @transform_9, window_bounds = array<i64: 24, 96>}, {pipeline_mode = #tpu.pipeline_mode<synchronous>, transform_indices = @transform_10, window_bounds = array<i64: 96, 24>}, {transform_indices = @transform_11, window_bounds = array<i64: 1, 32, 256>}]} {
    %c0 = arith.constant 0 : index
    %c0_0 = arith.constant 0 : index
    %0 = vector.load %arg2[%c0, %c0_0] : memref<96x32xbf16, #tpu.memory_space<vmem>>, vector<96x32xbf16>
    %c0_1 = arith.constant 0 : index
    %c0_2 = arith.constant 0 : index
    %c0_3 = arith.constant 0 : index
    %1 = vector.load %arg1[%c0_1, %c0_2, %c0_3] : memref<1x32x256xbf16, #tpu.memory_space<vmem>>, vector<1x32x256xbf16>
    %2 = vector.shape_cast %1 : vector<1x32x256xbf16> to vector<32x256xbf16>
    %cst = arith.constant dense<0.000000e+00> : vector<96x256xf32>
    %3 = tpu.matmul %0, %2, %cst {dimension_numbers = #tpu.dot_dimension_numbers<[1], [0], [0], [1], [0, 0, 1, 1], [], []>} : vector<96x32xbf16>, vector<32x256xbf16>, vector<96x256xf32> -> vector<96x256xf32>
    %c0_4 = arith.constant 0 : index
    %c0_5 = arith.constant 0 : index
    %4 = vector.load %arg3[%c0_4, %c0_5] : memref<96x1xf32, #tpu.memory_space<vmem>>, vector<96x1xf32>
    %5 = vector.broadcast %4 : vector<96x1xf32> to vector<96x256xf32>
    %6 = arith.addf %3, %5 : vector<96x256xf32>
    %c0_6 = arith.constant 0 : index
    %c0_7 = arith.constant 0 : index
    %7 = vector.load %arg4[%c0_6, %c0_7] : memref<96x2xf32, #tpu.memory_space<vmem>>, vector<96x2xf32>
    %c0_8 = arith.constant 0 : index
    %c0_9 = arith.constant 0 : index
    %8 = vector.load %arg10[%c0_8, %c0_9] : memref<24x96xf32, #tpu.memory_space<vmem>>, vector<24x96xf32>
    %c0_10 = arith.constant 0 : index
    %c0_11 = arith.constant 0 : index
    %9 = vector.load %arg11[%c0_10, %c0_11] : memref<96x24xf32, #tpu.memory_space<vmem>>, vector<96x24xf32>
    %10 = vector.extract_strided_slice %7 {offsets = [0, 0], sizes = [96, 1], strides = [1, 1]} : vector<96x2xf32> to vector<96x1xf32>
    %11 = vector.extract_strided_slice %7 {offsets = [0, 1], sizes = [96, 1], strides = [1, 1]} : vector<96x2xf32> to vector<96x1xf32>
    %cst_12 = arith.constant dense<0.000000e+00> : vector<96xf32>
    %12 = vector.multi_reduction <add>, %6, %cst_12 [1] : vector<96x256xf32> to vector<96xf32>
    %13 = vector.shape_cast %12 : vector<96xf32> to vector<96x1xf32>
    %14 = arith.mulf %6, %6 : vector<96x256xf32>
    %cst_13 = arith.constant dense<0.000000e+00> : vector<96xf32>
    %15 = vector.multi_reduction <add>, %14, %cst_13 [1] : vector<96x256xf32> to vector<96xf32>
    %16 = vector.shape_cast %15 : vector<96xf32> to vector<96x1xf32>
    %17 = tpu.concatenate %13, %16 in 1 : vector<96x1xf32>, vector<96x1xf32> -> vector<96x2xf32>
    %cst_14 = arith.constant dense<0.000000e+00> : vector<24x2xf32>
    %18 = tpu.matmul %8, %17, %cst_14 {dimension_numbers = #tpu.dot_dimension_numbers<[1], [0], [0], [1], [0, 0, 1, 1], [], []>} : vector<24x96xf32>, vector<96x2xf32>, vector<24x2xf32> -> vector<24x2xf32>
    %cst_15 = arith.constant 9.765625E-4 : f32
    %19 = vector.broadcast %cst_15 : f32 to vector<24x2xf32>
    %20 = arith.mulf %18, %19 : vector<24x2xf32>
    %cst_16 = arith.constant dense<0.000000e+00> : vector<96x2xf32>
    %21 = tpu.matmul %9, %20, %cst_16 {dimension_numbers = #tpu.dot_dimension_numbers<[1], [0], [0], [1], [0, 0, 1, 1], [], []>} : vector<96x24xf32>, vector<24x2xf32>, vector<96x2xf32> -> vector<96x2xf32>
    %22 = vector.extract_strided_slice %21 {offsets = [0, 0], sizes = [96, 1], strides = [1, 1]} : vector<96x2xf32> to vector<96x1xf32>
    %23 = vector.extract_strided_slice %21 {offsets = [0, 1], sizes = [96, 1], strides = [1, 1]} : vector<96x2xf32> to vector<96x1xf32>
    %24 = arith.mulf %22, %22 : vector<96x1xf32>
    %25 = arith.subf %23, %24 : vector<96x1xf32>
    %cst_17 = arith.constant 9.99999974E-6 : f32
    %26 = vector.broadcast %cst_17 : f32 to vector<96x1xf32>
    %27 = arith.addf %25, %26 : vector<96x1xf32>
    %28 = math.rsqrt %27 : vector<96x1xf32>
    %29 = arith.mulf %28, %10 : vector<96x1xf32>
    %30 = arith.mulf %22, %29 : vector<96x1xf32>
    %31 = arith.subf %11, %30 : vector<96x1xf32>
    %32 = vector.broadcast %29 : vector<96x1xf32> to vector<96x256xf32>
    %33 = arith.mulf %6, %32 : vector<96x256xf32>
    %34 = vector.broadcast %31 : vector<96x1xf32> to vector<96x256xf32>
    %35 = arith.addf %33, %34 : vector<96x256xf32>
    %36 = arith.negf %35 : vector<96x256xf32>
    %37 = math.exp %36 : vector<96x256xf32>
    %cst_18 = arith.constant 1.000000e+00 : f32
    %38 = vector.broadcast %cst_18 : f32 to vector<96x256xf32>
    %39 = arith.addf %38, %37 : vector<96x256xf32>
    %40 = arith.divf %38, %39 : vector<96x256xf32>
    %41 = vector.extract_strided_slice %40 {offsets = [0, 0], sizes = [32, 256], strides = [1, 1]} : vector<96x256xf32> to vector<32x256xf32>
    %42 = vector.extract_strided_slice %40 {offsets = [32, 0], sizes = [32, 256], strides = [1, 1]} : vector<96x256xf32> to vector<32x256xf32>
    %43 = vector.extract_strided_slice %40 {offsets = [64, 0], sizes = [32, 256], strides = [1, 1]} : vector<96x256xf32> to vector<32x256xf32>
    %44 = arith.mulf %41, %42 : vector<32x256xf32>
    %45 = arith.mulf %41, %41 : vector<32x256xf32>
    %46 = arith.mulf %42, %42 : vector<32x256xf32>
    %47 = tpu.concatenate %44, %45, %46, %41, %42 in 0 : vector<32x256xf32>, vector<32x256xf32>, vector<32x256xf32>, vector<32x256xf32>, vector<32x256xf32> -> vector<160x256xf32>
    %c0_19 = arith.constant 0 : index
    %c0_20 = arith.constant 0 : index
    %48 = vector.load %arg6[%c0_19, %c0_20] : memref<256x4xf32, #tpu.memory_space<vmem>>, vector<256x4xf32>
    %cst_21 = arith.constant dense<0.000000e+00> : vector<160x4xf32>
    %49 = tpu.matmul %47, %48, %cst_21 {dimension_numbers = #tpu.dot_dimension_numbers<[1], [0], [0], [1], [0, 0, 1, 1], [], []>} : vector<160x256xf32>, vector<256x4xf32>, vector<160x4xf32> -> vector<160x4xf32>
    %cst_22 = arith.constant 2.500000e-01 : f32
    %50 = vector.broadcast %cst_22 : f32 to vector<160x4xf32>
    %51 = arith.mulf %49, %50 : vector<160x4xf32>
    %52 = vector.extract_strided_slice %51 {offsets = [0, 0], sizes = [32, 4], strides = [1, 1]} : vector<160x4xf32> to vector<32x4xf32>
    %53 = vector.extract_strided_slice %51 {offsets = [32, 0], sizes = [32, 4], strides = [1, 1]} : vector<160x4xf32> to vector<32x4xf32>
    %54 = vector.extract_strided_slice %51 {offsets = [64, 0], sizes = [32, 4], strides = [1, 1]} : vector<160x4xf32> to vector<32x4xf32>
    %55 = vector.extract_strided_slice %51 {offsets = [96, 0], sizes = [32, 4], strides = [1, 1]} : vector<160x4xf32> to vector<32x4xf32>
    %56 = vector.extract_strided_slice %51 {offsets = [128, 0], sizes = [32, 4], strides = [1, 1]} : vector<160x4xf32> to vector<32x4xf32>
    %57 = arith.addf %53, %54 : vector<32x4xf32>
    %cst_23 = arith.constant 9.99999974E-6 : f32
    %58 = vector.broadcast %cst_23 : f32 to vector<32x4xf32>
    %59 = arith.addf %52, %58 : vector<32x4xf32>
    %cst_24 = arith.constant 2.000000e+00 : f32
    %60 = vector.broadcast %cst_24 : f32 to vector<32x4xf32>
    %61 = arith.mulf %60, %52 : vector<32x4xf32>
    %62 = arith.subf %57, %61 : vector<32x4xf32>
    %63 = arith.addf %62, %59 : vector<32x4xf32>
    %64 = tpu.reciprocal %63 {approx = true} : vector<32x4xf32> -> vector<32x4xf32>
    %cst_25 = arith.constant 2.000000e+00 : f32
    %65 = vector.broadcast %cst_25 : f32 to vector<32x4xf32>
    %66 = arith.mulf %65, %63 : vector<32x4xf32>
    %67 = arith.subf %66, %59 : vector<32x4xf32>
    %68 = tpu.reciprocal %67 {approx = true} : vector<32x4xf32> -> vector<32x4xf32>
    %69 = arith.addf %64, %68 : vector<32x4xf32>
    %cst_26 = arith.constant 2.000000e+00 : f32
    %70 = vector.broadcast %cst_26 : f32 to vector<32x4xf32>
    %71 = arith.mulf %70, %67 : vector<32x4xf32>
    %72 = arith.subf %71, %59 : vector<32x4xf32>
    %73 = tpu.reciprocal %72 {approx = true} : vector<32x4xf32> -> vector<32x4xf32>
    %74 = arith.addf %69, %73 : vector<32x4xf32>
    %cst_27 = arith.constant 2.000000e+00 : f32
    %75 = vector.broadcast %cst_27 : f32 to vector<32x4xf32>
    %76 = arith.mulf %75, %72 : vector<32x4xf32>
    %77 = arith.subf %76, %59 : vector<32x4xf32>
    %78 = tpu.reciprocal %77 {approx = true} : vector<32x4xf32> -> vector<32x4xf32>
    %79 = arith.addf %74, %78 : vector<32x4xf32>
    %cst_28 = arith.constant 2.000000e+00 : f32
    %80 = vector.broadcast %cst_28 : f32 to vector<32x4xf32>
    %81 = arith.mulf %80, %77 : vector<32x4xf32>
    %82 = arith.subf %81, %59 : vector<32x4xf32>
    %83 = tpu.reciprocal %82 {approx = true} : vector<32x4xf32> -> vector<32x4xf32>
    %84 = arith.addf %79, %83 : vector<32x4xf32>
    %cst_29 = arith.constant 2.000000e+00 : f32
    %85 = vector.broadcast %cst_29 : f32 to vector<32x4xf32>
    %86 = arith.mulf %85, %82 : vector<32x4xf32>
    %87 = arith.subf %86, %59 : vector<32x4xf32>
    %88 = tpu.reciprocal %87 {approx = true} : vector<32x4xf32> -> vector<32x4xf32>
    %89 = arith.addf %84, %88 : vector<32x4xf32>
    %cst_30 = arith.constant 2.000000e+00 : f32
    %90 = vector.broadcast %cst_30 : f32 to vector<32x4xf32>
    %91 = arith.mulf %90, %87 : vector<32x4xf32>
    %92 = arith.subf %91, %59 : vector<32x4xf32>
    %93 = tpu.reciprocal %92 {approx = true} : vector<32x4xf32> -> vector<32x4xf32>
    %94 = arith.addf %89, %93 : vector<32x4xf32>
    %cst_31 = arith.constant 2.000000e+00 : f32
    %95 = vector.broadcast %cst_31 : f32 to vector<32x4xf32>
    %96 = arith.mulf %95, %92 : vector<32x4xf32>
    %97 = arith.subf %96, %59 : vector<32x4xf32>
    %98 = tpu.reciprocal %97 {approx = true} : vector<32x4xf32> -> vector<32x4xf32>
    %99 = arith.addf %94, %98 : vector<32x4xf32>
    %cst_32 = arith.constant 2.000000e+00 : f32
    %100 = vector.broadcast %cst_32 : f32 to vector<32x4xf32>
    %101 = arith.mulf %100, %97 : vector<32x4xf32>
    %102 = arith.subf %101, %59 : vector<32x4xf32>
    %103 = tpu.reciprocal %102 {approx = true} : vector<32x4xf32> -> vector<32x4xf32>
    %104 = arith.addf %99, %103 : vector<32x4xf32>
    %cst_33 = arith.constant 2.000000e+00 : f32
    %105 = vector.broadcast %cst_33 : f32 to vector<32x4xf32>
    %106 = arith.mulf %105, %102 : vector<32x4xf32>
    %107 = arith.subf %106, %59 : vector<32x4xf32>
    %108 = tpu.reciprocal %107 {approx = true} : vector<32x4xf32> -> vector<32x4xf32>
    %109 = arith.addf %104, %108 : vector<32x4xf32>
    %110 = arith.mulf %59, %109 : vector<32x4xf32>
    %cst_34 = arith.constant 1.000000e-01 : f32
    %111 = vector.broadcast %cst_34 : f32 to vector<32x4xf32>
    %112 = arith.mulf %110, %111 : vector<32x4xf32>
    %cst_35 = arith.constant 1.600000e+01 : f32
    %113 = vector.broadcast %cst_35 : f32 to vector<32x4xf32>
    %114 = arith.subf %113, %55 : vector<32x4xf32>
    %115 = arith.subf %114, %56 : vector<32x4xf32>
    %116 = arith.addf %115, %52 : vector<32x4xf32>
    %cst_36 = arith.constant 2.000000e+00 : f32
    %117 = vector.broadcast %cst_36 : f32 to vector<32x4xf32>
    %118 = arith.mulf %117, %55 : vector<32x4xf32>
    %cst_37 = arith.constant 1.600000e+01 : f32
    %119 = vector.broadcast %cst_37 : f32 to vector<32x4xf32>
    %120 = arith.subf %119, %118 : vector<32x4xf32>
    %121 = arith.addf %120, %53 : vector<32x4xf32>
    %cst_38 = arith.constant 2.000000e+00 : f32
    %122 = vector.broadcast %cst_38 : f32 to vector<32x4xf32>
    %123 = arith.mulf %122, %56 : vector<32x4xf32>
    %cst_39 = arith.constant 1.600000e+01 : f32
    %124 = vector.broadcast %cst_39 : f32 to vector<32x4xf32>
    %125 = arith.subf %124, %123 : vector<32x4xf32>
    %126 = arith.addf %125, %54 : vector<32x4xf32>
    %127 = arith.addf %121, %126 : vector<32x4xf32>
    %cst_40 = arith.constant 9.99999974E-6 : f32
    %128 = vector.broadcast %cst_40 : f32 to vector<32x4xf32>
    %129 = arith.addf %116, %128 : vector<32x4xf32>
    %cst_41 = arith.constant 2.000000e+00 : f32
    %130 = vector.broadcast %cst_41 : f32 to vector<32x4xf32>
    %131 = arith.mulf %130, %116 : vector<32x4xf32>
    %132 = arith.subf %127, %131 : vector<32x4xf32>
    %133 = arith.addf %132, %129 : vector<32x4xf32>
    %134 = tpu.reciprocal %133 {approx = true} : vector<32x4xf32> -> vector<32x4xf32>
    %cst_42 = arith.constant 2.000000e+00 : f32
    %135 = vector.broadcast %cst_42 : f32 to vector<32x4xf32>
    %136 = arith.mulf %135, %133 : vector<32x4xf32>
    %137 = arith.subf %136, %129 : vector<32x4xf32>
    %138 = tpu.reciprocal %137 {approx = true} : vector<32x4xf32> -> vector<32x4xf32>
    %139 = arith.addf %134, %138 : vector<32x4xf32>
    %cst_43 = arith.constant 2.000000e+00 : f32
    %140 = vector.broadcast %cst_43 : f32 to vector<32x4xf32>
    %141 = arith.mulf %140, %137 : vector<32x4xf32>
    %142 = arith.subf %141, %129 : vector<32x4xf32>
    %143 = tpu.reciprocal %142 {approx = true} : vector<32x4xf32> -> vector<32x4xf32>
    %144 = arith.addf %139, %143 : vector<32x4xf32>
    %cst_44 = arith.constant 2.000000e+00 : f32
    %145 = vector.broadcast %cst_44 : f32 to vector<32x4xf32>
    %146 = arith.mulf %145, %142 : vector<32x4xf32>
    %147 = arith.subf %146, %129 : vector<32x4xf32>
    %148 = tpu.reciprocal %147 {approx = true} : vector<32x4xf32> -> vector<32x4xf32>
    %149 = arith.addf %144, %148 : vector<32x4xf32>
    %cst_45 = arith.constant 2.000000e+00 : f32
    %150 = vector.broadcast %cst_45 : f32 to vector<32x4xf32>
    %151 = arith.mulf %150, %147 : vector<32x4xf32>
    %152 = arith.subf %151, %129 : vector<32x4xf32>
    %153 = tpu.reciprocal %152 {approx = true} : vector<32x4xf32> -> vector<32x4xf32>
    %154 = arith.addf %149, %153 : vector<32x4xf32>
    %cst_46 = arith.constant 2.000000e+00 : f32
    %155 = vector.broadcast %cst_46 : f32 to vector<32x4xf32>
    %156 = arith.mulf %155, %152 : vector<32x4xf32>
    %157 = arith.subf %156, %129 : vector<32x4xf32>
    %158 = tpu.reciprocal %157 {approx = true} : vector<32x4xf32> -> vector<32x4xf32>
    %159 = arith.addf %154, %158 : vector<32x4xf32>
    %cst_47 = arith.constant 2.000000e+00 : f32
    %160 = vector.broadcast %cst_47 : f32 to vector<32x4xf32>
    %161 = arith.mulf %160, %157 : vector<32x4xf32>
    %162 = arith.subf %161, %129 : vector<32x4xf32>
    %163 = tpu.reciprocal %162 {approx = true} : vector<32x4xf32> -> vector<32x4xf32>
    %164 = arith.addf %159, %163 : vector<32x4xf32>
    %cst_48 = arith.constant 2.000000e+00 : f32
    %165 = vector.broadcast %cst_48 : f32 to vector<32x4xf32>
    %166 = arith.mulf %165, %162 : vector<32x4xf32>
    %167 = arith.subf %166, %129 : vector<32x4xf32>
    %168 = tpu.reciprocal %167 {approx = true} : vector<32x4xf32> -> vector<32x4xf32>
    %169 = arith.addf %164, %168 : vector<32x4xf32>
    %cst_49 = arith.constant 2.000000e+00 : f32
    %170 = vector.broadcast %cst_49 : f32 to vector<32x4xf32>
    %171 = arith.mulf %170, %167 : vector<32x4xf32>
    %172 = arith.subf %171, %129 : vector<32x4xf32>
    %173 = tpu.reciprocal %172 {approx = true} : vector<32x4xf32> -> vector<32x4xf32>
    %174 = arith.addf %169, %173 : vector<32x4xf32>
    %cst_50 = arith.constant 2.000000e+00 : f32
    %175 = vector.broadcast %cst_50 : f32 to vector<32x4xf32>
    %176 = arith.mulf %175, %172 : vector<32x4xf32>
    %177 = arith.subf %176, %129 : vector<32x4xf32>
    %178 = tpu.reciprocal %177 {approx = true} : vector<32x4xf32> -> vector<32x4xf32>
    %179 = arith.addf %174, %178 : vector<32x4xf32>
    %180 = arith.mulf %129, %179 : vector<32x4xf32>
    %cst_51 = arith.constant 1.000000e-01 : f32
    %181 = vector.broadcast %cst_51 : f32 to vector<32x4xf32>
    %182 = arith.mulf %180, %181 : vector<32x4xf32>
    %183 = arith.addf %112, %182 : vector<32x4xf32>
    %cst_52 = arith.constant 5.000000e-01 : f32
    %184 = vector.broadcast %cst_52 : f32 to vector<32x4xf32>
    %185 = arith.mulf %184, %183 : vector<32x4xf32>
    %c0_53 = arith.constant 0 : index
    %c0_54 = arith.constant 0 : index
    %186 = vector.load %arg7[%c0_53, %c0_54] : memref<4x256xf32, #tpu.memory_space<vmem>>, vector<4x256xf32>
    %cst_55 = arith.constant dense<0.000000e+00> : vector<32x256xf32>
    %187 = tpu.matmul %185, %186, %cst_55 {dimension_numbers = #tpu.dot_dimension_numbers<[1], [0], [0], [1], [0, 0, 1, 1], [], []>} : vector<32x4xf32>, vector<4x256xf32>, vector<32x256xf32> -> vector<32x256xf32>
    %c0_56 = arith.constant 0 : index
    %c0_57 = arith.constant 0 : index
    %188 = vector.load %arg8[%c0_56, %c0_57] : memref<40x160xf32, #tpu.memory_space<vmem>>, vector<40x160xf32>
    %cst_58 = arith.constant dense<0.000000e+00> : vector<40x256xf32>
    %189 = tpu.matmul %188, %47, %cst_58 {dimension_numbers = #tpu.dot_dimension_numbers<[1], [0], [0], [1], [0, 0, 1, 1], [], []>} : vector<40x160xf32>, vector<160x256xf32>, vector<40x256xf32> -> vector<40x256xf32>
    %190 = vector.extract_strided_slice %189 {offsets = [0, 0], sizes = [8, 256], strides = [1, 1]} : vector<40x256xf32> to vector<8x256xf32>
    %191 = vector.extract_strided_slice %189 {offsets = [8, 0], sizes = [8, 256], strides = [1, 1]} : vector<40x256xf32> to vector<8x256xf32>
    %192 = vector.extract_strided_slice %189 {offsets = [16, 0], sizes = [8, 256], strides = [1, 1]} : vector<40x256xf32> to vector<8x256xf32>
    %193 = vector.extract_strided_slice %189 {offsets = [24, 0], sizes = [8, 256], strides = [1, 1]} : vector<40x256xf32> to vector<8x256xf32>
    %194 = vector.extract_strided_slice %189 {offsets = [32, 0], sizes = [8, 256], strides = [1, 1]} : vector<40x256xf32> to vector<8x256xf32>
    %195 = arith.addf %191, %192 : vector<8x256xf32>
    %cst_59 = arith.constant 9.99999974E-6 : f32
    %196 = vector.broadcast %cst_59 : f32 to vector<8x256xf32>
    %197 = arith.addf %190, %196 : vector<8x256xf32>
    %cst_60 = arith.constant 2.000000e+00 : f32
    %198 = vector.broadcast %cst_60 : f32 to vector<8x256xf32>
    %199 = arith.mulf %198, %190 : vector<8x256xf32>
    %200 = arith.subf %195, %199 : vector<8x256xf32>
    %201 = arith.addf %200, %197 : vector<8x256xf32>
    %202 = tpu.reciprocal %201 {approx = true} : vector<8x256xf32> -> vector<8x256xf32>
    %cst_61 = arith.constant 2.000000e+00 : f32
    %203 = vector.broadcast %cst_61 : f32 to vector<8x256xf32>
    %204 = arith.mulf %203, %201 : vector<8x256xf32>
    %205 = arith.subf %204, %197 : vector<8x256xf32>
    %206 = tpu.reciprocal %205 {approx = true} : vector<8x256xf32> -> vector<8x256xf32>
    %207 = arith.addf %202, %206 : vector<8x256xf32>
    %cst_62 = arith.constant 2.000000e+00 : f32
    %208 = vector.broadcast %cst_62 : f32 to vector<8x256xf32>
    %209 = arith.mulf %208, %205 : vector<8x256xf32>
    %210 = arith.subf %209, %197 : vector<8x256xf32>
    %211 = tpu.reciprocal %210 {approx = true} : vector<8x256xf32> -> vector<8x256xf32>
    %212 = arith.addf %207, %211 : vector<8x256xf32>
    %cst_63 = arith.constant 2.000000e+00 : f32
    %213 = vector.broadcast %cst_63 : f32 to vector<8x256xf32>
    %214 = arith.mulf %213, %210 : vector<8x256xf32>
    %215 = arith.subf %214, %197 : vector<8x256xf32>
    %216 = tpu.reciprocal %215 {approx = true} : vector<8x256xf32> -> vector<8x256xf32>
    %217 = arith.addf %212, %216 : vector<8x256xf32>
    %cst_64 = arith.constant 2.000000e+00 : f32
    %218 = vector.broadcast %cst_64 : f32 to vector<8x256xf32>
    %219 = arith.mulf %218, %215 : vector<8x256xf32>
    %220 = arith.subf %219, %197 : vector<8x256xf32>
    %221 = tpu.reciprocal %220 {approx = true} : vector<8x256xf32> -> vector<8x256xf32>
    %222 = arith.addf %217, %221 : vector<8x256xf32>
    %cst_65 = arith.constant 2.000000e+00 : f32
    %223 = vector.broadcast %cst_65 : f32 to vector<8x256xf32>
    %224 = arith.mulf %223, %220 : vector<8x256xf32>
    %225 = arith.subf %224, %197 : vector<8x256xf32>
    %226 = tpu.reciprocal %225 {approx = true} : vector<8x256xf32> -> vector<8x256xf32>
    %227 = arith.addf %222, %226 : vector<8x256xf32>
    %cst_66 = arith.constant 2.000000e+00 : f32
    %228 = vector.broadcast %cst_66 : f32 to vector<8x256xf32>
    %229 = arith.mulf %228, %225 : vector<8x256xf32>
    %230 = arith.subf %229, %197 : vector<8x256xf32>
    %231 = tpu.reciprocal %230 {approx = true} : vector<8x256xf32> -> vector<8x256xf32>
    %232 = arith.addf %227, %231 : vector<8x256xf32>
    %cst_67 = arith.constant 2.000000e+00 : f32
    %233 = vector.broadcast %cst_67 : f32 to vector<8x256xf32>
    %234 = arith.mulf %233, %230 : vector<8x256xf32>
    %235 = arith.subf %234, %197 : vector<8x256xf32>
    %236 = tpu.reciprocal %235 {approx = true} : vector<8x256xf32> -> vector<8x256xf32>
    %237 = arith.addf %232, %236 : vector<8x256xf32>
    %cst_68 = arith.constant 2.000000e+00 : f32
    %238 = vector.broadcast %cst_68 : f32 to vector<8x256xf32>
    %239 = arith.mulf %238, %235 : vector<8x256xf32>
    %240 = arith.subf %239, %197 : vector<8x256xf32>
    %241 = tpu.reciprocal %240 {approx = true} : vector<8x256xf32> -> vector<8x256xf32>
    %242 = arith.addf %237, %241 : vector<8x256xf32>
    %cst_69 = arith.constant 2.000000e+00 : f32
    %243 = vector.broadcast %cst_69 : f32 to vector<8x256xf32>
    %244 = arith.mulf %243, %240 : vector<8x256xf32>
    %245 = arith.subf %244, %197 : vector<8x256xf32>
    %246 = tpu.reciprocal %245 {approx = true} : vector<8x256xf32> -> vector<8x256xf32>
    %247 = arith.addf %242, %246 : vector<8x256xf32>
    %248 = arith.mulf %197, %247 : vector<8x256xf32>
    %cst_70 = arith.constant 1.000000e-01 : f32
    %249 = vector.broadcast %cst_70 : f32 to vector<8x256xf32>
    %250 = arith.mulf %248, %249 : vector<8x256xf32>
    %cst_71 = arith.constant 4.000000e+00 : f32
    %251 = vector.broadcast %cst_71 : f32 to vector<8x256xf32>
    %252 = arith.subf %251, %193 : vector<8x256xf32>
    %253 = arith.subf %252, %194 : vector<8x256xf32>
    %254 = arith.addf %253, %190 : vector<8x256xf32>
    %cst_72 = arith.constant 2.000000e+00 : f32
    %255 = vector.broadcast %cst_72 : f32 to vector<8x256xf32>
    %256 = arith.mulf %255, %193 : vector<8x256xf32>
    %cst_73 = arith.constant 4.000000e+00 : f32
    %257 = vector.broadcast %cst_73 : f32 to vector<8x256xf32>
    %258 = arith.subf %257, %256 : vector<8x256xf32>
    %259 = arith.addf %258, %191 : vector<8x256xf32>
    %cst_74 = arith.constant 2.000000e+00 : f32
    %260 = vector.broadcast %cst_74 : f32 to vector<8x256xf32>
    %261 = arith.mulf %260, %194 : vector<8x256xf32>
    %cst_75 = arith.constant 4.000000e+00 : f32
    %262 = vector.broadcast %cst_75 : f32 to vector<8x256xf32>
    %263 = arith.subf %262, %261 : vector<8x256xf32>
    %264 = arith.addf %263, %192 : vector<8x256xf32>
    %265 = arith.addf %259, %264 : vector<8x256xf32>
    %cst_76 = arith.constant 9.99999974E-6 : f32
    %266 = vector.broadcast %cst_76 : f32 to vector<8x256xf32>
    %267 = arith.addf %254, %266 : vector<8x256xf32>
    %cst_77 = arith.constant 2.000000e+00 : f32
    %268 = vector.broadcast %cst_77 : f32 to vector<8x256xf32>
    %269 = arith.mulf %268, %254 : vector<8x256xf32>
    %270 = arith.subf %265, %269 : vector<8x256xf32>
    %271 = arith.addf %270, %267 : vector<8x256xf32>
    %272 = tpu.reciprocal %271 {approx = true} : vector<8x256xf32> -> vector<8x256xf32>
    %cst_78 = arith.constant 2.000000e+00 : f32
    %273 = vector.broadcast %cst_78 : f32 to vector<8x256xf32>
    %274 = arith.mulf %273, %271 : vector<8x256xf32>
    %275 = arith.subf %274, %267 : vector<8x256xf32>
    %276 = tpu.reciprocal %275 {approx = true} : vector<8x256xf32> -> vector<8x256xf32>
    %277 = arith.addf %272, %276 : vector<8x256xf32>
    %cst_79 = arith.constant 2.000000e+00 : f32
    %278 = vector.broadcast %cst_79 : f32 to vector<8x256xf32>
    %279 = arith.mulf %278, %275 : vector<8x256xf32>
    %280 = arith.subf %279, %267 : vector<8x256xf32>
    %281 = tpu.reciprocal %280 {approx = true} : vector<8x256xf32> -> vector<8x256xf32>
    %282 = arith.addf %277, %281 : vector<8x256xf32>
    %cst_80 = arith.constant 2.000000e+00 : f32
    %283 = vector.broadcast %cst_80 : f32 to vector<8x256xf32>
    %284 = arith.mulf %283, %280 : vector<8x256xf32>
    %285 = arith.subf %284, %267 : vector<8x256xf32>
    %286 = tpu.reciprocal %285 {approx = true} : vector<8x256xf32> -> vector<8x256xf32>
    %287 = arith.addf %282, %286 : vector<8x256xf32>
    %cst_81 = arith.constant 2.000000e+00 : f32
    %288 = vector.broadcast %cst_81 : f32 to vector<8x256xf32>
    %289 = arith.mulf %288, %285 : vector<8x256xf32>
    %290 = arith.subf %289, %267 : vector<8x256xf32>
    %291 = tpu.reciprocal %290 {approx = true} : vector<8x256xf32> -> vector<8x256xf32>
    %292 = arith.addf %287, %291 : vector<8x256xf32>
    %cst_82 = arith.constant 2.000000e+00 : f32
    %293 = vector.broadcast %cst_82 : f32 to vector<8x256xf32>
    %294 = arith.mulf %293, %290 : vector<8x256xf32>
    %295 = arith.subf %294, %267 : vector<8x256xf32>
    %296 = tpu.reciprocal %295 {approx = true} : vector<8x256xf32> -> vector<8x256xf32>
    %297 = arith.addf %292, %296 : vector<8x256xf32>
    %cst_83 = arith.constant 2.000000e+00 : f32
    %298 = vector.broadcast %cst_83 : f32 to vector<8x256xf32>
    %299 = arith.mulf %298, %295 : vector<8x256xf32>
    %300 = arith.subf %299, %267 : vector<8x256xf32>
    %301 = tpu.reciprocal %300 {approx = true} : vector<8x256xf32> -> vector<8x256xf32>
    %302 = arith.addf %297, %301 : vector<8x256xf32>
    %cst_84 = arith.constant 2.000000e+00 : f32
    %303 = vector.broadcast %cst_84 : f32 to vector<8x256xf32>
    %304 = arith.mulf %303, %300 : vector<8x256xf32>
    %305 = arith.subf %304, %267 : vector<8x256xf32>
    %306 = tpu.reciprocal %305 {approx = true} : vector<8x256xf32> -> vector<8x256xf32>
    %307 = arith.addf %302, %306 : vector<8x256xf32>
    %cst_85 = arith.constant 2.000000e+00 : f32
    %308 = vector.broadcast %cst_85 : f32 to vector<8x256xf32>
    %309 = arith.mulf %308, %305 : vector<8x256xf32>
    %310 = arith.subf %309, %267 : vector<8x256xf32>
    %311 = tpu.reciprocal %310 {approx = true} : vector<8x256xf32> -> vector<8x256xf32>
    %312 = arith.addf %307, %311 : vector<8x256xf32>
    %cst_86 = arith.constant 2.000000e+00 : f32
    %313 = vector.broadcast %cst_86 : f32 to vector<8x256xf32>
    %314 = arith.mulf %313, %310 : vector<8x256xf32>
    %315 = arith.subf %314, %267 : vector<8x256xf32>
    %316 = tpu.reciprocal %315 {approx = true} : vector<8x256xf32> -> vector<8x256xf32>
    %317 = arith.addf %312, %316 : vector<8x256xf32>
    %318 = arith.mulf %267, %317 : vector<8x256xf32>
    %cst_87 = arith.constant 1.000000e-01 : f32
    %319 = vector.broadcast %cst_87 : f32 to vector<8x256xf32>
    %320 = arith.mulf %318, %319 : vector<8x256xf32>
    %321 = arith.addf %250, %320 : vector<8x256xf32>
    %cst_88 = arith.constant 5.000000e-01 : f32
    %322 = vector.broadcast %cst_88 : f32 to vector<8x256xf32>
    %323 = arith.mulf %322, %321 : vector<8x256xf32>
    %c0_89 = arith.constant 0 : index
    %c0_90 = arith.constant 0 : index
    %324 = vector.load %arg9[%c0_89, %c0_90] : memref<32x8xf32, #tpu.memory_space<vmem>>, vector<32x8xf32>
    %cst_91 = arith.constant dense<0.000000e+00> : vector<32x256xf32>
    %325 = tpu.matmul %324, %323, %cst_91 {dimension_numbers = #tpu.dot_dimension_numbers<[1], [0], [0], [1], [0, 0, 1, 1], [], []>} : vector<32x8xf32>, vector<8x256xf32>, vector<32x256xf32> -> vector<32x256xf32>
    %326 = arith.addf %187, %325 : vector<32x256xf32>
    %cst_92 = arith.constant 5.000000e-01 : f32
    %327 = vector.broadcast %cst_92 : f32 to vector<32x256xf32>
    %328 = arith.mulf %327, %326 : vector<32x256xf32>
    %329 = arith.mulf %328, %43 : vector<32x256xf32>
    %c0_93 = arith.constant 0 : index
    %c0_94 = arith.constant 0 : index
    %330 = vector.load %arg5[%c0_93, %c0_94] : memref<32x2xf32, #tpu.memory_space<vmem>>, vector<32x2xf32>
    %c0_95 = arith.constant 0 : index
    %c0_96 = arith.constant 0 : index
    %331 = vector.load %arg10[%c0_95, %c0_96] : memref<24x96xf32, #tpu.memory_space<vmem>>, vector<8x32xf32>
    %c0_97 = arith.constant 0 : index
    %c0_98 = arith.constant 0 : index
    %332 = vector.load %arg11[%c0_97, %c0_98] : memref<96x24xf32, #tpu.memory_space<vmem>>, vector<32x8xf32>
    %333 = vector.extract_strided_slice %330 {offsets = [0, 0], sizes = [32, 1], strides = [1, 1]} : vector<32x2xf32> to vector<32x1xf32>
    %334 = vector.extract_strided_slice %330 {offsets = [0, 1], sizes = [32, 1], strides = [1, 1]} : vector<32x2xf32> to vector<32x1xf32>
    %cst_99 = arith.constant dense<0.000000e+00> : vector<32xf32>
    %335 = vector.multi_reduction <add>, %329, %cst_99 [1] : vector<32x256xf32> to vector<32xf32>
    %336 = vector.shape_cast %335 : vector<32xf32> to vector<32x1xf32>
    %337 = arith.mulf %329, %329 : vector<32x256xf32>
    %cst_100 = arith.constant dense<0.000000e+00> : vector<32xf32>
    %338 = vector.multi_reduction <add>, %337, %cst_100 [1] : vector<32x256xf32> to vector<32xf32>
    %339 = vector.shape_cast %338 : vector<32xf32> to vector<32x1xf32>
    %340 = tpu.concatenate %336, %339 in 1 : vector<32x1xf32>, vector<32x1xf32> -> vector<32x2xf32>
    %cst_101 = arith.constant dense<0.000000e+00> : vector<8x2xf32>
    %341 = tpu.matmul %331, %340, %cst_101 {dimension_numbers = #tpu.dot_dimension_numbers<[1], [0], [0], [1], [0, 0, 1, 1], [], []>} : vector<8x32xf32>, vector<32x2xf32>, vector<8x2xf32> -> vector<8x2xf32>
    %cst_102 = arith.constant 9.765625E-4 : f32
    %342 = vector.broadcast %cst_102 : f32 to vector<8x2xf32>
    %343 = arith.mulf %341, %342 : vector<8x2xf32>
    %cst_103 = arith.constant dense<0.000000e+00> : vector<32x2xf32>
    %344 = tpu.matmul %332, %343, %cst_103 {dimension_numbers = #tpu.dot_dimension_numbers<[1], [0], [0], [1], [0, 0, 1, 1], [], []>} : vector<32x8xf32>, vector<8x2xf32>, vector<32x2xf32> -> vector<32x2xf32>
    %345 = vector.extract_strided_slice %344 {offsets = [0, 0], sizes = [32, 1], strides = [1, 1]} : vector<32x2xf32> to vector<32x1xf32>
    %346 = vector.extract_strided_slice %344 {offsets = [0, 1], sizes = [32, 1], strides = [1, 1]} : vector<32x2xf32> to vector<32x1xf32>
    %347 = arith.mulf %345, %345 : vector<32x1xf32>
    %348 = arith.subf %346, %347 : vector<32x1xf32>
    %cst_104 = arith.constant 9.99999974E-6 : f32
    %349 = vector.broadcast %cst_104 : f32 to vector<32x1xf32>
    %350 = arith.addf %348, %349 : vector<32x1xf32>
    %351 = math.rsqrt %350 : vector<32x1xf32>
    %352 = arith.mulf %351, %333 : vector<32x1xf32>
    %353 = arith.mulf %345, %352 : vector<32x1xf32>
    %354 = arith.subf %334, %353 : vector<32x1xf32>
    %355 = vector.broadcast %352 : vector<32x1xf32> to vector<32x256xf32>
    %356 = arith.mulf %329, %355 : vector<32x256xf32>
    %357 = vector.broadcast %354 : vector<32x1xf32> to vector<32x256xf32>
    %358 = arith.addf %356, %357 : vector<32x256xf32>
    %c0_105 = arith.constant 0 : index
    %c0_106 = arith.constant 0 : index
    %c0_107 = arith.constant 0 : index
    %359 = vector.load %arg12[%c0_105, %c0_106, %c0_107] : memref<1x32x256xf32, #tpu.memory_space<vmem>>, vector<1x32x256xf32>
    %360 = vector.shape_cast %359 : vector<1x32x256xf32> to vector<32x256xf32>
    %361 = vector.shape_cast %358 : vector<32x256xf32> to vector<1x32x256xf32>
    tpu.vector_store %arg12[%c0_105, %c0_106, %c0_107], %361 {strides = array<i32>} : memref<1x32x256xf32, #tpu.memory_space<vmem>>, vector<1x32x256xf32>,
    return
  }
  func.func @transform_0(%arg0: i32) -> (i32, i32, i32) {
    %c0_i32 = arith.constant 0 : i32
    %c0_i32_0 = arith.constant 0 : i32
    %c0_i32_1 = arith.constant 0 : i32
    return %arg0, %c0_i32, %c0_i32_0 : i32, i32, i32
  }
  func.func @transform_1(%arg0: i32) -> (i32, i32) {
    %c0_i32 = arith.constant 0 : i32
    %c0_i32_0 = arith.constant 0 : i32
    %c0_i32_1 = arith.constant 0 : i32
    return %c0_i32, %c0_i32_0 : i32, i32
  }
  func.func @transform_2(%arg0: i32) -> (i32, i32) {
    %c0_i32 = arith.constant 0 : i32
    %c0_i32_0 = arith.constant 0 : i32
    %c0_i32_1 = arith.constant 0 : i32
    return %c0_i32, %c0_i32_0 : i32, i32
  }
  func.func @transform_3(%arg0: i32) -> (i32, i32) {
    %c0_i32 = arith.constant 0 : i32
    %c0_i32_0 = arith.constant 0 : i32
    %c0_i32_1 = arith.constant 0 : i32
    return %c0_i32, %c0_i32_0 : i32, i32
  }
  func.func @transform_4(%arg0: i32) -> (i32, i32) {
    %c0_i32 = arith.constant 0 : i32
    %c0_i32_0 = arith.constant 0 : i32
    %c0_i32_1 = arith.constant 0 : i32
    return %c0_i32, %c0_i32_0 : i32, i32
  }
  func.func @transform_5(%arg0: i32) -> (i32, i32) {
    %c0_i32 = arith.constant 0 : i32
    %c0_i32_0 = arith.constant 0 : i32
    %c0_i32_1 = arith.constant 0 : i32
    return %c0_i32, %c0_i32_0 : i32, i32
  }
  func.func @transform_6(%arg0: i32) -> (i32, i32) {
    %c0_i32 = arith.constant 0 : i32
    %c0_i32_0 = arith.constant 0 : i32
    %c0_i32_1 = arith.constant 0 : i32
    return %c0_i32, %c0_i32_0 : i32, i32
  }
  func.func @transform_7(%arg0: i32) -> (i32, i32) {
    %c0_i32 = arith.constant 0 : i32
    %c0_i32_0 = arith.constant 0 : i32
    %c0_i32_1 = arith.constant 0 : i32
    return %c0_i32, %c0_i32_0 : i32, i32
  }
  func.func @transform_8(%arg0: i32) -> (i32, i32) {
    %c0_i32 = arith.constant 0 : i32
    %c0_i32_0 = arith.constant 0 : i32
    %c0_i32_1 = arith.constant 0 : i32
    return %c0_i32, %c0_i32_0 : i32, i32
  }
  func.func @transform_9(%arg0: i32) -> (i32, i32) {
    %c0_i32 = arith.constant 0 : i32
    %c0_i32_0 = arith.constant 0 : i32
    %c0_i32_1 = arith.constant 0 : i32
    return %c0_i32, %c0_i32_0 : i32, i32
  }
  func.func @transform_10(%arg0: i32) -> (i32, i32) {
    %c0_i32 = arith.constant 0 : i32
    %c0_i32_0 = arith.constant 0 : i32
    %c0_i32_1 = arith.constant 0 : i32
    return %c0_i32, %c0_i32_0 : i32, i32
  }
  func.func @transform_11(%arg0: i32) -> (i32, i32, i32) {
    %c0_i32 = arith.constant 0 : i32
    %c0_i32_0 = arith.constant 0 : i32
    %c0_i32_1 = arith.constant 0 : i32
    return %arg0, %c0_i32, %c0_i32_0 : i32, i32, i32
  }
}

</mosaic_0001>

<bundles_post_ra>
// kernel: ptattention3d_tchw.1
= control target key start
LH: loop header
LB: loop body
LE: loop exit
PB: predicated region body
PF: predicated region fallthrough
CT: control target
= control target key end

     0   :  { %s3995_s17 = smov 0   ;;  %s6238_s0 = inlined_call_operand.vmem [shape: bf16[2,32,256], index: 0, kind: input, shape index: {}]   ;;  %s6239_s1 = inlined_call_operand.vmem [shape: bf16[96,32], index: 1, kind: input, shape index: {}]   ;;  %s6240_s2 = inlined_call_operand.vmem [shape: f32[96,1], index: 2, kind: input, shape index: {}]   ;;  %s6241_s3 = inlined_call_operand.vmem [shape: f32[96,2], index: 3, kind: input, shape index: {}]   ;;  %s6242_s4 = inlined_call_operand.vmem [shape: f32[32,2], index: 4, kind: input, shape index: {}]   ;;  %s6243_s5 = inlined_call_operand.vmem [shape: f32[256,4], index: 5, kind: input, shape index: {}]   ;;  %s6244_s6 = inlined_call_operand.vmem [shape: f32[4,256], index: 6, kind: input, shape index: {}]   ;;  %s6245_s7 = inlined_call_operand.vmem [shape: f32[40,160], index: 7, kind: input, shape index: {}]   ;;  %s6246_s8 = inlined_call_operand.vmem [shape: f32[32,8], index: 8, kind: input, shape index: {}]   ;;  %s6247_s9 = inlined_call_operand.vmem [shape: f32[24,96], index: 9, kind: input, shape index: {}]   ;;  %s6248_s10 = inlined_call_operand.vmem [shape: f32[96,24], index: 10, kind: input, shape index: {}]   ;;  %s6249_s11 = inlined_call_operand.vmem [shape: f32[2,32,256], index: 11, kind: output, shape index: {}]  }
   0x1 LB: > { %s3386_s18 = sadd.s32 4294967295, %s3929_s17   ;;  %p3390_p0 = scmp.ge.s32.totalorder %s3929_s17, 1  ;;  %s3929_s17 = sphi %s3995_s17, %s21_s17  }
   0x2   : > { %p337_p1 = scmp.lt.s32.totalorder %s3929_s17, 3 }
   0x4   : > { %p338_p2 = pnand %p3390_p0, %p337_p1 }
   0x6   : > { %341 = sbr.rel (%p338_p2) target bundleno = 2681 (0xa79), region = 64 }
   0xb   : > { %p377_p3 = scmp.lt.s32.totalorder %s3386_s18, 1  ;;  %v413_v0 = vld [vmem:[%s6240_s2 + $0x48] sm:$0xff]  ;;  %v415_v1 = vld [vmem:[%s6240_s2 + $0x58] sm:$0xff]  ;;  %v3931_v2 = vmov 0   ;;  %v412_v4 = vld [vmem:[%s6240_s2 + $0x40] sm:$0xff]  ;;  %vm526_vm0 = vcmask 261120  }
   0xc   : > { %3546 = vset.pattern.permute.xlu1 %v3931_v2  ;;  %3545 = vset.pattern.permute.xlu0 %v3931_v2  ;;  %v411_v3 = vld [vmem:[%s6240_s2 + $0x38] sm:$0xff]  ;;  %v414_v15 = vld [vmem:[%s6240_s2 + $0x50] sm:$0xff]  ;;  %v3523_v19 = vld [vmem:[%s6239_s1] sm:$0xff]  ;;  %vm746_vm1 = vcmask 7168   ;;  %vm759_vm2 = vcmask 785408   ;;  %vm798_vm3 = vcmask 195584  }
   0xd   : > { %s6330_s18 = smov (!%p377_p3, %s3386_s18), 1  ;;  %463 = vperm.xlu1 %3546, %v413_v0   ;;  %473 = vperm.xlu0 %3545, %v415_v1   ;;  %v410_v17 = vld [vmem:[%s6240_s2 + $0x30] sm:$0xff]  ;;  %v408_v20 = vld [vmem:[%s6240_s2 + $0x20] sm:$0xff]  ;;  %v409_v21 = vld [vmem:[%s6240_s2 + $0x28] sm:$0xff]  ;;  %s3932_s30 = smov 1  }
   0xe   : > { %3547 = vset.pattern.permute.xlu2 %v3931_v2  ;;  %s3521_s25 = sshll.u32 %s6330_s18, 5  ;;  %v407_v22 = vld [vmem:[%s6240_s2 + $0x18] sm:$0xff]  ;;  %v405_v23 = vld [vmem:[%s6240_s2 + $0x8] sm:$0xff]  ;;  %v406_v24 = vld [vmem:[%s6240_s2 + $0x10] sm:$0xff]  ;;  %s3933_s12 = smov 127  }
   0xf   : > { %453 = vperm.xlu2 %3547, %v411_v3   ;;  %s381_s28 = scalar_lea.vmem %s6238_s0, %s3521_s25  ;;  %v404_v25 = vld [vmem:[%s6240_s2] sm:$0xff]  ;;  %v3524_v26 = vld [vmem:[%s6239_s1 + $0x8] sm:$0xff]  ;;  %v3525_v27 = vld [vmem:[%s6239_s1 + $0x10] sm:$0xff] }
  0x10   : > { %v3429_v5 = vld [vmem:[%s381_s28 + $0x10] sm:$0xf]  ;;  %v3532_v6 = vld [vmem:[%s381_s28 + $0x14] sm:$0xf0]  ;;  %v3531_v7 = vld [vmem:[%s381_s28 + $0x14] sm:$0xf] }
  0x11   : > { %v3430_v8 = vor.u32 %v3532_v6, %v3429_v5  ;;  %v3431_v9 = vld [vmem:[%s381_s28 + $0x18] sm:$0xf0]  ;;  %v3421_v10 = vld [vmem:[%s381_s28] sm:$0xf]  ;;  %v3530_v11 = vld [vmem:[%s381_s28 + $0x4] sm:$0xf0] }
  0x12   : > { %v3434_v12 = vor.u32 %v3531_v7, %v3431_v9  ;;  %v3529_v13 = vld [vmem:[%s381_s28 + $0x4] sm:$0xf]  ;;  %v3423_v14 = vld [vmem:[%s381_s28 + $0x8] sm:$0xf0]  ;;  %v3422_v16 = vor.u32 %v3530_v11, %v3421_v10  ;;  %v3526_v28 = vld [vmem:[%s6239_s1 + $0x18] sm:$0xff] }
  0x13   : > { %551 = vmatpush.bf16.msra.mxu0 %v3430_v8  ;;  %v3426_v18 = vor.u32 %v3529_v13, %v3423_v14  ;;  %v3527_v29 = vld [vmem:[%s6239_s1 + $0x20] sm:$0xff]  ;;  %v3528_v30 = vld [vmem:[%s6239_s1 + $0x28] sm:$0xff] }
  0x14   : > { %590 = vmatpush.bf16.msra.mxu1 %v3434_v12 }
  0x15   : > { %458 = vperm.xlu1 %3546, %v412_v4   ;;  %468 = vperm.xlu0 %3545, %v414_v15  }
  0x17   : > { %448 = vperm.xlu2 %3547, %v410_v17   ;;  %552 = vmatpush.bf16.msra.mxu0 %v3422_v16 }
  0x18   : > { %591 = vmatpush.bf16.msra.mxu1 %v3426_v18 }
  0x1a   : > { %3435 = vmatmul.msk.bf16.vlgmr.msra.gmra.mxu0 %vm526_vm0, %v3523_v19 }
  0x1b   : > { %3441 = vmatmul.msk.bf16.vlgmr.msra.gmra.mxu1 %vm526_vm0, %v3523_v19 }
  0x1d   : > { %438 = vperm.xlu1 %3546, %v408_v20   ;;  %443 = vperm.xlu0 %3545, %v409_v21  }
  0x1f   : > { %433 = vperm.xlu2 %3547, %v407_v22  }
  0x25   : > { %423 = vperm.xlu1 %3546, %v405_v23   ;;  %428 = vperm.xlu0 %3545, %v406_v24  }
  0x27   : > { %418 = vperm.xlu2 %3547, %v404_v25  }
  0x2a   : > { %3436 = vmatmul.msk.bf16.gmra.mxu0 %vm526_vm0, %v3524_v26 }
  0x2b   : > { %3442 = vmatmul.msk.bf16.gmra.mxu1 %vm526_vm0, %v3524_v26 }
  0x3a   : > { %3437 = vmatmul.msk.bf16.gmra.mxu0 %vm526_vm0, %v3525_v27 }
  0x3b   : > { %3443 = vmatmul.msk.bf16.gmra.mxu1 %vm526_vm0, %v3525_v27 }
  0x4a   : > { %3438 = vmatmul.msk.bf16.gmra.mxu0 %vm526_vm0, %v3526_v28 }
  0x4b   : > { %3444 = vmatmul.msk.bf16.gmra.mxu1 %vm526_vm0, %v3526_v28 }
  0x5a   : > { %3439 = vmatmul.msk.bf16.gmra.mxu0 %vm526_vm0, %v3527_v29 }
  0x5b   : > { %3445 = vmatmul.msk.bf16.gmra.mxu1 %vm526_vm0, %v3527_v29 }
  0x69   : > { %v454_v49 = vpop.permute.xlu2 %453 }
  0x6a   : > { %3440 = vmatmul.msk.bf16.gmra.mxu0 %vm526_vm0, %v3528_v30 }
  0x6b   : > { %3446 = vmatmul.msk.bf16.gmra.mxu1 %vm526_vm0, %v3528_v30 }
  0x71   : > { %v449_v59 = vpop.permute.xlu2 %448 }
  0x7f   : > { %v464_v35 = vpop.permute.xlu1 %463  ;;  %v4087_v38 = vpop.permute.xlu0 %473 }
  0x87   : > { %v459_v39 = vpop.permute.xlu1 %458  ;;  %v4093_v42 = vpop.permute.xlu0 %468 }
  0x8f   : > { %v439_v43 = vpop.permute.xlu1 %438  ;;  %v444_v50 = vpop.permute.xlu0 %443 }
  0x97   : > { %v4075_v31 = vpop.f32.mrf.mxu0 }
  0x98   : > { %v4077_v32 = vpop.f32.mrf.mxu1 }
  0x9f   : > { %v4079_v33 = vpop.f32.mrf.mxu0 }
  0xa0   : > { %v4081_v34 = vpop.f32.mrf.mxu1 }
  0xa7   : > { %v4083_v36 = vpop.f32.mrf.mxu0 }
  0xa8   : > { %v4085_v37 = vpop.f32.mrf.mxu1 }
  0xaf   : > { %v4089_v40 = vpop.f32.mrf.mxu0 }
  0xb0   : > { %v4091_v41 = vpop.f32.mrf.mxu1 }
  0xb7   : > { %v564_v44 = vpop.f32.mrf.mxu0 }
  0xb8   : > { %v4095_v45 = vadd.f32 %v564_v44, %v439_v43  ;;  %v603_v46 = vpop.f32.mrf.mxu1 }
  0xb9   : > { %v4097_v47 = vadd.f32 %v603_v46, %v439_v43 }
  0xbb   : > { %v662_v48 = vadd.f32 %v4097_v47, %v4095_v45 }
  0xbd   : > { %663 = vadd.xlane.f32.xlu1 %v662_v48 }
  0xbf   : > { %v566_v51 = vpop.f32.mrf.mxu0 }
  0xc0   : > { %v4101_v52 = vadd.f32 %v566_v51, %v444_v50  ;;  %v605_v53 = vpop.f32.mrf.mxu1 }
  0xc1   : > { %v4103_v54 = vadd.f32 %v605_v53, %v444_v50 }
  0xc2   : > { %v696_v55 = vmul.f32 %v4101_v52, %v4101_v52 }
  0xc3   : > { %v665_v56 = vadd.f32 %v4103_v54, %v4101_v52  ;;  %v697_v57 = vmul.f32 %v4103_v54, %v4103_v54 }
  0xc5   : > { %666 = vadd.xlane.f32.xlu2 %v665_v56  ;;  %v725_v58 = vadd.f32 %v697_v57, %v696_v55  ;;  %v434_v56 = vpop.permute.xlu2 %433 }
  0xc6   : > { %v4176_v57 = vadd.f32 %v4089_v40, %v434_v56 }
  0xc7   : > { %726 = vadd.xlane.f32.xlu0 %v725_v58  ;;  %v569_v60 = vpop.f32.mrf.mxu0  ;;  %v4179_v58 = vadd.f32 %v4091_v41, %v434_v56 }
  0xc8   : > { %v4111_v61 = vadd.f32 %v569_v60, %v449_v59  ;;  %v608_v62 = vpop.f32.mrf.mxu1  ;;  %v695_v60 = vmul.f32 %v4097_v47, %v4097_v47 }
  0xc9   : > { %v4113_v63 = vadd.f32 %v608_v62, %v449_v59  ;;  %v694_v59 = vmul.f32 %v4095_v45, %v4095_v45  ;;  %v429_v62 = vpop.permute.xlu0 %428  ;;  %v693_v40 = vmul.f32 %v4179_v58, %v4179_v58 }
  0xca   : > { %v698_v0 = vmul.f32 %v4111_v61, %v4111_v61  ;;  %v4190_v41 = vadd.f32 %v4083_v36, %v429_v62 }
  0xcb   : > { %v699_v1 = vmul.f32 %v4113_v63, %v4113_v63  ;;  %v668_v2 = vadd.f32 %v4113_v63, %v4111_v61 }
  0xcd   : > { %v728_v3 = vadd.f32 %v699_v1, %v698_v0  ;;  %v692_v0 = vmul.f32 %v4176_v57, %v4176_v57  ;;  %v4193_v1 = vadd.f32 %v4085_v37, %v429_v62 }
  0xcf   : > { %669 = vadd.xlane.f32.xlu0 %v668_v2  ;;  %729 = vadd.xlane.f32.xlu1 %v728_v3  ;;  %v571_v4 = vpop.f32.mrf.mxu0  ;;  %v722_v2 = vadd.f32 %v695_v60, %v694_v59  ;;  %v659_v3 = vadd.f32 %v4179_v58, %v4176_v57 }
  0xd0   : > { %v4121_v5 = vadd.f32 %v571_v4, %v454_v49  ;;  %v610_v6 = vpop.f32.mrf.mxu1  ;;  %v719_v4 = vadd.f32 %v693_v40, %v692_v0 }
  0xd1   : > { %v4123_v7 = vadd.f32 %v610_v6, %v454_v49  ;;  %v424_v6 = vpop.permute.xlu1 %423 }
  0xd2   : > { %v700_v8 = vmul.f32 %v4121_v5, %v4121_v5  ;;  %v4202_v36 = vadd.f32 %v4079_v33, %v424_v6  ;;  %v4205_v37 = vadd.f32 %v4081_v34, %v424_v6 }
  0xd3   : > { %v701_v9 = vmul.f32 %v4123_v7, %v4123_v7  ;;  %v671_v11 = vadd.f32 %v4123_v7, %v4121_v5 }
  0xd4   : > { %v653_v33 = vadd.f32 %v4205_v37, %v4202_v36  ;;  %v688_v34 = vmul.f32 %v4202_v36, %v4202_v36 }
  0xd5   : > { %v731_v10 = vadd.f32 %v701_v9, %v700_v8  ;;  %v690_v8 = vmul.f32 %v4190_v41, %v4190_v41  ;;  %v691_v9 = vmul.f32 %v4193_v1, %v4193_v1 }
  0xd7   : > { %732 = vadd.xlane.f32.xlu2 %v731_v10  ;;  %672 = vadd.xlane.f32.xlu1 %v671_v11  ;;  %v574_v12 = vpop.f32.mrf.mxu0  ;;  %v419_v10 = vpop.permute.xlu2 %418  ;;  %v716_v11 = vadd.f32 %v691_v9, %v690_v8 }
  0xd8   : > { %v4131_v13 = vadd.f32 %v574_v12, %v459_v39  ;;  %v613_v14 = vpop.f32.mrf.mxu1  ;;  %v656_v12 = vadd.f32 %v4193_v1, %v4190_v41 }
  0xd9   : > { %v4133_v15 = vadd.f32 %v613_v14, %v459_v39  ;;  %v4210_v14 = vadd.f32 %v4075_v31, %v419_v10 }
  0xda   : > { %6257 = vst [vmem:[#allocation2_spill] sm:$0xff] %v4131_v13  ;;  %v702_v16 = vmul.f32 %v4131_v13, %v4131_v13 }
  0xdb   : > { %6258 = vst [vmem:[#allocation3_spill] sm:$0xff] %v4133_v15  ;;  %v703_v17 = vmul.f32 %v4133_v15, %v4133_v15  ;;  %v674_v19 = vadd.f32 %v4133_v15, %v4131_v13 }
  0xdd   : > { %v734_v18 = vadd.f32 %v703_v17, %v702_v16  ;;  %v4213_v16 = vadd.f32 %v4077_v32, %v419_v10  ;;  %v689_v17 = vmul.f32 %v4205_v37, %v4205_v37 }
  0xdf   : > { %735 = vadd.xlane.f32.xlu0 %v734_v18  ;;  %675 = vadd.xlane.f32.xlu2 %v674_v19  ;;  %v576_v20 = vpop.f32.mrf.mxu0  ;;  %v686_v18 = vmul.f32 %v4210_v14, %v4210_v14  ;;  %v687_v31 = vmul.f32 %v4213_v16, %v4213_v16  ;;  %v713_v32 = vadd.f32 %v689_v17, %v688_v34 }
  0xe0   : > { %v4141_v21 = vadd.f32 %v576_v20, %v464_v35  ;;  %v615_v22 = vpop.f32.mrf.mxu1  ;;  %v650_v19 = vadd.f32 %v4213_v16, %v4210_v14 }
  0xe1   : > { %v4143_v23 = vadd.f32 %v615_v22, %v464_v35  ;;  %v710_v20 = vadd.f32 %v687_v31, %v686_v18  ;;  %v635_v18 = vld [vmem:[%s6247_s9] sm:$0xff] }
  0xe2   : > { %v704_v24 = vmul.f32 %v4141_v21, %v4141_v21 }
  0xe3   : > { %6259 = vst [vmem:[#allocation4_spill] sm:$0xff] %v4143_v23  ;;  %v705_v25 = vmul.f32 %v4143_v23, %v4143_v23  ;;  %v677_v26 = vadd.f32 %v4143_v23, %v4141_v21 }
  0xe5   : > { %v737_v27 = vadd.f32 %v705_v25, %v704_v24 }
  0xe7   : > { %678 = vadd.xlane.f32.xlu0 %v677_v26  ;;  %738 = vadd.xlane.f32.xlu1 %v737_v27  ;;  %v579_v28 = vpop.f32.mrf.mxu0 }
  0xe8   : > { %v4152_v29 = vadd.f32 %v579_v28, %v4093_v42  ;;  %v618_v30 = vpop.f32.mrf.mxu1 }
  0xe9   : > { %v4155_v35 = vadd.f32 %v618_v30, %v4093_v42 }
  0xea   : > { %6260 = vst [vmem:[#allocation5_spill] sm:$0xff] %v4152_v29  ;;  %v706_v44 = vmul.f32 %v4152_v29, %v4152_v29 }
  0xeb   : > { %6261 = vst [vmem:[#allocation6_spill] sm:$0xff] %v4155_v35  ;;  %v680_v39 = vadd.f32 %v4155_v35, %v4152_v29  ;;  %v707_v46 = vmul.f32 %v4155_v35, %v4155_v35 }
  0xed   : > { %681 = vadd.xlane.f32.xlu2 %v680_v39  ;;  %v740_v53 = vadd.f32 %v707_v46, %v706_v44 }
  0xef   : > { %v581_v43 = vpop.f32.mrf.mxu0 }
  0xf0   : > { %v4164_v48 = vadd.f32 %v581_v43, %v4087_v38  ;;  %v620_v49 = vpop.f32.mrf.mxu1 }
  0xf1   : > { %v4167_v50 = vadd.f32 %v620_v49, %v4087_v38 }
  0xf2   : > { %6262 = vst [vmem:[#allocation7_spill] sm:$0xff] %v4164_v48  ;;  %v708_v42 = vmul.f32 %v4164_v48, %v4164_v48 }
  0xf3   : > { %6263 = vst [vmem:[#allocation8_spill] sm:$0xff] %v4167_v50  ;;  %v683_v51 = vadd.f32 %v4167_v50, %v4164_v48  ;;  %v709_v55 = vmul.f32 %v4167_v50, %v4167_v50 }
  0xf5   : > { %684 = vadd.xlane.f32.xlu0 %v683_v51  ;;  %741 = vadd.xlane.f32.xlu2 %v740_v53  ;;  %v743_v38 = vadd.f32 %v709_v55, %v708_v42 }
  0xf7   : > { %744 = vadd.xlane.f32.xlu1 %v743_v38 }
  0xfd   : > { %723 = vadd.xlane.f32.xlu2 %v722_v2  ;;  %660 = vadd.xlane.f32.xlu0 %v659_v3 }
  0xff   : > { %720 = vadd.xlane.f32.xlu1 %v719_v4 }
 0x105   : > { %717 = vadd.xlane.f32.xlu0 %v716_v11  ;;  %657 = vadd.xlane.f32.xlu2 %v656_v12 }
 0x107   : > { %654 = vadd.xlane.f32.xlu1 %v653_v33 }
 0x10d   : > { %714 = vadd.xlane.f32.xlu2 %v713_v32  ;;  %651 = vadd.xlane.f32.xlu0 %v650_v19  ;;  %v636_v32 = vld [vmem:[%s6247_s9 + $0x8] sm:$0xff]  ;;  %v637_v19 = vld [vmem:[%s6247_s9 + $0x10] sm:$0xff] }
 0x10f   : > { %711 = vadd.xlane.f32.xlu1 %v710_v20 }
 0x130   : > { %v664_v25 = vpop.xlane.xlu1 %663 }
 0x138   : > { %v667_v24 = vpop.xlane.xlu2 %666 }
 0x13a   : > { %v727_v22 = vpop.xlane.xlu0 %726 }
 0x13b   : > { %v752_v3 = vsel %vm746_vm1, %v667_v24, %v727_v22 }
 0x142   : > { %v670_v26 = vpop.xlane.xlu0 %669  ;;  %v730_v28 = vpop.xlane.xlu1 %729 }
 0x143   : > { %v753_v2 = vsel %vm746_vm1, %v670_v26, %v730_v28  ;;  %v638_v28 = vld [vmem:[%s6248_s10] sm:$0xff] }
 0x14a   : > { %v733_v27 = vpop.xlane.xlu2 %732  ;;  %v673_v43 = vpop.xlane.xlu1 %672 }
 0x14b   : > { %v754_v40 = vsel %vm746_vm1, %v673_v43, %v733_v27  ;;  %v641_v43 = vld [vmem:[%s6248_s10 + $0x18] sm:$0xff] }
 0x152   : > { %v736_v30 = vpop.xlane.xlu0 %735  ;;  %v676_v39 = vpop.xlane.xlu2 %675 }
 0x153   : > { %v755_v62 = vsel %vm746_vm1, %v676_v39, %v736_v30  ;;  %v639_v30 = vld [vmem:[%s6248_s10 + $0x8] sm:$0xff]  ;;  %v640_v39 = vld [vmem:[%s6248_s10 + $0x10] sm:$0xff] }
 0x15a   : > { %v679_v44 = vpop.xlane.xlu0 %678  ;;  %v739_v49 = vpop.xlane.xlu1 %738 }
 0x15b   : > { %v756_v38 = vsel %vm746_vm1, %v679_v44, %v739_v49  ;;  %v642_v44 = vld [vmem:[%s6248_s10 + $0x20] sm:$0xff]  ;;  %v644_v49 = vld [vmem:[%s6248_s10 + $0x30] sm:$0xff] }
 0x160   : > { %v682_v46 = vpop.xlane.xlu2 %681 }
 0x168   : > { %v685_v42 = vpop.xlane.xlu0 %684  ;;  %v742_v51 = vpop.xlane.xlu2 %741 }
 0x169   : > { %v757_v56 = vsel %vm746_vm1, %v682_v46, %v742_v51  ;;  %v643_v46 = vld [vmem:[%s6248_s10 + $0x28] sm:$0xff] }
 0x16a   : > { %v745_v53 = vpop.xlane.xlu1 %744 }
 0x16b   : > { %v758_v55 = vsel %vm746_vm1, %v685_v42, %v745_v53  ;;  %v645_v42 = vld [vmem:[%s6248_s10 + $0x38] sm:$0xff] }
 0x16c   : > { %773 = vmatpush.msra.mxu2 %v758_v55 }
 0x16e   : > { %774 = vmatpush.msra.mxu2 %v757_v56 }
 0x170   : > { %v724_v59 = vpop.xlane.xlu2 %723  ;;  %775 = vmatpush.msra.mxu2 %v756_v38  ;;  %v661_v60 = vpop.xlane.xlu0 %660 }
 0x171   : > { %v751_v8 = vsel %vm746_vm1, %v664_v25, %v724_v59 }
 0x172   : > { %776 = vmatpush.msra.mxu2 %v755_v62  ;;  %v721_v0 = vpop.xlane.xlu1 %720 }
 0x173   : > { %v750_v10 = vsel %vm746_vm1, %v661_v60, %v721_v0 }
 0x174   : > { %777 = vmatpush.msra.mxu2 %v754_v40 }
 0x176   : > { %778 = vmatpush.msra.mxu2 %v753_v2 }
 0x178   : > { %779 = vmatpush.msra.mxu2 %v752_v3  ;;  %v718_v4 = vpop.xlane.xlu0 %717  ;;  %v658_v6 = vpop.xlane.xlu2 %657 }
 0x179   : > { %v749_v11 = vsel %vm746_vm1, %v658_v6, %v718_v4  ;;  %v4315_v6 = vld [vmem:[%s6241_s3] sm:$0xff] }
 0x17a   : > { %780 = vmatpush.msra.mxu2 %v751_v8  ;;  %v655_v9 = vpop.xlane.xlu1 %654 }
 0x17c   : > { %781 = vmatpush.msra.mxu2 %v750_v10  ;;  %v4327_v10 = vld [vmem:[%s6241_s3 + $0x10] sm:$0xff] }
 0x17e   : > { %782 = vmatpush.msra.mxu2 %v749_v11 }
 0x180   : > { %v715_v12 = vpop.xlane.xlu2 %714  ;;  %v652_v34 = vpop.xlane.xlu0 %651 }
 0x181   : > { %v748_v33 = vsel %vm746_vm1, %v655_v9, %v715_v12  ;;  %v4334_v12 = vld [vmem:[%s6241_s3 + $0x18] sm:$0xff] }
 0x182   : > { %783 = vmatpush.msra.mxu2 %v748_v33  ;;  %v712_v17 = vpop.xlane.xlu1 %711  ;;  %v4344_v33 = vld [vmem:[%s6241_s3 + $0x20] sm:$0xff] }
 0x183   : > { %v747_v31 = vsel %vm746_vm1, %v652_v34, %v712_v17  ;;  %v4349_v34 = vld [vmem:[%s6241_s3 + $0x38] sm:$0xff]  ;;  %v4354_v17 = vld [vmem:[%s6241_s3 + $0x28] sm:$0xff] }
 0x184   : > { %784 = vmatpush.msra.mxu2 %v747_v31  ;;  %v4372_v31 = vld [vmem:[%s6241_s3 + $0x30] sm:$0xff] }
 0x185   : > { %3447 = vmatmul.msk.f32.vlgmr.msra.gmra.mxu2 %vm759_vm2, %v635_v18  ;;  %v4365_v18 = vld [vmem:[%s6241_s3 + $0x8] sm:$0xff] }
 0x18d   : > { %3448 = vmatmul.msk.f32.gmra.mxu2 %vm759_vm2, %v636_v32 }
 0x195   : > { %3449 = vmatmul.msk.f32.gmra.mxu2 %vm759_vm2, %v637_v19 }
 0x208   : > { %v786_v20 = vpop.f32.mrf.mxu2 }
 0x209   : > { %v795_v27 = vmul.f32 0.0009765625, %v786_v20 }
 0x210   : > { %v789_v22 = vpop.f32.mrf.mxu2 }
 0x211   : > { %v796_v26 = vmul.f32 0.0009765625, %v789_v22 }
 0x218   : > { %v792_v24 = vpop.f32.mrf.mxu2 }
 0x219   : > { %v797_v25 = vmul.f32 0.0009765625, %v792_v24 }
 0x21b   : > { %848 = vmatpush.msra.mxu3 %v797_v25 }
 0x21d   : > { %849 = vmatpush.msra.mxu3 %v796_v26 }
 0x21f   : > { %850 = vmatpush.msra.mxu3 %v795_v27 }
 0x220   : > { %3450 = vmatmul.msk.f32.vlgmr.msra.gmra.mxu3 %vm798_vm3, %v638_v28 }
 0x228   : > { %3451 = vmatmul.msk.f32.gmra.mxu3 %vm798_vm3, %v639_v30 }
 0x230   : > { %3452 = vmatmul.msk.f32.gmra.mxu3 %vm798_vm3, %v640_v39 }
 0x238   : > { %3453 = vmatmul.msk.f32.gmra.mxu3 %vm798_vm3, %v641_v43 }
 0x240   : > { %3454 = vmatmul.msk.f32.gmra.mxu3 %vm798_vm3, %v642_v44 }
 0x248   : > { %3455 = vmatmul.msk.f32.gmra.mxu3 %vm798_vm3, %v643_v46 }
 0x250   : > { %3456 = vmatmul.msk.f32.gmra.mxu3 %vm798_vm3, %v644_v49 }
 0x258   : > { %3457 = vmatmul.msk.f32.gmra.mxu3 %vm798_vm3, %v645_v42 }
 0x2a3   : > { %v4280_v51 = vpop.f32.mrf.mxu3 }
 0x2a4   : > { %v888_v53 = vmul.f32 %v4280_v51, %v4280_v51 }
 0x2a6   : > { %912 = vrot.lane.b32.xlu2 %v888_v53, %s3932_s30 }
 0x2ab   : > { %v4285_v55 = vpop.f32.mrf.mxu3 }
 0x2ac   : > { %v889_v56 = vmul.f32 %v4285_v55, %v4285_v55 }
 0x2ae   : > { %914 = vrot.lane.b32.xlu2 %v889_v56, %s3932_s30 }
 0x2b3   : > { %v4290_v38 = vpop.f32.mrf.mxu3 }
 0x2b4   : > { %v890_v59 = vmul.f32 %v4290_v38, %v4290_v38 }
 0x2b6   : > { %916 = vrot.lane.b32.xlu0 %v890_v59, %s3932_s30 }
 0x2bb   : > { %v4295_v60 = vpop.f32.mrf.mxu3 }
 0x2bc   : > { %v891_v62 = vmul.f32 %v4295_v60, %v4295_v60 }
 0x2be   : > { %918 = vrot.lane.b32.xlu1 %v891_v62, %s3932_s30 }
 0x2c3   : > { %v4300_v0 = vpop.f32.mrf.mxu3 }
 0x2c4   : > { %v892_v40 = vmul.f32 %v4300_v0, %v4300_v0 }
 0x2c6   : > { %920 = vrot.lane.b32.xlu0 %v892_v40, %s3932_s30 }
 0x2cb   : > { %v4305_v2 = vpop.f32.mrf.mxu3 }
 0x2cc   : > { %v893_v3 = vmul.f32 %v4305_v2, %v4305_v2 }
 0x2ce   : > { %922 = vrot.lane.b32.xlu1 %v893_v3, %s3932_s30 }
 0x2d3   : > { %v4310_v4 = vpop.f32.mrf.mxu3 }
 0x2d4   : > { %v894_v8 = vmul.f32 %v4310_v4, %v4310_v4 }
 0x2d6   : > { %1104 = vrot.lane.b32.xlu1 %v4315_v6, %s3932_s30  ;;  %924 = vrot.lane.b32.xlu2 %v894_v8, %s3932_s30 }
 0x2db   : > { %v4322_v9 = vpop.f32.mrf.mxu3 }
 0x2dc   : > { %v895_v11 = vmul.f32 %v4322_v9, %v4322_v9 }
 0x2de   : > { %1108 = vrot.lane.b32.xlu1 %v4327_v10, %s3932_s30  ;;  %926 = vrot.lane.b32.xlu0 %v895_v11, %s3932_s30 }
 0x2df   : > { %1110 = vrot.lane.b32.xlu2 %v4334_v12, %s3932_s30 }
 0x2e6   : > { %1112 = vrot.lane.b32.xlu0 %v4344_v33, %s3932_s30  ;;  %1118 = vrot.lane.b32.xlu1 %v4349_v34, %s3932_s30 }
 0x2e7   : > { %1114 = vrot.lane.b32.xlu2 %v4354_v17, %s3932_s30 }
 0x2ee   : > { %1106 = vrot.lane.b32.xlu0 %v4365_v18, %s3932_s30 }
 0x2f6   : > { %1116 = vrot.lane.b32.xlu0 %v4372_v31, %s3932_s30 }
 0x300   : > { %v913_v32 = vpop.permute.xlu2 %912 }
 0x301   : > { %v948_v19 = vsub.f32 %v4280_v51, %v913_v32 }
 0x303   : > { %v960_v20 = vadd.f32 1e-05, %v948_v19 }
 0x305   : > { %3551 = vrsqrt.f32 %v960_v20  ;;  %vm978_vm8 = vweird.f32 %v960_v20 }
 0x308   : > { %v915_v43 = vpop.permute.xlu2 %914 }
 0x309   : > { %v949_v53 = vsub.f32 %v4285_v55, %v915_v43 }
 0x30b   : > { %v3552_v26 = vpop.eup %3551  ;;  %v4391_v11 = vadd.f32 1e-05, %v949_v53 }
 0x30c   : > { %v973_v30 = vmul.f32 %v3552_v26, %v960_v20  ;;  %vm979_vm5 = vweird.f32 %v3552_v26 }
 0x30d   : > { %vm980_vm9 = vmor %vm978_vm8, %vm979_vm5 }
 0x30e   : > { %v974_v44 = vmul.f32 %v3552_v26, %v973_v30 }
 0x310   : > { %v975_v59 = vmul.f32 0.5, %v974_v44 }
 0x312   : > { %v976_v19 = vsub.f32 1.5, %v975_v59 }
 0x328   : > { %v917_v22 = vpop.permute.xlu0 %916 }
 0x329   : > { %v950_v24 = vsub.f32 %v4290_v38, %v917_v22 }
 0x32b   : > { %v4378_v25 = vadd.f32 1e-05, %v950_v24 }
 0x32d   : > { %3553 = vrsqrt.f32 %v4378_v25  ;;  %vm998_vm11 = vweird.f32 %v4378_v25 }
 0x330   : > { %v919_v27 = vpop.permute.xlu1 %918  ;;  %v925_v8 = vpop.permute.xlu2 %924 }
 0x331   : > { %v951_v28 = vsub.f32 %v4295_v60, %v919_v27  ;;  %v954_v30 = vsub.f32 %v4310_v4, %v925_v8 }
 0x333   : > { %v963_v39 = vadd.f32 1e-05, %v951_v28  ;;  %v4382_v49 = vpop.eup %3553 }
 0x334   : > { %v993_v40 = vmul.f32 %v4382_v49, %v4378_v25  ;;  %vm999_vm10 = vweird.f32 %v4382_v49 }
 0x335   : > { %3555 = vrsqrt.f32 %v963_v39  ;;  %vm1008_vm6 = vweird.f32 %v963_v39  ;;  %vm1000_vm12 = vmor %vm998_vm11, %vm999_vm10 }
 0x336   : > { %v994_v22 = vmul.f32 %v4382_v49, %v993_v40 }
 0x338   : > { %v921_v46 = vpop.permute.xlu0 %920  ;;  %v995_v53 = vmul.f32 0.5, %v994_v22 }
 0x339   : > { %v952_v42 = vsub.f32 %v4300_v0, %v921_v46 }
 0x33a   : > { %v996_v15 = vsub.f32 1.5, %v995_v53 }
 0x33b   : > { %v3556_v56 = vpop.eup %3555  ;;  %v4386_v62 = vadd.f32 1e-05, %v952_v42  ;;  %v977_v42 = vmul.f32 %v3552_v26, %v976_v19 }
 0x33c   : > { %v1003_v3 = vmul.f32 %v3556_v56, %v963_v39  ;;  %vm1009_vm4 = vweird.f32 %v3556_v56 }
 0x33d   : > { %3557 = vrsqrt.f32 %v4386_v62  ;;  %vm1010_vm7 = vmor %vm1008_vm6, %vm1009_vm4  ;;  %v981_v22 = vsel %vm980_vm9, %v3552_v26, %v977_v42  ;;  %v997_v26 = vmul.f32 %v4382_v49, %v996_v15  ;;  %vm1018_vm4 = vweird.f32 %v4386_v62 }
 0x33e   : > { %v1004_v32 = vmul.f32 %v3556_v56, %v1003_v3  ;;  %3559 = vrsqrt.f32 %v4391_v11  ;;  %v1111_v3 = vpop.permute.xlu2 %1110 }
 0x340   : > { %v1005_v24 = vmul.f32 0.5, %v1004_v32  ;;  %v923_v27 = vpop.permute.xlu1 %922  ;;  %v4401_v32 = vadd.f32 1e-05, %v954_v30 }
 0x341   : > { %v953_v28 = vsub.f32 %v4305_v2, %v923_v27 }
 0x342   : > { %v1006_v43 = vsub.f32 1.5, %v1005_v24 }
 0x343   : > { %v4397_v44 = vpop.eup %3557  ;;  %v965_v46 = vadd.f32 1e-05, %v953_v28 }
 0x344   : > { %v1013_v59 = vmul.f32 %v4397_v44, %v4386_v62  ;;  %v1007_v40 = vmul.f32 %v3556_v56, %v1006_v43  ;;  %v4405_v24 = vpop.eup %3559  ;;  %vm1019_vm15 = vweird.f32 %v4397_v44 }
 0x345   : > { %3561 = vrsqrt.f32 %v965_v46  ;;  %v983_v20 = vmul.f32 %v4405_v24, %v4391_v11  ;;  %vm1028_vm14 = vweird.f32 %v965_v46  ;;  %vm1020_vm5 = vmor %vm1018_vm4, %vm1019_vm15  ;;  %vm989_vm6 = vweird.f32 %v4405_v24 }
 0x346   : > { %v1011_v27 = vsel %vm1010_vm7, %v3556_v56, %v1007_v40  ;;  %v1014_v19 = vmul.f32 %v4397_v44, %v1013_v59  ;;  %3563 = vrsqrt.f32 %v4401_v32  ;;  %v1001_v40 = vsel %vm1000_vm12, %v4382_v49, %v997_v26 }
 0x347   : > { %v4403_v8 = vmul.f32 %v1111_v3, %v1011_v27  ;;  %v984_v42 = vmul.f32 %v4405_v24, %v983_v20  ;;  %vm988_vm7 = vweird.f32 %v4391_v11 }
 0x348   : > { %v1105_v28 = vpop.permute.xlu1 %1104  ;;  %v1015_v56 = vmul.f32 0.5, %v1014_v19  ;;  %vm990_vm8 = vmor %vm988_vm7, %vm989_vm6 }
 0x349   : > { %v4408_v13 = vmul.f32 %v1105_v28, %v981_v22  ;;  %1170 = vrot.lane.b32.xlu0 %v4403_v8, %s3933_s12  ;;  %v985_v50 = vmul.f32 0.5, %v984_v42 }
 0x34a   : > { %v1016_v22 = vsub.f32 1.5, %v1015_v56 }
 0x34b   : > { %v3562_v39 = vpop.eup %3561  ;;  %1164 = vrot.lane.b32.xlu2 %v4408_v13, %s3933_s12 }
 0x34c   : > { %v1023_v30 = vmul.f32 %v3562_v39, %v965_v46  ;;  %v3564_v53 = vpop.eup %3563  ;;  %vm1029_vm13 = vweird.f32 %v3562_v39  ;;  %v1017_v49 = vmul.f32 %v4397_v44, %v1016_v22 }
 0x34d   : > { %vm1030_vm2 = vmor %vm1028_vm14, %vm1029_vm13  ;;  %vm1039_vm11 = vweird.f32 %v3564_v53  ;;  %vm1038_vm13 = vweird.f32 %v4401_v32 }
 0x34e   : > { %v1024_v43 = vmul.f32 %v3562_v39, %v1023_v30  ;;  %v1033_v30 = vmul.f32 %v3564_v53, %v4401_v32  ;;  %vm1040_vm14 = vmor %vm1038_vm13, %vm1039_vm11  ;;  %v648_v32 = vld [vmem:[%s6248_s10 + $0x50] sm:$0xff] }
 0x350   : > { %v1025_v59 = vmul.f32 0.5, %v1024_v43  ;;  %v1109_v3 = vpop.permute.xlu1 %1108  ;;  %v927_v27 = vpop.permute.xlu0 %926  ;;  %v1034_v42 = vmul.f32 %v3564_v53, %v1033_v30 }
 0x351   : > { %v4422_v28 = vmul.f32 %v1109_v3, %v1001_v40  ;;  %v955_v19 = vsub.f32 %v4322_v9, %v927_v27  ;;  %v1115_v43 = vpop.permute.xlu2 %1114  ;;  %v986_v3 = vsub.f32 1.5, %v985_v50 }
 0x352   : > { %v1026_v15 = vsub.f32 1.5, %v1025_v59  ;;  %v1021_v59 = vsel %vm1020_vm5, %v4397_v44, %v1017_v49  ;;  %v1035_v22 = vmul.f32 0.5, %v1034_v42 }
 0x353   : > { %v967_v25 = vadd.f32 1e-05, %v955_v19  ;;  %1168 = vrot.lane.b32.xlu2 %v4422_v28, %s3933_s12 }
 0x354   : > { %v1027_v20 = vmul.f32 %v3562_v39, %v1026_v15  ;;  %v1036_v30 = vsub.f32 1.5, %v1035_v22  ;;  %v646_v22 = vld [vmem:[%s6248_s10 + $0x40] sm:$0xff] }
 0x355   : > { %3565 = vrsqrt.f32 %v967_v25  ;;  %vm1048_vm10 = vweird.f32 %v967_v25  ;;  %3458 = vmatmul.msk.f32.gmra.mxu3 %vm798_vm3, %v646_v22 }
 0x356   : > { %v1031_v56 = vsel %vm1030_vm2, %v3562_v39, %v1027_v20  ;;  %v987_v39 = vmul.f32 %v4405_v24, %v986_v3  ;;  %v1037_v42 = vmul.f32 %v3564_v53, %v1036_v30 }
 0x357   : > { %v4431_v26 = vmul.f32 %v1115_v43, %v1031_v56 }
 0x358   : > { %v1113_v40 = vpop.permute.xlu0 %1112  ;;  %v991_v50 = vsel %vm990_vm8, %v4405_v24, %v987_v39  ;;  %v1119_v49 = vpop.permute.xlu1 %1118 }
 0x359   : > { %v1144_v27 = vmul.f32 %v1113_v40, %v1021_v59  ;;  %1174 = vrot.lane.b32.xlu0 %v4431_v26, %s3933_s12  ;;  %v1041_v40 = vsel %vm1040_vm14, %v3564_v53, %v1037_v42  ;;  %v649_v53 = vld [vmem:[%s6248_s10 + $0x58] sm:$0xff] }
 0x35b   : > { %v3566_v46 = vpop.eup %3565  ;;  %1172 = vrot.lane.b32.xlu1 %v1144_v27, %s3933_s12 }
 0x35c   : > { %v1043_v19 = vmul.f32 %v3566_v46, %v967_v25  ;;  %vm1049_vm9 = vweird.f32 %v3566_v46  ;;  %v647_v25 = vld [vmem:[%s6248_s10 + $0x48] sm:$0xff] }
 0x35d   : > { %vm1050_vm12 = vmor %vm1048_vm10, %vm1049_vm9  ;;  %3459 = vmatmul.msk.f32.gmra.mxu3 %vm798_vm3, %v647_v25 }
 0x35e   : > { %v1044_v62 = vmul.f32 %v3566_v46, %v1043_v19 }
 0x360   : > { %v1045_v44 = vmul.f32 0.5, %v1044_v62  ;;  %v1107_v15 = vpop.permute.xlu0 %1106  ;;  %v3934_v62 = vmov 1  }
 0x361   : > { %v1141_v20 = vmul.f32 %v1107_v15, %v991_v50  ;;  %3549 = vset.pattern.permute.xlu0 %v3934_v62  ;;  %3548 = vset.pattern.permute.xlu1 %v3934_v62 }
 0x362   : > { %v1046_v43 = vsub.f32 1.5, %v1045_v44  ;;  %3550 = vset.pattern.permute.xlu2 %v3934_v62  ;;  %v1923_v62 = vld [vmem:[%s6243_s5 + $0x78] sm:$0xff] }
 0x363   : > { %1166 = vrot.lane.b32.xlu1 %v1141_v20, %s3933_s12  ;;  %1940 = vmatpush.msrb.mxu2 %v1923_v62  ;;  %v1910_v62 = vld [vmem:[%s6243_s5 + $0x10] sm:$0xff] }
 0x364   : > { %v1047_v56 = vmul.f32 %v3566_v46, %v1046_v43 }
 0x365   : > { %3460 = vmatmul.msk.f32.gmra.mxu3 %vm798_vm3, %v648_v32 }
 0x366   : > { %v1051_v59 = vsel %vm1050_vm12, %v3566_v46, %v1047_v56 }
 0x367   : > { %v1147_v11 = vmul.f32 %v1119_v49, %v1051_v59 }
 0x368   : > { %v1117_v24 = vpop.permute.xlu0 %1116 }
 0x369   : > { %v1146_v3 = vmul.f32 %v1117_v24, %v1041_v40  ;;  %1178 = vrot.lane.b32.xlu2 %v1147_v11, %s3933_s12 }
 0x36b   : > { %1176 = vrot.lane.b32.xlu1 %v1146_v3, %s3933_s12 }
 0x36d   : > { %3461 = vmatmul.msk.f32.gmra.mxu3 %vm798_vm3, %v649_v53  ;;  %v633_v53 = vld [vmem:[%s6241_s3 + $0x50] sm:$0xff] }
 0x3a5   : > { %v1165_v46 = vpop.permute.xlu2 %1164 }
 0x3a6   : > { %v1200_v19 = vmul.f32 %v1165_v46, %v4280_v51  ;;  %v632_v46 = vld [vmem:[%s6241_s3 + $0x48] sm:$0xff] }
 0x3a8   : > { %1224 = vrot.lane.b32.xlu0 %v1200_v19, %s3932_s30  ;;  %v631_v19 = vld [vmem:[%s6241_s3 + $0x40] sm:$0xff] }
 0x3ad   : > { %v1169_v39 = vpop.permute.xlu2 %1168 }
 0x3ae   : > { %v1202_v44 = vmul.f32 %v1169_v39, %v4290_v38 }
 0x3b0   : > { %1228 = vrot.lane.b32.xlu0 %v1202_v44, %s3932_s30  ;;  %v1939_v44 = vld [vmem:[%s6243_s5 + $0xf8] sm:$0xff] }
 0x3b1   : > { %2017 = vmatpush.msrb.mxu3 %v1939_v44  ;;  %v1926_v44 = vld [vmem:[%s6243_s5 + $0x90] sm:$0xff] }
 0x3bb   : > { %v1171_v50 = vpop.permute.xlu0 %1170 }
 0x3bc   : > { %v1203_v15 = vmul.f32 %v1171_v50, %v4295_v60 }
 0x3be   : > { %1230 = vrot.lane.b32.xlu1 %v1203_v15, %s3932_s30  ;;  %v1922_v15 = vld [vmem:[%s6243_s5 + $0x70] sm:$0xff] }
 0x3bf   : > { %1941 = vmatpush.msrb.mxu2 %v1922_v15 }
 0x3c3   : > { %v1179_v30 = vpop.permute.xlu2 %1178 }
 0x3c4   : > { %v1207_v43 = vmul.f32 %v1179_v30, %v4322_v9  ;;  %v1938_v30 = vld [vmem:[%s6243_s5 + $0xf0] sm:$0xff] }
 0x3c5   : > { %2018 = vmatpush.msrb.mxu3 %v1938_v30 }
 0x3c6   : > { %1238 = vrot.lane.b32.xlu0 %v1207_v43, %s3932_s30  ;;  %v1921_v43 = vld [vmem:[%s6243_s5 + $0x68] sm:$0xff] }
 0x3c7   : > { %1942 = vmatpush.msrb.mxu2 %v1921_v43 }
 0x3cb   : > { %v1175_v51 = vpop.permute.xlu0 %1174 }
 0x3cc   : > { %v1205_v49 = vmul.f32 %v1175_v51, %v4305_v2  ;;  %v1937_v51 = vld [vmem:[%s6243_s5 + $0xe8] sm:$0xff] }
 0x3cd   : > { %v1173_v56 = vpop.permute.xlu1 %1172  ;;  %2019 = vmatpush.msrb.mxu3 %v1937_v51 }
 0x3ce   : > { %v1204_v42 = vmul.f32 %v1173_v56, %v4300_v0  ;;  %1289 = vperm.xlu0 %3549, %v1144_v27   ;;  %1234 = vrot.lane.b32.xlu1 %v1205_v49, %s3932_s30  ;;  %v1920_v49 = vld [vmem:[%s6243_s5 + $0x60] sm:$0xff] }
 0x3cf   : > { %v1936_v56 = vld [vmem:[%s6243_s5 + $0xe0] sm:$0xff]  ;;  %1943 = vmatpush.msrb.mxu2 %v1920_v49 }
 0x3d0   : > { %1232 = vrot.lane.b32.xlu2 %v1204_v42, %s3932_s30  ;;  %2020 = vmatpush.msrb.mxu3 %v1936_v56  ;;  %v1919_v42 = vld [vmem:[%s6243_s5 + $0x58] sm:$0xff] }
 0x3d1   : > { %1944 = vmatpush.msrb.mxu2 %v1919_v42  ;;  %v1908_v42 = vld [vmem:[%s6243_s5] sm:$0xff] }
 0x3d5   : > { %v1167_v38 = vpop.permute.xlu1 %1166 }
 0x3d6   : > { %v1201_v60 = vmul.f32 %v1167_v38, %v4285_v55  ;;  %1293 = vperm.xlu0 %3549, %v4431_v26   ;;  %1273 = vperm.xlu1 %3548, %v4408_v13   ;;  %v1935_v38 = vld [vmem:[%s6243_s5 + $0xd8] sm:$0xff] }
 0x3d7   : > { %2021 = vmatpush.msrb.mxu3 %v1935_v38  ;;  %v1924_v38 = vld [vmem:[%s6243_s5 + $0x80] sm:$0xff] }
 0x3d8   : > { %1226 = vrot.lane.b32.xlu2 %v1201_v60, %s3932_s30  ;;  %v4482_v26 = vpop.f32.mrf.mxu3 }
 0x3dd   : > { %v1177_v9 = vpop.permute.xlu1 %1176 }
 0x3de   : > { %v1206_v2 = vmul.f32 %v1177_v9, %v4310_v4  ;;  %1297 = vperm.xlu0 %3549, %v1146_v3   ;;  %1281 = vperm.xlu1 %3548, %v4422_v28   ;;  %v1918_v9 = vld [vmem:[%s6243_s5 + $0x50] sm:$0xff] }
 0x3df   : > { %1945 = vmatpush.msrb.mxu2 %v1918_v9 }
 0x3e0   : > { %1236 = vrot.lane.b32.xlu2 %v1206_v2, %s3932_s30  ;;  %v4485_v59 = vpop.f32.mrf.mxu3  ;;  %v1934_v2 = vld [vmem:[%s6243_s5 + $0xd0] sm:$0xff] }
 0x3e1   : > { %2022 = vmatpush.msrb.mxu3 %v1934_v2 }
 0x3e8   : > { %1285 = vperm.xlu2 %3550, %v4403_v8  }
 0x3f0   : > { %1277 = vperm.xlu2 %3550, %v1141_v20  }
 0x3f8   : > { %1301 = vperm.xlu2 %3550, %v1147_v11  }
 0x41a   : > { %v1225_v0 = vpop.permute.xlu0 %1224 }
 0x41b   : > { %v1260_v55 = vsub.f32 %v4315_v6, %v1225_v0  ;;  %v4489_v6 = vpop.f32.mrf.mxu3 }
 0x41d   : > { %1346 = vperm.xlu1 %3548, %v1260_v55   ;;  %v1917_v55 = vld [vmem:[%s6243_s5 + $0x48] sm:$0xff] }
 0x41e   : > { %1946 = vmatpush.msrb.mxu2 %v1917_v55 }
 0x422   : > { %v1229_v20 = vpop.permute.xlu0 %1228 }
 0x423   : > { %v1262_v24 = vsub.f32 %v4327_v10, %v1229_v20  ;;  %v4497_v32 = vpop.f32.mrf.mxu3  ;;  %v1914_v20 = vld [vmem:[%s6243_s5 + $0x30] sm:$0xff] }
 0x424   : > { %v899_v10 = vmul.f32 %v4497_v32, %v4497_v32 }
 0x42a   : > { %v1233_v13 = vpop.permute.xlu2 %1232 }
 0x42b   : > { %v1264_v27 = vsub.f32 %v4344_v33, %v1233_v13  ;;  %v1933_v13 = vld [vmem:[%s6243_s5 + $0xc8] sm:$0xff] }
 0x42c   : > { %2023 = vmatpush.msrb.mxu3 %v1933_v13 }
 0x42d   : > { %1366 = vperm.xlu2 %3550, %v1264_v27   ;;  %v1916_v27 = vld [vmem:[%s6243_s5 + $0x40] sm:$0xff] }
 0x42e   : > { %1947 = vmatpush.msrb.mxu2 %v1916_v27 }
 0x430   : > { %v1231_v4 = vpop.permute.xlu1 %1230 }
 0x431   : > { %v1263_v28 = vsub.f32 %v4334_v12, %v1231_v4  ;;  %v897_v12 = vmul.f32 %v4485_v59, %v4485_v59  ;;  %v1932_v4 = vld [vmem:[%s6243_s5 + $0xc0] sm:$0xff] }
 0x432   : > { %v1227_v40 = vpop.permute.xlu2 %1226  ;;  %2024 = vmatpush.msrb.mxu3 %v1932_v4 }
 0x433   : > { %v1261_v8 = vsub.f32 %v4365_v18, %v1227_v40  ;;  %1361 = vperm.xlu0 %3549, %v1263_v28   ;;  %v1915_v40 = vld [vmem:[%s6243_s5 + $0x38] sm:$0xff] }
 0x434   : > { %1948 = vmatpush.msrb.mxu2 %v1915_v40 }
 0x435   : > { %1351 = vperm.xlu1 %3548, %v1261_v8   ;;  %v1931_v8 = vld [vmem:[%s6243_s5 + $0xb8] sm:$0xff] }
 0x436   : > { %2025 = vmatpush.msrb.mxu3 %v1931_v8  ;;  %1949 = vmatpush.msrb.mxu2 %v1914_v20 }
 0x438   : > { %v1239_v33 = vpop.permute.xlu0 %1238 }
 0x439   : > { %v1267_v18 = vsub.f32 %v4349_v34, %v1239_v33  ;;  %v896_v34 = vmul.f32 %v4482_v26, %v4482_v26 }
 0x43a   : > { %v1237_v11 = vpop.permute.xlu2 %1236 }
 0x43b   : > { %v1266_v3 = vsub.f32 %v4372_v31, %v1237_v11  ;;  %v898_v31 = vmul.f32 %v4489_v6, %v4489_v6  ;;  %v1930_v11 = vld [vmem:[%s6243_s5 + $0xb0] sm:$0xff] }
 0x43c   : > { %2026 = vmatpush.msrb.mxu3 %v1930_v11 }
 0x43d   : > { %1376 = vperm.xlu0 %3549, %v1266_v3   ;;  %1356 = vperm.xlu1 %3548, %v1262_v24  }
 0x440   : > { %v1235_v22 = vpop.permute.xlu1 %1234  ;;  %v1290_v28 = vpop.permute.xlu0 %1289 }
 0x441   : > { %v1265_v25 = vsub.f32 %v4354_v17, %v1235_v22  ;;  %v634_v17 = vld [vmem:[%s6241_s3 + $0x58] sm:$0xff]  ;;  %v1328_v24 = vmul.f32 %v1290_v28, %v4095_v45  ;;  %v1329_v3 = vmul.f32 %v1290_v28, %v4097_v47  ;;  %v1912_v45 = vld [vmem:[%s6243_s5 + $0x20] sm:$0xff] }
 0x442   : > { %v4525_v39 = vpop.permute.xlu2 %1285  ;;  %v1928_v47 = vld [vmem:[%s6243_s5 + $0xa0] sm:$0xff] }
 0x443   : > { %1371 = vperm.xlu2 %3550, %v1265_v25   ;;  %v1929_v25 = vld [vmem:[%s6243_s5 + $0xa8] sm:$0xff]  ;;  %v1326_v27 = vmul.f32 %v4525_v39, %v4176_v57  ;;  %v1327_v40 = vmul.f32 %v4525_v39, %v4179_v58 }
 0x444   : > { %2027 = vmatpush.msrb.mxu3 %v1929_v25 }
 0x445   : > { %1381 = vperm.xlu1 %3548, %v1267_v18   ;;  %930 = vrot.lane.b32.xlu0 %v897_v12, %s3932_s30  ;;  %v1913_v12 = vld [vmem:[%s6243_s5 + $0x28] sm:$0xff] }
 0x446   : > { %1950 = vmatpush.msrb.mxu2 %v1913_v12  ;;  %2028 = vmatpush.msrb.mxu3 %v1928_v47 }
 0x448   : > { %v1274_v60 = vpop.permute.xlu1 %1273  ;;  %1951 = vmatpush.msrb.mxu2 %v1912_v45  ;;  %v1294_v30 = vpop.permute.xlu0 %1293 }
 0x449   : > { %v1330_v8 = vmul.f32 %v1294_v30, %v4101_v52  ;;  %v1331_v20 = vmul.f32 %v1294_v30, %v4103_v54 }
 0x44a   : > { %v4533_v50 = vpop.permute.xlu2 %1277 }
 0x44b   : > { %934 = vrot.lane.b32.xlu2 %v899_v10, %s3932_s30  ;;  %v4653_v57 = vmul.f32 %v4533_v50, %v4205_v37 }
 0x44d   : > { %932 = vrot.lane.b32.xlu1 %v898_v31, %s3932_s30  ;;  %1124 = vrot.lane.b32.xlu0 %v633_v53, %s3932_s30 }
 0x450   : > { %v1282_v33 = vpop.permute.xlu1 %1281  ;;  %v1298_v4 = vpop.permute.xlu0 %1297 }
 0x451   : > { %v4661_v54 = vmul.f32 %v1282_v33, %v4193_v1  ;;  %v4664_v39 = vmul.f32 %v1298_v4, %v4111_v61 }
 0x452   : > { %v4565_v0 = vpop.permute.xlu2 %1301 }
 0x453   : > { %928 = vrot.lane.b32.xlu2 %v896_v34, %s3932_s30  ;;  %v1911_v34 = vld [vmem:[%s6243_s5 + $0x18] sm:$0xff] }
 0x454   : > { %1952 = vmatpush.msrb.mxu2 %v1911_v34 }
 0x455   : > { %1126 = vrot.lane.b32.xlu1 %v634_v17, %s3932_s30  ;;  %v1927_v17 = vld [vmem:[%s6243_s5 + $0x98] sm:$0xff] }
 0x456   : > { %2029 = vmatpush.msrb.mxu3 %v1927_v17  ;;  %1953 = vmatpush.msrb.mxu2 %v1910_v62 }
 0x458   : > { %2030 = vmatpush.msrb.mxu3 %v1926_v44 }
 0x45b   : > { %1122 = vrot.lane.b32.xlu2 %v632_v46, %s3932_s30  ;;  %v1320_v46 = vmul.f32 %v1274_v60, %v4210_v14  ;;  %v1909_v14 = vld [vmem:[%s6243_s5 + $0x8] sm:$0xff] }
 0x45c   : > { %1954 = vmatpush.msrb.mxu2 %v1909_v14 }
 0x45d   : > { %1120 = vrot.lane.b32.xlu1 %v631_v19, %s3932_s30  ;;  %v1321_v19 = vmul.f32 %v1274_v60, %v4213_v16  ;;  %v1925_v16 = vld [vmem:[%s6243_s5 + $0x88] sm:$0xff] }
 0x45e   : > { %2031 = vmatpush.msrb.mxu3 %v1925_v16  ;;  %1955 = vmatpush.msrb.mxu2 %v1908_v42 }
 0x460   : > { %2032 = vmatpush.msrb.mxu3 %v1924_v38 }
 0x487   : > { %v1367_v22 = vpop.permute.xlu2 %1366 }
 0x488   : > { %v1412_v18 = vadd.f32 %v1367_v22, %v1328_v24  ;;  %v1413_v10 = vadd.f32 %v1367_v22, %v1329_v3  ;;  %v1322_v3 = vmul.f32 %v4533_v50, %v4202_v36  ;;  %v4656_v22 = vmul.f32 %v1282_v33, %v4190_v41 }
 0x48a   : > { %v3470_v31 = vmul.f32 -1.442695, %v1412_v18  ;;  %v3471_v53 = vmul.f32 -1.442695, %v1413_v10 }
 0x48c   : > { %3567 = vpow2.f32 %v3470_v31  ;;  %v4677_v31 = vmul.f32 %v1298_v4, %v4113_v63 }
 0x48d   : > { %3569 = vpow2.f32 %v3471_v53 }
 0x48f   : > { %v1347_v15 = vpop.permute.xlu1 %1346 }
 0x490   : > { %v1404_v43 = vadd.f32 %v1347_v15, %v1320_v46  ;;  %v1405_v51 = vadd.f32 %v1347_v15, %v1321_v19 }
 0x492   : > { %v3568_v49 = vpop.eup %3567  ;;  %v3462_v56 = vmul.f32 -1.442695, %v1404_v43  ;;  %v3463_v2 = vmul.f32 -1.442695, %v1405_v51 }
 0x493   : > { %v3570_v60 = vpop.eup %3569  ;;  %v4631_v9 = vadd.f32 1.0, %v3568_v49 }
 0x494   : > { %v4633_v55 = vadd.f32 1.0, %v3570_v60  ;;  %3571 = vpow2.f32 %v3462_v56 }
 0x495   : > { %3573 = vrcp.f32 %v4631_v9  ;;  %v1653_v10 = vand.u32 2147483647, %v4631_v9  ;;  %v1655_v1 = vand.u32 2147483648, %v4631_v9  ;;  %vm1649_vm3 = vweird.f32 %v4631_v9 }
 0x496   : > { %3575 = vrcp.f32 %v4633_v55  ;;  %v1670_v33 = vand.u32 2147483648, %v4633_v55  ;;  %v1668_v17 = vand.u32 2147483647, %v4633_v55  ;;  %vm1664_vm15 = vweird.f32 %v4633_v55 }
 0x497   : > { %3577 = vpow2.f32 %v3463_v2  ;;  %v1656_v63 = vor.u32 1.1754944e-38, %v1655_v1  ;;  %vm4689_vm5 = vcmp.eq.f32.partialorder %v1653_v10, 8.507059e+37 }
 0x498   : > { %v1671_v30 = vor.u32 1.1754944e-38, %v1670_v33  ;;  %vm4701_vm9 = vcmp.eq.f32.partialorder %v1668_v17, 8.507059e+37 }
 0x49a   : > { %v3572_v13 = vpop.eup %3571 }
 0x49b   : > { %v4639_v28 = vpop.eup %3573  ;;  %v4645_v11 = vadd.f32 1.0, %v3572_v13 }
 0x49c   : > { %v4647_v24 = vpop.eup %3575  ;;  %v1645_v58 = vmul.f32 %v4639_v28, %v4631_v9  ;;  %vm1650_vm2 = vweird.f32 %v4639_v28 }
 0x49d   : > { %v3578_v52 = vpop.eup %3577  ;;  %v1660_v36 = vmul.f32 %v4647_v24, %v4633_v55  ;;  %3579 = vrcp.f32 %v4645_v11  ;;  %v1372_v37 = vpop.permute.xlu2 %1371  ;;  %v1533_v53 = vand.u32 2147483647, %v4645_v11  ;;  %v1535_v34 = vand.u32 2147483648, %v4645_v11  ;;  %vm4712_vm10 = vmor %vm1649_vm3, %vm1650_vm2 }
 0x49e   : > { %v1646_v50 = vsub.f32 1.0, %v1645_v58  ;;  %v4669_v12 = vadd.f32 1.0, %v3578_v52  ;;  %v1414_v41 = vadd.f32 %v1372_v37, %v1330_v8  ;;  %v1415_v25 = vadd.f32 %v1372_v37, %v1331_v20 }
 0x49f   : > { %v1661_v18 = vsub.f32 1.0, %v1660_v36  ;;  %vm1529_vm4 = vweird.f32 %v4645_v11  ;;  %vm1665_vm6 = vweird.f32 %v4647_v24  ;;  %vm4694_vm7 = vcmp.eq.f32.partialorder %v1533_v53, 8.507059e+37 }
 0x4a0   : > { %3581 = vrcp.f32 %v4669_v12  ;;  %v3472_v61 = vmul.f32 -1.442695, %v1414_v41  ;;  %v3473_v45 = vmul.f32 -1.442695, %v1415_v25  ;;  %v1647_v47 = vmul.f32 %v4639_v28, %v1646_v50  ;;  %vm4730_vm13 = vmor %vm1664_vm15, %vm1665_vm6 }
 0x4a1   : > { %v1662_v46 = vmul.f32 %v4647_v24, %v1661_v18  ;;  %v1536_v16 = vor.u32 1.1754944e-38, %v1535_v34  ;;  %vm1544_vm8 = vweird.f32 %v4669_v12  ;;  %v1548_v49 = vand.u32 2147483647, %v4669_v12 }
 0x4a2   : > { %3583 = vpow2.f32 %v3472_v61  ;;  %v1648_v62 = vadd.f32 %v4639_v28, %v1647_v47 }
 0x4a3   : > { %v3580_v19 = vpop.eup %3579  ;;  %3585 = vpow2.f32 %v3473_v45  ;;  %v1663_v56 = vadd.f32 %v4647_v24, %v1662_v46  ;;  %vm4747_vm3 = vcmp.eq.f32.partialorder %v1548_v49, 8.507059e+37 }
 0x4a4   : > { %v1525_v44 = vmul.f32 %v3580_v19, %v4645_v11  ;;  %vm1530_vm11 = vweird.f32 %v3580_v19 }
 0x4a5   : > { %v1362_v43 = vpop.permute.xlu0 %1361  ;;  %v935_v51 = vpop.permute.xlu2 %934  ;;  %v1667_v33 = vsel %vm4730_vm13, %v4647_v24, %v1663_v56  ;;  %vm1531_vm14 = vmor %vm1529_vm4, %vm1530_vm11 }
 0x4a6   : > { %v4705_v38 = vpop.eup %3581  ;;  %v1526_v60 = vsub.f32 1.0, %v1525_v44  ;;  %v1410_v2 = vadd.f32 %v1362_v43, %v1326_v27  ;;  %v1411_v13 = vadd.f32 %v1362_v43, %v1327_v40  ;;  %v959_v4 = vsub.f32 %v4497_v32, %v935_v51 }
 0x4a7   : > { %v1540_v20 = vmul.f32 %v4705_v38, %v4669_v12  ;;  %v1352_v58 = vpop.permute.xlu1 %1351  ;;  %v1652_v27 = vsel %vm4712_vm10, %v4639_v28, %v1648_v62  ;;  %v1550_v40 = vand.u32 2147483648, %v4669_v12  ;;  %vm1545_vm12 = vweird.f32 %v4705_v38 }
 0x4a8   : > { %v3584_v52 = vpop.eup %3583  ;;  %v3468_v36 = vmul.f32 -1.442695, %v1410_v2  ;;  %v3469_v37 = vmul.f32 -1.442695, %v1411_v13  ;;  %v1406_v50 = vadd.f32 %v1352_v58, %v1322_v3  ;;  %v1407_v18 = vadd.f32 %v1352_v58, %v4653_v57  ;;  %vm4766_vm15 = vmor %vm1544_vm8, %vm1545_vm12 }
 0x4a9   : > { %v3586_v9 = vpop.eup %3585  ;;  %v1541_v41 = vsub.f32 1.0, %v1540_v20  ;;  %v4723_v25 = vadd.f32 1.0, %v3584_v52  ;;  %v1527_v10 = vmul.f32 %v3580_v19, %v1526_v60  ;;  %v4736_v3 = vadd.f32 1e-05, %v959_v4 }
 0x4aa   : > { %v4734_v1 = vadd.f32 1.0, %v3586_v9  ;;  %3587 = vpow2.f32 %v3468_v36  ;;  %v3464_v57 = vmul.f32 -1.442695, %v1406_v50  ;;  %v3465_v55 = vmul.f32 -1.442695, %v1407_v18 }
 0x4ab   : > { %3589 = vrcp.f32 %v4723_v25  ;;  %v1528_v61 = vadd.f32 %v3580_v19, %v1527_v10  ;;  %v1542_v45 = vmul.f32 %v4705_v38, %v1541_v41  ;;  %v1551_v53 = vor.u32 1.1754944e-38, %v1550_v40 }
 0x4ac   : > { %3591 = vrcp.f32 %v4734_v1  ;;  %v4753_v17 = vsel %vm4689_vm5, %v1656_v63, %v1652_v27  ;;  %v4772_v63 = vsel %vm4701_vm9, %v1671_v30, %v1667_v33  ;;  %v1685_v12 = vand.u32 2147483648, %v4723_v25 }
 0x4ad   : > { %3593 = vpow2.f32 %v3469_v37  ;;  %v929_v24 = vpop.permute.xlu2 %928  ;;  %v1532_v34 = vsel %vm1531_vm14, %v3580_v19, %v1528_v61  ;;  %v1543_v46 = vadd.f32 %v4705_v38, %v1542_v45  ;;  %v1335_v58 = vmul.f32 %v4565_v0, %v4123_v7 }
 0x4ae   : > { %3595 = vrsqrt.f32 %v4736_v3  ;;  %v956_v62 = vsub.f32 %v4482_v26, %v929_v24  ;;  %v4760_v11 = vsel %vm4694_vm7, %v1536_v16, %v1532_v34  ;;  %v1683_v40 = vand.u32 2147483647, %v4723_v25 }
 0x4af   : > { %3597 = vpow2.f32 %v3464_v57  ;;  %v1357_v44 = vpop.permute.xlu1 %1356  ;;  %v1377_v15 = vpop.permute.xlu0 %1376  ;;  %v4776_v43 = vmul.f32 %v4753_v17, %v4760_v11  ;;  %v1547_v51 = vsel %vm4766_vm15, %v4705_v38, %v1543_v46  ;;  %v4817_v37 = vor.u32 1.1754944e-38, %v1685_v12 }
 0x4b0   : > { %v3588_v14 = vpop.eup %3587  ;;  %3599 = vpow2.f32 %v3465_v55  ;;  %v4782_v16 = vadd.f32 1e-05, %v956_v62  ;;  %v1408_v30 = vadd.f32 %v1357_v44, %v4656_v22  ;;  %v1409_v49 = vadd.f32 %v1357_v44, %v4661_v54 }
 0x4b1   : > { %v4786_v56 = vpop.eup %3589  ;;  %v4788_v42 = vadd.f32 1.0, %v3588_v14  ;;  %v1416_v60 = vadd.f32 %v1377_v15, %v4664_v39  ;;  %v1417_v2 = vadd.f32 %v1377_v15, %v4677_v31  ;;  %1956 = vmatmul.f32.vlgmr.msrb.gmra.mxu2 %v4776_v43  ;;  %v4795_v38 = vsel %vm4747_vm3, %v1551_v53, %v1547_v51 }
 0x4b2   : > { %v4797_v13 = vpop.eup %3591  ;;  %3601 = vrsqrt.f32 %v4782_v16  ;;  %v3466_v22 = vmul.f32 -1.442695, %v1408_v30  ;;  %v3467_v54 = vmul.f32 -1.442695, %v1409_v49  ;;  %v4802_v4 = vmul.f32 %v4772_v63, %v4795_v38 }
 0x4b3   : > { %v3594_v8 = vpop.eup %3593  ;;  %v1334_v39 = vmul.f32 %v4565_v0, %v4121_v5  ;;  %3603 = vrcp.f32 %v4788_v42  ;;  %v3474_v31 = vmul.f32 -1.442695, %v1416_v60  ;;  %v3475_v5 = vmul.f32 -1.442695, %v1417_v2 }
 0x4b4   : > { %v4807_v20 = vpop.eup %3595  ;;  %v4811_v27 = vadd.f32 1.0, %v3594_v8  ;;  %3605 = vpow2.f32 %v3466_v22  ;;  %2033 = vmatmul.f32.vlgmr.msrb.gmra.mxu3 %v4802_v4  ;;  %v1625_v7 = vand.u32 2147483648, %v4788_v42  ;;  %vm1088_vm2 = vweird.f32 %v4736_v3 }
 0x4b5   : > { %v3598_v52 = vpop.eup %3597  ;;  %v1083_v36 = vmul.f32 %v4807_v20, %v4736_v3  ;;  %3607 = vpow2.f32 %v3467_v54  ;;  %v4826_v0 = vmul.f32 %v4786_v56, %v4723_v25  ;;  %v1623_v33 = vand.u32 2147483647, %v4788_v42 }
 0x4b6   : > { %v3600_v50 = vpop.eup %3599  ;;  %3609 = vrcp.f32 %v4811_v27  ;;  %v4820_v9 = vadd.f32 1.0, %v3598_v52  ;;  %vm1089_vm4 = vweird.f32 %v4807_v20  ;;  %vm1619_vm5 = vweird.f32 %v4788_v42 }
 0x4b7   : > { %v1084_v41 = vmul.f32 %v4807_v20, %v1083_v36  ;;  %v4829_v18 = vadd.f32 1.0, %v3600_v50  ;;  %3611 = vpow2.f32 %v3474_v31  ;;  %v1382_v10 = vpop.permute.xlu1 %1381  ;;  %v931_v28 = vpop.permute.xlu0 %930  ;;  %v1626_v62 = vor.u32 1.1754944e-38, %v1625_v7  ;;  %vm4895_vm13 = vmor %vm1088_vm2, %vm1089_vm4 }
 0x4b8   : > { %v4832_v57 = vpop.eup %3601  ;;  %3613 = vrcp.f32 %v4820_v9  ;;  %v1418_v61 = vadd.f32 %v1382_v10, %v1334_v39  ;;  %v1419_v45 = vadd.f32 %v1382_v10, %v1335_v58  ;;  %v957_v24 = vsub.f32 %v4485_v59, %v931_v28 }
 0x4b9   : > { %v4836_v55 = vpop.eup %3603  ;;  %v1085_v47 = vmul.f32 0.5, %v1084_v41  ;;  %3615 = vrcp.f32 %v4829_v18  ;;  %v1053_v53 = vmul.f32 %v4832_v57, %v4782_v16  ;;  %v1676_v19 = vsub.f32 1.0, %v4826_v0 }
 0x4ba   : > { %v3606_v34 = vpop.eup %3605  ;;  %3617 = vpow2.f32 %v3475_v5  ;;  %v3476_v46 = vmul.f32 -1.442695, %v1418_v61  ;;  %v3477_v12 = vmul.f32 -1.442695, %v1419_v45  ;;  %v1615_v14 = vmul.f32 %v4836_v55, %v4788_v42 }
 0x4bb   : > { %v3608_v44 = vpop.eup %3607  ;;  %v1054_v15 = vmul.f32 %v4832_v57, %v1053_v53  ;;  %v4845_v51 = vadd.f32 1.0, %v3606_v34  ;;  %vm4849_vm6 = vcmp.eq.f32.partialorder %v1623_v33, 8.507059e+37  ;;  %v1086_v2 = vsub.f32 1.5, %v1085_v47 }
 0x4bc   : > { %v4853_v49 = vpop.eup %3609  ;;  %v4855_v60 = vadd.f32 1.0, %v3608_v44  ;;  %3619 = vpow2.f32 %v3476_v46  ;;  %v1563_v22 = vand.u32 2147483647, %v4820_v9  ;;  %vm1679_vm7 = vweird.f32 %v4723_v25 }
 0x4bd   : > { %v3612_v54 = vpop.eup %3611  ;;  %3621 = vrcp.f32 %v4845_v51  ;;  %v4860_v8 = vadd.f32 1e-05, %v957_v24  ;;  %v1616_v39 = vsub.f32 1.0, %v1615_v14  ;;  %vm1620_vm8 = vweird.f32 %v4836_v55 }
 0x4be   : > { %vm1559_vm9 = vweird.f32 %v4820_v9  ;;  %v3614_v31 = vpop.eup %3613  ;;  %v4864_v58 = vmul.f32 0.5, %v1054_v15  ;;  %3623 = vrcp.f32 %v4855_v60  ;;  %v4867_v52 = vadd.f32 1.0, %v3612_v54  ;;  %vm1621_vm14 = vmor %vm1619_vm5, %vm1620_vm8 }
 0x4bf   : > { %v1565_v36 = vand.u32 2147483648, %v4820_v9  ;;  %v4870_v5 = vpop.eup %3615  ;;  %3625 = vpow2.f32 %v3477_v12  ;;  %v933_v50 = vpop.permute.xlu1 %932  ;;  %v1617_v7 = vmul.f32 %v4836_v55, %v1616_v39  ;;  %v1087_v0 = vmul.f32 %v4807_v20, %v1086_v2 }
 0x4c0   : > { %v1555_v41 = vmul.f32 %v3614_v31, %v4820_v9  ;;  %vm4877_vm10 = vcmp.eq.f32.partialorder %v1683_v40, 8.507059e+37  ;;  %v3618_v28 = vpop.eup %3617  ;;  %3627 = vrcp.f32 %v4867_v52  ;;  %v958_v33 = vsub.f32 %v4489_v6, %v933_v50 }
 0x4c1   : > { %vm1560_vm11 = vweird.f32 %v3614_v31  ;;  %vm4883_vm12 = vcmp.eq.f32.partialorder %v1563_v22, 8.507059e+37  ;;  %v4887_v45 = vadd.f32 1.0, %v3618_v28  ;;  %3629 = vrsqrt.f32 %v4860_v8 }
 0x4c2   : > { %v1618_v47 = vadd.f32 %v4836_v55, %v1617_v7  ;;  %v1556_v53 = vsub.f32 1.0, %v1555_v41  ;;  %v3620_v24 = vpop.eup %3619  ;;  %v4899_v34 = vadd.f32 1e-05, %v958_v33  ;;  %v1677_v46 = vmul.f32 %v4786_v56, %v1676_v19  ;;  %vm1561_vm2 = vmor %vm1559_vm9, %vm1560_vm11 }
 0x4c3   : > { %vm1680_vm3 = vweird.f32 %v4786_v56  ;;  %v1570_v3 = vmul.f32 %v4870_v5, %v4829_v18  ;;  %v4909_v44 = vpop.eup %3621  ;;  %3631 = vrcp.f32 %v4887_v45  ;;  %v4912_v15 = vadd.f32 1.0, %v3620_v24 }
 0x4c4   : > { %v1622_v12 = vsel %vm1621_vm14, %v4836_v55, %v1618_v47  ;;  %v1557_v14 = vmul.f32 %v3614_v31, %v1556_v53  ;;  %v4915_v2 = vpop.eup %3623  ;;  %3633 = vrsqrt.f32 %v4899_v34  ;;  %v1678_v19 = vadd.f32 %v4786_v56, %v1677_v46  ;;  %vm4932_vm15 = vmor %vm1679_vm7, %vm1680_vm3 }
 0x4c5   : > { %v4920_v42 = vsel %vm4849_vm6, %v1626_v62, %v1622_v12  ;;  %v1571_v22 = vsub.f32 1.0, %v1570_v3  ;;  %v3626_v54 = vpop.eup %3625  ;;  %3635 = vrcp.f32 %v4912_v15  ;;  %v1091_v55 = vsel %vm4895_vm13, %v4807_v20, %v1087_v0 }
 0x4c6   : > { %2536 = vmatpush.msrb.mxu0 %v4920_v42  ;;  %v1558_v39 = vadd.f32 %v3614_v31, %v1557_v14  ;;  %v1566_v50 = vor.u32 1.1754944e-38, %v1565_v36  ;;  %v4936_v30 = vpop.eup %3627  ;;  %v4938_v7 = vadd.f32 1.0, %v3626_v54  ;;  %v1682_v20 = vsel %vm4932_vm15, %v4786_v56, %v1678_v19 }
 0x4c7   : > { %v1572_v36 = vmul.f32 %v4870_v5, %v1571_v22  ;;  %v1578_v25 = vand.u32 2147483647, %v4829_v18  ;;  %v3630_v0 = vpop.eup %3629  ;;  %v1127_v41 = vpop.permute.xlu1 %1126  ;;  %vm1575_vm4 = vweird.f32 %v4870_v5  ;;  %v1580_v33 = vand.u32 2147483648, %v4829_v18 }
 0x4c8   : > { %v1562_v28 = vsel %vm1561_vm2, %v3614_v31, %v1558_v39  ;;  %v1690_v47 = vmul.f32 %v4797_v13, %v4734_v1  ;;  %v1063_v9 = vmul.f32 %v3630_v0, %v4860_v8  ;;  %v4953_v40 = vmul.f32 %v1127_v41, %v1091_v55 }
 0x4c9   : > { %v4957_v56 = vsel %vm4883_vm12, %v1566_v50, %v1562_v28  ;;  %v4962_v53 = vsel %vm4877_vm10, %v4817_v37, %v1682_v20  ;;  %v4964_v31 = vpop.eup %3631  ;;  %3637 = vrcp.f32 %v4938_v7  ;;  %v1573_v46 = vadd.f32 %v4870_v5, %v1572_v36 }
 0x4ca   : > { %v4969_v24 = vmul.f32 %v4962_v53, %v4957_v56  ;;  %vm1574_vm5 = vweird.f32 %v4829_v18  ;;  %v4973_v61 = vpop.eup %3633  ;;  %v1064_v3 = vmul.f32 %v3630_v0, %v1063_v9  ;;  %vm1579_vm7 = vcmp.eq.f32.partialorder %v1578_v25, 8.507059e+37  ;;  %1186 = vrot.lane.b32.xlu0 %v4953_v40, %s3933_s12 }
 0x4cb   : > { %vm4975_vm6 = vmor %vm1574_vm5, %vm1575_vm4  ;;  %v1581_v37 = vor.u32 1.1754944e-38, %v1580_v33  ;;  %v1691_v10 = vsub.f32 1.0, %v1690_v47  ;;  %v4981_v14 = vpop.eup %3635  ;;  %v1073_v19 = vmul.f32 %v4973_v61, %v4899_v34  ;;  %v1698_v22 = vand.u32 2147483647, %v4734_v1 }
 0x4cc   : > { %1959 = vmatmul.f32.gmra.mxu2 %v4969_v24  ;;  %v1577_v18 = vsel %vm4975_vm6, %v4870_v5, %v1573_v46  ;;  %v1700_v54 = vand.u32 2147483648, %v4734_v1  ;;  %v1065_v55 = vmul.f32 0.5, %v1064_v3  ;;  %vm1694_vm8 = vweird.f32 %v4734_v1  ;;  %v1123_v46 = vpop.permute.xlu2 %1122 }
 0x4cd   : > { %v1692_v39 = vmul.f32 %v4797_v13, %v1691_v10  ;;  %vm1695_vm9 = vweird.f32 %v4797_v13  ;;  %v1074_v50 = vmul.f32 %v4973_v61, %v1073_v19  ;;  %v4995_v62 = vsel %vm1579_vm7, %v1581_v37, %v1577_v18 }
 0x4ce   : > { %vm4997_vm10 = vcmp.eq.f32.partialorder %v1698_v22, 8.507059e+37  ;;  %vm1068_vm11 = vweird.f32 %v4860_v8  ;;  %v1066_v36 = vsub.f32 1.5, %v1065_v55  ;;  %vm1069_vm12 = vweird.f32 %v3630_v0  ;;  %vm1696_vm13 = vmor %vm1694_vm8, %vm1695_vm9 }
 0x4cf   : > { %v1693_v5 = vadd.f32 %v4797_v13, %v1692_v39  ;;  %v1585_v25 = vmul.f32 %v4909_v44, %v4845_v51  ;;  %v5005_v1 = vpop.eup %3637  ;;  %v1701_v41 = vor.u32 1.1754944e-38, %v1700_v54  ;;  %vm1589_vm14 = vweird.f32 %v4845_v51  ;;  %vm1070_vm3 = vmor %vm1068_vm11, %vm1069_vm12  ;;  %v1121_v55 = vpop.permute.xlu1 %1120 }
 0x4d0   : > { %v1593_v28 = vand.u32 2147483647, %v4845_v51  ;;  %v1595_v33 = vand.u32 2147483648, %v4845_v51  ;;  %v1067_v9 = vmul.f32 %v3630_v0, %v1066_v36  ;;  %v1056_v12 = vsub.f32 1.5, %v4864_v58 }
 0x4d1   : > { %v1697_v47 = vsel %vm1696_vm13, %v4797_v13, %v1693_v5  ;;  %v1586_v3 = vsub.f32 1.0, %v1585_v25  ;;  %v5012_v37 = vmul.f32 0.5, %v1074_v50  ;;  %vm1590_vm15 = vweird.f32 %v4909_v44 }
 0x4d2   : > { %v5016_v10 = vsel %vm4997_vm10, %v1701_v41, %v1697_v47  ;;  %vm5022_vm2 = vcmp.eq.f32.partialorder %v1593_v28, 8.507059e+37  ;;  %v1071_v58 = vsel %vm1070_vm3, %v3630_v0, %v1067_v9  ;;  %v1057_v22 = vmul.f32 %v4832_v57, %v1056_v12  ;;  %vm1591_vm7 = vmor %vm1589_vm14, %vm1590_vm15 }
 0x4d3   : > { %v5028_v13 = vmul.f32 %v5016_v10, %v4995_v62  ;;  %v1587_v18 = vmul.f32 %v4909_v44, %v1586_v3  ;;  %v5032_v54 = vmul.f32 %v1123_v46, %v1071_v58  ;;  %vm1058_vm4 = vweird.f32 %v4782_v16 }
 0x4d4   : > { %vm1059_vm5 = vweird.f32 %v4832_v57  ;;  %v1705_v8 = vmul.f32 %v4936_v30, %v4867_v52  ;;  %v1596_v50 = vor.u32 1.1754944e-38, %v1595_v33  ;;  %v1713_v0 = vand.u32 2147483647, %v4867_v52 }
 0x4d5   : > { %2036 = vmatmul.f32.gmra.mxu3 %v5028_v13  ;;  %v1588_v39 = vadd.f32 %v4909_v44, %v1587_v18  ;;  %vm1060_vm6 = vmor %vm1058_vm4, %vm1059_vm5  ;;  %v1715_v20 = vand.u32 2147483648, %v4867_v52  ;;  %vm1709_vm8 = vweird.f32 %v4867_v52  ;;  %v1600_v36 = vmul.f32 %v4915_v2, %v4855_v60  ;;  %1182 = vrot.lane.b32.xlu1 %v5032_v54, %s3933_s12 }
 0x4d6   : > { %v1061_v16 = vsel %vm1060_vm6, %v4832_v57, %v1057_v22  ;;  %v1706_v5 = vsub.f32 1.0, %v1705_v8  ;;  %vm1710_vm9 = vweird.f32 %v4936_v30  ;;  %vm1604_vm10 = vweird.f32 %v4855_v60 }
 0x4d7   : > { %v1592_v25 = vsel %vm1591_vm7, %v4909_v44, %v1588_v39  ;;  %v5053_v41 = vmul.f32 %v1121_v55, %v1061_v16  ;;  %vm5062_vm11 = vcmp.eq.f32.partialorder %v1713_v0, 8.507059e+37  ;;  %v1601_v33 = vsub.f32 1.0, %v1600_v36  ;;  %vm1711_vm14 = vmor %vm1709_vm8, %vm1710_vm9 }
 0x4d8   : > { %v5059_v57 = vsel %vm5022_vm2, %v1596_v50, %v1592_v25  ;;  %v1707_v51 = vmul.f32 %v4936_v30, %v1706_v5  ;;  %v1716_v44 = vor.u32 1.1754944e-38, %v1715_v20  ;;  %v1608_v47 = vand.u32 2147483647, %v4855_v60 }
 0x4d9   : > { %2537 = vmatpush.msrb.mxu0 %v5059_v57  ;;  %v1610_v9 = vand.u32 2147483648, %v4855_v60  ;;  %v1720_v46 = vmul.f32 %v4964_v31, %v4887_v45  ;;  %1180 = vrot.lane.b32.xlu0 %v5053_v41, %s3933_s12  ;;  %v1602_v12 = vmul.f32 %v4915_v2, %v1601_v33  ;;  %vm1605_vm12 = vweird.f32 %v4915_v2  ;;  %v1125_v60 = vpop.permute.xlu0 %1124 }
 0x4da   : > { %v1708_v3 = vadd.f32 %v4936_v30, %v1707_v51  ;;  %vm1724_vm13 = vweird.f32 %v4887_v45  ;;  %vm1725_vm3 = vweird.f32 %v4964_v31  ;;  %v1728_v58 = vand.u32 2147483647, %v4887_v45  ;;  %vm5098_vm2 = vmor %vm1604_vm10, %vm1605_vm12 }
 0x4db   : > { %v1721_v19 = vsub.f32 1.0, %v1720_v46  ;;  %v1730_v18 = vand.u32 2147483648, %v4887_v45  ;;  %2538 = vmatpush.msrb.mxu0 %v4957_v56  ;;  %v1603_v55 = vadd.f32 %v4915_v2, %v1602_v12  ;;  %vm5087_vm15 = vcmp.eq.f32.partialorder %v1608_v47, 8.507059e+37  ;;  %vm1726_vm8 = vmor %vm1724_vm13, %vm1725_vm3 }
 0x4dc   : > { %v1712_v22 = vsel %vm1711_vm14, %v4936_v30, %v1708_v3  ;;  %v1076_v52 = vsub.f32 1.5, %v5012_v37  ;;  %v1611_v0 = vor.u32 1.1754944e-38, %v1610_v9  ;;  %vm1078_vm4 = vweird.f32 %v4899_v34 }
 0x4dd   : > { %v5094_v39 = vsel %vm5062_vm11, %v1716_v44, %v1712_v22  ;;  %v1722_v30 = vmul.f32 %v4964_v31, %v1721_v19  ;;  %2539 = vmatpush.msrb.mxu0 %v4760_v11  ;;  %v1607_v20 = vsel %vm5098_vm2, %v4915_v2, %v1603_v55  ;;  %vm1079_vm5 = vweird.f32 %v4973_v61 }
 0x4de   : > { %v5107_v37 = vmul.f32 %v5094_v39, %v5059_v57  ;;  %v1077_v16 = vmul.f32 %v4973_v61, %v1076_v52  ;;  %vm1729_vm6 = vcmp.eq.f32.partialorder %v1728_v58, 8.507059e+37  ;;  %v1731_v36 = vor.u32 1.1754944e-38, %v1730_v18  ;;  %vm1080_vm7 = vmor %vm1078_vm4, %vm1079_vm5 }
 0x4df   : > { %v1723_v5 = vadd.f32 %v4964_v31, %v1722_v30  ;;  %v1735_v34 = vmul.f32 %v4981_v14, %v4912_v15  ;;  %v5120_v25 = vsel %vm5087_vm15, %v1611_v0, %v1607_v20  ;;  %v1743_v51 = vand.u32 2147483647, %v4912_v15 }
 0x4e0   : > { %1962 = vmatmul.f32.gmra.mxu2 %v5107_v37  ;;  %v1081_v2 = vsel %vm1080_vm7, %v4973_v61, %v1077_v16  ;;  %v1745_v28 = vand.u32 2147483648, %v4912_v15  ;;  %v1630_v9 = vmul.f32 %v4853_v49, %v4811_v27  ;;  %vm1740_vm9 = vweird.f32 %v4981_v14 }
 0x4e1   : > { %v1727_v33 = vsel %vm1726_vm8, %v4964_v31, %v1723_v5  ;;  %v5130_v44 = vmul.f32 %v1125_v60, %v1081_v2  ;;  %v1736_v47 = vsub.f32 1.0, %v1735_v34  ;;  %vm1739_vm10 = vweird.f32 %v4912_v15 }
 0x4e2   : > { %v5134_v46 = vsel %vm1729_vm6, %v1731_v36, %v1727_v33  ;;  %v1631_v3 = vsub.f32 1.0, %v1630_v9  ;;  %v1750_v31 = vmul.f32 %v5005_v1, %v4938_v7  ;;  %vm1744_vm11 = vcmp.eq.f32.partialorder %v1743_v51, 8.507059e+37  ;;  %vm1741_vm12 = vmor %vm1739_vm10, %vm1740_vm9  ;;  %v5205_v33 = vld [vmem:[%s6245_s7 + $0x8] sm:$0xff] }
 0x4e3   : > { %v5138_v45 = vmul.f32 %v5134_v46, %v5120_v25  ;;  %v1737_v61 = vmul.f32 %v4981_v14, %v1736_v47  ;;  %1184 = vrot.lane.b32.xlu2 %v5130_v44, %s3933_s12  ;;  %v1746_v19 = vor.u32 1.1754944e-38, %v1745_v28  ;;  %vm1634_vm13 = vweird.f32 %v4811_v27 }
 0x4e4   : > { %v1632_v58 = vmul.f32 %v4853_v49, %v1631_v3  ;;  %vm1635_vm14 = vweird.f32 %v4853_v49  ;;  %v1638_v18 = vand.u32 2147483647, %v4811_v27  ;;  %v1751_v22 = vsub.f32 1.0, %v1750_v31 }
 0x4e5   : > { %2039 = vmatmul.f32.gmra.mxu3 %v5138_v45  ;;  %v1738_v12 = vadd.f32 %v4981_v14, %v1737_v61  ;;  %v1640_v8 = vand.u32 2147483648, %v4811_v27  ;;  %v1760_v52 = vand.u32 2147483648, %v4938_v7  ;;  %vm1755_vm3 = vweird.f32 %v5005_v1  ;;  %vm5165_vm15 = vmor %vm1634_vm13, %vm1635_vm14 }
 0x4e6   : > { %v1633_v55 = vadd.f32 %v4853_v49, %v1632_v58  ;;  %v1752_v0 = vmul.f32 %v5005_v1, %v1751_v22  ;;  %v1758_v30 = vand.u32 2147483647, %v4938_v7  ;;  %vm1754_vm2 = vweird.f32 %v4938_v7  ;;  %v2516_v58 = vld [vmem:[%s6245_s7 + $0x28] sm:$0xff] }
 0x4e7   : > { %v1742_v15 = vsel %vm1741_vm12, %v4981_v14, %v1738_v12  ;;  %v1641_v5 = vor.u32 1.1754944e-38, %v1640_v8  ;;  %vm1756_vm4 = vmor %vm1754_vm2, %vm1755_vm3  ;;  %v1761_v36 = vor.u32 1.1754944e-38, %v1760_v52  ;;  %v5181_v34 = vmul.f32 %v5094_v39, %v5094_v39  ;;  %v2514_v12 = vld [vmem:[%s6245_s7 + $0x18] sm:$0xff]  ;;  %v2520_v52 = vld [vmem:[%s6245_s7 + $0x48] sm:$0xff] }
 0x4e8   : > { %v5157_v50 = vsel %vm1744_vm11, %v1746_v19, %v1742_v15  ;;  %v1637_v60 = vsel %vm5165_vm15, %v4853_v49, %v1633_v55  ;;  %v1753_v16 = vadd.f32 %v5005_v1, %v1752_v0  ;;  %vm1639_vm5 = vcmp.eq.f32.partialorder %v1638_v18, 8.507059e+37  ;;  %v2511_v18 = vld [vmem:[%s6245_s7] sm:$0xff] }
 0x4e9   : > { %2580 = vmatpush.msrb.mxu1 %v5157_v50  ;;  %v1890_v20 = vmul.f32 %v5157_v50, %v4920_v42  ;;  %v5171_v27 = vmul.f32 %v5157_v50, %v5157_v50  ;;  %vm1759_vm6 = vcmp.eq.f32.partialorder %v1758_v30, 8.507059e+37  ;;  %v5185_v49 = vsel %vm1639_vm5, %v1641_v5, %v1637_v60  ;;  %v2515_v30 = vld [vmem:[%s6245_s7 + $0x20] sm:$0xff] }
 0x4ea   : > { %v1757_v2 = vsel %vm1756_vm4, %v5005_v1, %v1753_v16  ;;  %v5192_v7 = vmul.f32 %v4962_v53, %v4962_v53  ;;  %v1900_v1 = vmul.f32 %v4753_v17, %v4753_v17  ;;  %v1892_v47 = vmul.f32 %v4760_v11, %v4760_v11  ;;  %v2519_v14 = vld [vmem:[%s6245_s7 + $0x40] sm:$0xff] }
 0x4eb   : > { %1965 = vmatmul.f32.gmra.mxu2 %v1890_v20  ;;  %2540 = vmatpush.msrb.mxu0 %v5171_v27  ;;  %v5187_v51 = vsel %vm1759_vm6, %v1761_v36, %v1757_v2  ;;  %v1898_v9 = vmul.f32 %v4920_v42, %v4920_v42  ;;  %v1896_v61 = vmul.f32 %v5059_v57, %v5059_v57  ;;  %vm2866_vm7 = vcmask 64512  }
 0x4ec   : > { %2581 = vmatpush.msrb.mxu1 %v5094_v39  ;;  %v5196_v28 = vmul.f32 %v5187_v51, %v5185_v49  ;;  %v1893_v3 = vmul.f32 %v4795_v38, %v4795_v38  ;;  %v1894_v31 = vmul.f32 %v4957_v56, %v4957_v56  ;;  %v1895_v19 = vmul.f32 %v4995_v62, %v4995_v62 }
 0x4ed   : > { %2541 = vmatpush.msrb.mxu0 %v5181_v34  ;;  %v1907_v22 = vmul.f32 %v5187_v51, %v5187_v51  ;;  %v1905_v15 = vmul.f32 %v5134_v46, %v5134_v46  ;;  %v1899_v55 = vmul.f32 %v5185_v49, %v5185_v49  ;;  %v1903_v8 = vmul.f32 %v5016_v10, %v5016_v10 }
 0x4ee   : > { %2582 = vmatpush.msrb.mxu1 %v4962_v53  ;;  %2042 = vmatmul.f32.gmra.mxu3 %v5196_v28  ;;  %v1901_v0 = vmul.f32 %v4772_v63, %v4772_v63  ;;  %vm2954_vm8 = vcmask 1043456   ;;  %vm2941_vm9 = vcmask 31744  }
 0x4ef   : > { %2542 = vmatpush.msrb.mxu0 %v5192_v7 }
 0x4f0   : > { %2583 = vmatpush.msrb.mxu1 %v4753_v17 }
 0x4f1   : > { %2543 = vmatpush.msrb.mxu0 %v1900_v1  ;;  %3486 = vmatmul.msk.f32.vlgmr.msrb.gmra.mxu1 %vm526_vm0, %v5205_v33 }
 0x4f2   : > { %2644 = vmatpush.msra.mxu1 %v5187_v51 }
 0x4f3   : > { %1968 = vmatmul.f32.gmra.mxu2 %v1892_v47  ;;  %2544 = vmatpush.msrb.mxu0 %v1898_v9 }
 0x4f4   : > { %2645 = vmatpush.msra.mxu1 %v5134_v46 }
 0x4f5   : > { %2545 = vmatpush.msrb.mxu0 %v1896_v61 }
 0x4f6   : > { %2646 = vmatpush.msra.mxu1 %v5016_v10  ;;  %2045 = vmatmul.f32.gmra.mxu3 %v1893_v3 }
 0x4f7   : > { %2546 = vmatpush.msrb.mxu0 %v1894_v31 }
 0x4f8   : > { %2647 = vmatpush.msra.mxu1 %v4772_v63 }
 0x4f9   : > { %2547 = vmatpush.msrb.mxu0 %v1892_v47  ;;  %3487 = vmatmul.msk.f32.gmra.mxu1 %vm526_vm0, %v2514_v12 }
 0x4fb   : > { %1971 = vmatmul.f32.gmra.mxu2 %v1894_v31  ;;  %2548 = vmatpush.msrb.mxu0 %v1890_v20  ;;  %v2517_v20 = vld [vmem:[%s6245_s7 + $0x30] sm:$0xff] }
 0x4fd   : > { %2549 = vmatpush.msrb.mxu0 %v5107_v37  ;;  %v1897_v37 = vmul.f32 %v5120_v25, %v5120_v25 }
 0x4fe   : > { %2048 = vmatmul.f32.gmra.mxu3 %v1895_v19 }
 0x4ff   : > { %2550 = vmatpush.msrb.mxu0 %v4969_v24  ;;  %v2518_v24 = vld [vmem:[%s6245_s7 + $0x38] sm:$0xff] }
 0x501   : > { %2551 = vmatpush.msrb.mxu0 %v4776_v43  ;;  %3488 = vmatmul.msk.f32.gmra.mxu1 %vm526_vm0, %v2516_v58  ;;  %v2513_v43 = vld [vmem:[%s6245_s7 + $0x10] sm:$0xff] }
 0x502   : > { %2552 = vmatmul.f32.vlgmr.msrb.gmra.mxu0 %v2511_v18 }
 0x503   : > { %1974 = vmatmul.f32.gmra.mxu2 %v1896_v61  ;;  %2600 = vmatpush.msra.mxu0 %v5185_v49 }
 0x505   : > { %2601 = vmatpush.msra.mxu0 %v5120_v25 }
 0x506   : > { %2051 = vmatmul.f32.gmra.mxu3 %v1897_v37 }
 0x507   : > { %2602 = vmatpush.msra.mxu0 %v4995_v62 }
 0x509   : > { %2603 = vmatpush.msra.mxu0 %v4795_v38  ;;  %3489 = vmatmul.msk.f32.gmra.mxu1 %vm526_vm0, %v2518_v24 }
 0x50a   : > { %2555 = vmatmul.f32.gmra.mxu0 %v2513_v43 }
 0x50b   : > { %1977 = vmatmul.f32.gmra.mxu2 %v1898_v9  ;;  %2604 = vmatpush.msra.mxu0 %v1907_v22 }
 0x50d   : > { %2605 = vmatpush.msra.mxu0 %v1905_v15 }
 0x50e   : > { %2054 = vmatmul.f32.gmra.mxu3 %v1899_v55 }
 0x50f   : > { %2606 = vmatpush.msra.mxu0 %v1903_v8 }
 0x511   : > { %2607 = vmatpush.msra.mxu0 %v1901_v0  ;;  %3490 = vmatmul.msk.f32.gmra.mxu1 %vm526_vm0, %v2520_v52 }
 0x512   : > { %2558 = vmatmul.f32.gmra.mxu0 %v2515_v30 }
 0x513   : > { %1980 = vmatmul.f32.gmra.mxu2 %v1900_v1  ;;  %2608 = vmatpush.msra.mxu0 %v1899_v55 }
 0x515   : > { %2609 = vmatpush.msra.mxu0 %v1897_v37 }
 0x516   : > { %2057 = vmatmul.f32.gmra.mxu3 %v1901_v0 }
 0x517   : > { %2610 = vmatpush.msra.mxu0 %v1895_v19 }
 0x519   : > { %2611 = vmatpush.msra.mxu0 %v1893_v3  ;;  %3491 = vmatmul.msk.f32.vlgmr.msra.gmra.mxu1 %vm526_vm0, %v5205_v33 }
 0x51a   : > { %2561 = vmatmul.f32.gmra.mxu0 %v2517_v20 }
 0x51b   : > { %1983 = vmatmul.f32.gmra.mxu2 %v5192_v7  ;;  %2612 = vmatpush.msra.mxu0 %v5196_v28 }
 0x51d   : > { %2613 = vmatpush.msra.mxu0 %v5138_v45 }
 0x51e   : > { %2060 = vmatmul.f32.gmra.mxu3 %v1903_v8 }
 0x51f   : > { %2614 = vmatpush.msra.mxu0 %v5028_v13 }
 0x521   : > { %2615 = vmatpush.msra.mxu0 %v4802_v4  ;;  %3492 = vmatmul.msk.f32.gmra.mxu1 %vm526_vm0, %v2514_v12 }
 0x522   : > { %2564 = vmatmul.f32.gmra.mxu0 %v2519_v14 }
 0x523   : > { %1986 = vmatmul.f32.gmra.mxu2 %v5181_v34 }
 0x526   : > { %2063 = vmatmul.f32.gmra.mxu3 %v1905_v15 }
 0x529   : > { %3493 = vmatmul.msk.f32.gmra.mxu1 %vm526_vm0, %v2516_v58 }
 0x52a   : > { %2616 = vmatmul.f32.vlgmr.msra.gmra.mxu0 %v2511_v18 }
 0x52b   : > { %1989 = vmatmul.f32.gmra.mxu2 %v5171_v27 }
 0x52e   : > { %2066 = vmatmul.f32.gmra.mxu3 %v1907_v22 }
 0x531   : > { %3494 = vmatmul.msk.f32.gmra.mxu1 %vm526_vm0, %v2518_v24 }
 0x532   : > { %2619 = vmatmul.f32.gmra.mxu0 %v2513_v43 }
 0x533   : > { %1992 = vmatmul.f32.gmra.mxu2 %v4760_v11 }
 0x536   : > { %2069 = vmatmul.f32.gmra.mxu3 %v4795_v38 }
 0x539   : > { %3495 = vmatmul.msk.f32.gmra.mxu1 %vm526_vm0, %v2520_v52 }
 0x53a   : > { %2622 = vmatmul.f32.gmra.mxu0 %v2515_v30 }
 0x53b   : > { %1995 = vmatmul.f32.gmra.mxu2 %v4957_v56  ;;  %v1957_v56 = vpop.f32.mrf.mxu2 }
 0x53c   : > { %v1187_v13 = vpop.permute.xlu0 %1186 }
 0x53d   : > { %v1185_v4 = vpop.permute.xlu2 %1184  ;;  %v1211_v60 = vmul.f32 %v1187_v13, %v4497_v32 }
 0x53e   : > { %v1210_v45 = vmul.f32 %v1185_v4, %v4489_v6  ;;  %2072 = vmatmul.f32.gmra.mxu3 %v4995_v62  ;;  %v2034_v62 = vpop.f32.mrf.mxu3 }
 0x53f   : > { %1246 = vrot.lane.b32.xlu2 %v1211_v60, %s3932_s30  ;;  %v2035_v31 = vadd.f32 %v2034_v62, %v1957_v56 }
 0x540   : > { %1244 = vrot.lane.b32.xlu1 %v1210_v45, %s3932_s30 }
 0x541   : > { %v5332_v37 = vmul.f32 0.25, %v2035_v31 }
 0x542   : > { %2625 = vmatmul.f32.gmra.mxu0 %v2517_v20 }
 0x543   : > { %1998 = vmatmul.f32.gmra.mxu2 %v5059_v57  ;;  %v2122_v8 = vmul.f32 2.0, %v5332_v37  ;;  %v5348_v0 = vadd.f32 1e-05, %v5332_v37 }
 0x546   : > { %2075 = vmatmul.f32.gmra.mxu3 %v5120_v25 }
 0x547   : > { %v1183_v11 = vpop.permute.xlu1 %1182 }
 0x548   : > { %1317 = vperm.xlu1 %3548, %v4953_v40   ;;  %v1209_v38 = vmul.f32 %v1183_v11, %v4485_v59 }
 0x54a   : > { %2628 = vmatmul.f32.gmra.mxu0 %v2519_v14  ;;  %1242 = vrot.lane.b32.xlu0 %v1209_v38, %s3932_s30 }
 0x54b   : > { %2001 = vmatmul.f32.gmra.mxu2 %v4920_v42  ;;  %v1181_v6 = vpop.permute.xlu0 %1180 }
 0x54c   : > { %v1208_v32 = vmul.f32 %v1181_v6, %v4482_v26 }
 0x54e   : > { %1240 = vrot.lane.b32.xlu2 %v1208_v32, %s3932_s30  ;;  %2078 = vmatmul.f32.gmra.mxu3 %v5185_v49 }
 0x54f   : > { %v1960_v59 = vpop.f32.mrf.mxu2 }
 0x550   : > { %1309 = vperm.xlu1 %3548, %v5032_v54  }
 0x552   : > { %1313 = vperm.xlu0 %3549, %v5130_v44  }
 0x553   : > { %2004 = vmatmul.f32.gmra.mxu2 %v4753_v17 }
 0x556   : > { %2081 = vmatmul.f32.gmra.mxu3 %v4772_v63 }
 0x558   : > { %v2037_v42 = vpop.f32.mrf.mxu3 }
 0x559   : > { %v2038_v40 = vadd.f32 %v2037_v42, %v1960_v59 }
 0x55b   : > { %2007 = vmatmul.f32.gmra.mxu2 %v4962_v53  ;;  %v5352_v38 = vmul.f32 0.25, %v2038_v40 }
 0x55e   : > { %2084 = vmatmul.f32.gmra.mxu3 %v5016_v10 }
 0x563   : > { %2010 = vmatmul.f32.gmra.mxu2 %v5094_v39  ;;  %v1963_v26 = vpop.f32.mrf.mxu2 }
 0x566   : > { %2087 = vmatmul.f32.gmra.mxu3 %v5134_v46 }
 0x568   : > { %v2040_v57 = vpop.f32.mrf.mxu3 }
 0x569   : > { %v2041_v54 = vadd.f32 %v2040_v57, %v1963_v26  ;;  %v2123_v57 = vmul.f32 2.0, %v5352_v38 }
 0x56b   : > { %2013 = vmatmul.f32.gmra.mxu2 %v5157_v50 }
 0x56e   : > { %v1966_v17 = vpop.f32.mrf.mxu2  ;;  %2090 = vmatmul.f32.gmra.mxu3 %v5187_v51  ;;  %v2585_v16 = vpop.f32.mrf.mxu1 }
 0x571   : > { %v2043_v25 = vpop.f32.mrf.mxu3 }
 0x572   : > { %v5317_v63 = vadd.f32 %v2043_v25, %v1966_v17  ;;  %v5363_v17 = vmul.f32 0.25, %v2041_v54 }
 0x576   : > { %v1969_v44 = vpop.f32.mrf.mxu2  ;;  %v2588_v46 = vpop.f32.mrf.mxu1 }
 0x579   : > { %v2046_v27 = vpop.f32.mrf.mxu3 }
 0x57a   : > { %v2047_v53 = vadd.f32 %v2046_v27, %v1969_v44 }
 0x57c   : > { %v5337_v22 = vmul.f32 0.25, %v2047_v53  ;;  %v5370_v53 = vadd.f32 1e-05, %v5352_v38 }
 0x57e   : > { %v1972_v10 = vpop.f32.mrf.mxu2  ;;  %v2591_v51 = vpop.f32.mrf.mxu1 }
 0x57f   : > { %v2553_v5 = vpop.f32.mrf.mxu0 }
 0x580   : > { %v5325_v9 = vadd.f32 %v2585_v16, %v2553_v5 }
 0x581   : > { %v2049_v39 = vpop.f32.mrf.mxu3 }
 0x582   : > { %v2050_v36 = vadd.f32 %v2049_v39, %v1972_v10  ;;  %v2668_v12 = vmul.f32 2.0, %v5325_v9  ;;  %v5335_v43 = vadd.f32 1e-05, %v5325_v9 }
 0x584   : > { %v5358_v59 = vmul.f32 0.25, %v2050_v36 }
 0x586   : > { %v1975_v34 = vpop.f32.mrf.mxu2  ;;  %v2594_v13 = vpop.f32.mrf.mxu1 }
 0x587   : > { %v2556_v2 = vpop.f32.mrf.mxu0 }
 0x588   : > { %v5327_v61 = vadd.f32 %v2588_v46, %v2556_v2  ;;  %v5373_v46 = vadd.f32 1e-05, %v5363_v17  ;;  %v2124_v2 = vmul.f32 2.0, %v5363_v17 }
 0x589   : > { %v2052_v49 = vpop.f32.mrf.mxu3 }
 0x58a   : > { %v5319_v7 = vadd.f32 %v2052_v49, %v1975_v34 }
 0x58e   : > { %v1978_v50 = vpop.f32.mrf.mxu2  ;;  %v2597_v5 = vpop.f32.mrf.mxu1 }
 0x58f   : > { %v2559_v28 = vpop.f32.mrf.mxu0 }
 0x590   : > { %v5321_v33 = vadd.f32 %v2591_v51, %v2559_v28 }
 0x591   : > { %v2055_v1 = vpop.f32.mrf.mxu3 }
 0x592   : > { %v5323_v47 = vadd.f32 %v2055_v1, %v1978_v50  ;;  %v2664_v3 = vadd.f32 %v5321_v33, %v5327_v61 }
 0x594   : > { %v2670_v58 = vsub.f32 %v2664_v3, %v2668_v12 }
 0x596   : > { %v1981_v19 = vpop.f32.mrf.mxu2  ;;  %v5342_v55 = vadd.f32 %v2670_v58, %v5335_v43  ;;  %v5382_v58 = vmul.f32 0.25, %v5319_v7  ;;  %v3919_v7 = vld [vmem:[%s6241_s3 + $0x58] sm:$0xff] }
 0x597   : > { %v2562_v4 = vpop.f32.mrf.mxu0 }
 0x598   : > { %v2676_v20 = vmul.f32 2.0, %v5342_v55  ;;  %v2595_v62 = vadd.f32 %v2594_v13, %v2562_v4 }
 0x599   : > { %v2058_v18 = vpop.f32.mrf.mxu3 }
 0x59a   : > { %v2059_v24 = vadd.f32 %v2058_v18, %v1981_v19  ;;  %v5355_v6 = vsub.f32 %v2676_v20, %v5335_v43  ;;  %v2758_v27 = vmul.f32 2.0, %v2595_v62  ;;  %v2752_v36 = vsub.f32 4.0, %v2595_v62 }
 0x59c   : > { %v5339_v15 = vmul.f32 0.25, %v2059_v24  ;;  %v2684_v40 = vmul.f32 2.0, %v5355_v6  ;;  %v2760_v31 = vsub.f32 4.0, %v2758_v27 }
 0x59e   : > { %v2114_v52 = vadd.f32 %v5339_v15, %v5337_v22  ;;  %v1984_v60 = vpop.f32.mrf.mxu2  ;;  %v5377_v49 = vsub.f32 %v2684_v40, %v5335_v43 }
 0x59f   : > { %v2565_v10 = vpop.f32.mrf.mxu0 }
 0x5a0   : > { %v2126_v30 = vsub.f32 %v2114_v52, %v2122_v8  ;;  %v2598_v34 = vadd.f32 %v2597_v5, %v2565_v10  ;;  %v2692_v4 = vmul.f32 2.0, %v5377_v49 }
 0x5a1   : > { %v2061_v11 = vpop.f32.mrf.mxu3 }
 0x5a2   : > { %v2130_v14 = vadd.f32 %v2126_v30, %v5348_v0  ;;  %v2062_v32 = vadd.f32 %v2061_v11, %v1984_v60  ;;  %v2754_v12 = vsub.f32 %v2752_v36, %v2598_v34  ;;  %v2764_v19 = vmul.f32 2.0, %v2598_v34 }
 0x5a4   : > { %v2138_v45 = vmul.f32 2.0, %v2130_v14  ;;  %3639 = vrcp.f32 %v2130_v14  ;;  %v5360_v42 = vmul.f32 0.25, %v2062_v32  ;;  %v2756_v30 = vadd.f32 %v2754_v12, %v5325_v9  ;;  %v1247_v14 = vpop.permute.xlu2 %1246 }
 0x5a5   : > { %v2766_v20 = vsub.f32 4.0, %v2764_v19  ;;  %v1271_v60 = vsub.f32 %v3919_v7, %v1247_v14 }
 0x5a6   : > { %v2142_v56 = vsub.f32 %v2138_v45, %v5348_v0  ;;  %v2115_v25 = vadd.f32 %v5360_v42, %v5358_v59  ;;  %v1987_v28 = vpop.f32.mrf.mxu2 }
 0x5a7   : > { %v2768_v9 = vadd.f32 %v2766_v20, %v5321_v33  ;;  %v5397_v40 = vpop.f32.mrf.mxu0  ;;  %1401 = vperm.xlu2 %3550, %v1271_v60   ;;  %v5405_v33 = vsub.f32 %v2692_v4, %v5335_v43 }
 0x5a8   : > { %3641 = vrcp.f32 %v2142_v56  ;;  %v2154_v26 = vmul.f32 2.0, %v2142_v56  ;;  %v2127_v16 = vsub.f32 %v2115_v25, %v2123_v57  ;;  %v2762_v56 = vadd.f32 %v2760_v31, %v5327_v61  ;;  %v5399_v25 = vpop.f32.mrf.mxu1 }
 0x5a9   : > { %v2064_v51 = vpop.f32.mrf.mxu3  ;;  %v5402_v61 = vmul.f32 0.25, %v5317_v63 }
 0x5aa   : > { %v2158_v44 = vsub.f32 %v2154_v26, %v5348_v0  ;;  %v3640_v54 = vpop.eup %3639  ;;  %v2131_v50 = vadd.f32 %v2127_v16, %v5370_v53  ;;  %v2065_v8 = vadd.f32 %v2064_v51, %v1987_v28  ;;  %v2770_v27 = vadd.f32 %v2768_v9, %v2762_v56 }
 0x5ab   : > { %v2774_v16 = vmul.f32 2.0, %v2756_v30  ;;  %v5427_v56 = vmul.f32 0.25, %v5323_v47 }
 0x5ac   : > { %3643 = vrcp.f32 %v2158_v44  ;;  %v2170_v39 = vmul.f32 2.0, %v2158_v44  ;;  %v2139_v24 = vmul.f32 2.0, %v2131_v50  ;;  %v5387_v45 = vmul.f32 0.25, %v2065_v8 }
 0x5ad   : > { %v2776_v28 = vsub.f32 %v2770_v27, %v2774_v16 }
 0x5ae   : > { %v3642_v1 = vpop.eup %3641  ;;  %v2174_v3 = vsub.f32 %v2170_v39, %v5348_v0  ;;  %v2143_v13 = vsub.f32 %v2139_v24, %v5370_v53  ;;  %v2116_v57 = vadd.f32 %v5387_v45, %v5382_v58  ;;  %v1990_v39 = vpop.f32.mrf.mxu2 }
 0x5af   : > { %v2150_v18 = vadd.f32 %v3642_v1, %v3640_v54  ;;  %1305 = vperm.xlu2 %3550, %v5053_v41  }
 0x5b0   : > { %3645 = vrcp.f32 %v2174_v3  ;;  %v2186_v52 = vmul.f32 2.0, %v2174_v3  ;;  %v2155_v26 = vmul.f32 2.0, %v2143_v13  ;;  %v2128_v5 = vsub.f32 %v2116_v57, %v2124_v2  ;;  %v2652_v57 = vpop.f32.mrf.mxu1 }
 0x5b1   : > { %3647 = vrcp.f32 %v2131_v50  ;;  %v2067_v36 = vpop.f32.mrf.mxu3  ;;  %v5410_v50 = vadd.f32 1e-05, %v2756_v30 }
 0x5b2   : > { %v3644_v11 = vpop.eup %3643  ;;  %v2190_v32 = vsub.f32 %v2186_v52, %v5348_v0  ;;  %3649 = vrcp.f32 %v2143_v13  ;;  %v2159_v10 = vsub.f32 %v2155_v26, %v5370_v53  ;;  %v2132_v1 = vadd.f32 %v2128_v5, %v5373_v46  ;;  %v2620_v26 = vpop.f32.mrf.mxu0 }
 0x5b3   : > { %v2166_v62 = vadd.f32 %v3644_v11, %v2150_v18  ;;  %v5414_v2 = vadd.f32 %v2776_v28, %v5410_v50  ;;  %v2068_v12 = vadd.f32 %v2067_v36, %v1990_v39 }
 0x5b4   : > { %3651 = vrcp.f32 %v2190_v32  ;;  %v2202_v44 = vmul.f32 2.0, %v2190_v32  ;;  %v2171_v63 = vmul.f32 2.0, %v2159_v10  ;;  %v2140_v24 = vmul.f32 2.0, %v2132_v1 }
 0x5b5   : > { %3653 = vrcp.f32 %v5342_v55  ;;  %v2700_v55 = vmul.f32 2.0, %v5405_v33  ;;  %v2782_v20 = vmul.f32 2.0, %v5414_v2  ;;  %v5424_v11 = vmul.f32 0.25, %v2068_v12 }
 0x5b6   : > { %v3646_v34 = vpop.eup %3645  ;;  %v2206_v54 = vsub.f32 %v2202_v44, %v5348_v0  ;;  %3655 = vrcp.f32 %v2159_v10  ;;  %v2175_v18 = vsub.f32 %v2171_v63, %v5370_v53  ;;  %v2144_v13 = vsub.f32 %v2140_v24, %v5373_v46  ;;  %v5434_v5 = vpop.f32.mrf.mxu2 }
 0x5b7   : > { %v2182_v51 = vadd.f32 %v3646_v34, %v2166_v62  ;;  %v3648_v3 = vpop.eup %3647  ;;  %v2784_v60 = vsub.f32 %v2782_v20, %v5410_v50  ;;  %v2702_v41 = vsub.f32 %v2700_v55, %v5335_v43  ;;  %v2117_v63 = vadd.f32 %v5424_v11, %v5427_v56 }
 0x5b8   : > { %3657 = vrcp.f32 %v2206_v54  ;;  %v2218_v31 = vmul.f32 2.0, %v2206_v54  ;;  %v3650_v19 = vpop.eup %3649  ;;  %v2187_v4 = vmul.f32 2.0, %v2175_v18  ;;  %v2156_v62 = vmul.f32 2.0, %v2144_v13 }
 0x5b9   : > { %3659 = vrcp.f32 %v5355_v6  ;;  %v2151_v30 = vadd.f32 %v3650_v19, %v3648_v3  ;;  %v2790_v10 = vmul.f32 2.0, %v2784_v60  ;;  %v5437_v54 = vpop.f32.mrf.mxu3  ;;  %v5450_v55 = vadd.f32 1e-05, %v5402_v61 }
 0x5ba   : > { %v3652_v8 = vpop.eup %3651  ;;  %v2222_v52 = vsub.f32 %v2218_v31, %v5348_v0  ;;  %3661 = vrcp.f32 %v2132_v1  ;;  %v2191_v9 = vsub.f32 %v2187_v4, %v5370_v53  ;;  %v2160_v34 = vsub.f32 %v2156_v62, %v5373_v46  ;;  %v2655_v62 = vpop.f32.mrf.mxu1 }
 0x5bb   : > { %v2198_v14 = vadd.f32 %v3652_v8, %v2182_v51  ;;  %3663 = vrcp.f32 %v2175_v18  ;;  %v3654_v6 = vpop.eup %3653  ;;  %v2125_v51 = vmul.f32 2.0, %v5402_v61  ;;  %v5447_v31 = vsub.f32 %v2790_v10, %v5410_v50 }
 0x5bc   : > { %3665 = vrcp.f32 %v2222_v52  ;;  %v2234_v7 = vmul.f32 2.0, %v2222_v52  ;;  %v3656_v32 = vpop.eup %3655  ;;  %v2203_v47 = vmul.f32 2.0, %v2191_v9  ;;  %v2172_v12 = vmul.f32 2.0, %v2160_v34  ;;  %v1243_v29 = vpop.permute.xlu0 %1242 }
 0x5bd   : > { %3667 = vrcp.f32 %v2144_v13  ;;  %v2167_v16 = vadd.f32 %v3656_v32, %v2151_v30  ;;  %v2129_v24 = vsub.f32 %v2117_v63, %v2125_v51  ;;  %v5470_v63 = vadd.f32 %v2652_v57, %v2620_v26 }
 0x5be   : > { %v3658_v44 = vpop.eup %3657  ;;  %v5432_v27 = vsub.f32 %v2234_v7, %v5348_v0  ;;  %3669 = vrcp.f32 %v2191_v9  ;;  %v5444_v3 = vsub.f32 %v2203_v47, %v5370_v53  ;;  %v2176_v30 = vsub.f32 %v2172_v12, %v5373_v46  ;;  %v2623_v9 = vpop.f32.mrf.mxu0 }
 0x5bf   : > { %v3660_v39 = vpop.eup %3659  ;;  %v2214_v36 = vadd.f32 %v3658_v44, %v2198_v14  ;;  %3671 = vrcp.f32 %v5377_v49  ;;  %v2708_v49 = vmul.f32 2.0, %v2702_v41  ;;  %v2133_v14 = vadd.f32 %v2129_v24, %v5450_v55  ;;  %v1245_v47 = vpop.permute.xlu1 %1244 }
 0x5c0   : > { %v3662_v28 = vpop.eup %3661  ;;  %3673 = vrcp.f32 %v2160_v34  ;;  %v2682_v13 = vadd.f32 %v3660_v39, %v3654_v6  ;;  %v2798_v7 = vmul.f32 2.0, %v5447_v31  ;;  %v2188_v32 = vmul.f32 2.0, %v2176_v30  ;;  %v1996_v34 = vpop.f32.mrf.mxu2 }
 0x5c1   : > { %v3664_v1 = vpop.eup %3663  ;;  %3675 = vrcp.f32 %v5405_v33  ;;  %v5463_v33 = vadd.f32 %v5399_v25, %v5397_v40  ;;  %v5467_v39 = vadd.f32 %v2655_v62, %v2623_v9  ;;  %v3920_v40 = vld [vmem:[%s6241_s3 + $0x50] sm:$0xff] }
 0x5c2   : > { %v3666_v19 = vpop.eup %3665  ;;  %v2183_v18 = vadd.f32 %v3664_v1, %v2167_v16  ;;  %3677 = vrcp.f32 %v2702_v41  ;;  %v2141_v41 = vmul.f32 2.0, %v2133_v14  ;;  %v2192_v6 = vsub.f32 %v2188_v32, %v5373_v46 }
 0x5c3   : > { %v3668_v8 = vpop.eup %3667  ;;  %v5453_v52 = vadd.f32 %v3666_v19, %v2214_v36  ;;  %3679 = vrcp.f32 %v2176_v30  ;;  %v2710_v36 = vsub.f32 %v2708_v49, %v5335_v43  ;;  %v1270_v25 = vsub.f32 %v3920_v40, %v1245_v47 }
 0x5c4   : > { %v2152_v20 = vadd.f32 %v3668_v8, %v3662_v28  ;;  %v3670_v4 = vpop.eup %3669  ;;  %3681 = vrcp.f32 %v5414_v2  ;;  %v2145_v51 = vsub.f32 %v2141_v41, %v5450_v55  ;;  %v2073_v2 = vpop.f32.mrf.mxu3  ;;  %v2204_v19 = vmul.f32 2.0, %v2192_v6 }
 0x5c5   : > { %v3672_v44 = vpop.eup %3671  ;;  %v5458_v16 = vadd.f32 %v3670_v4, %v2183_v18  ;;  %3683 = vrcp.f32 %v2784_v60  ;;  %v2800_v60 = vsub.f32 %v2798_v7, %v5410_v50  ;;  %v2669_v24 = vmul.f32 2.0, %v5463_v33  ;;  %1396 = vperm.xlu0 %3549, %v1270_v25  }
 0x5c6   : > { %v3674_v10 = vpop.eup %3673  ;;  %v2690_v12 = vadd.f32 %v3672_v44, %v2682_v13  ;;  %3685 = vrcp.f32 %v2192_v6  ;;  %v2157_v8 = vmul.f32 2.0, %v2145_v51  ;;  %v2665_v26 = vadd.f32 %v5467_v39, %v5470_v63  ;;  %v2658_v6 = vpop.f32.mrf.mxu1 }
 0x5c7   : > { %v2168_v28 = vadd.f32 %v3674_v10, %v2152_v20  ;;  %v3676_v1 = vpop.eup %3675  ;;  %3687 = vrcp.f32 %v2133_v14  ;;  %v2716_v49 = vmul.f32 2.0, %v2710_v36  ;;  %v5480_v30 = vsub.f32 %v2204_v19, %v5373_v46  ;;  %v1241_v20 = vpop.permute.xlu2 %1240 }
 0x5c8   : > { %v3678_v18 = vpop.eup %3677  ;;  %3689 = vrcp.f32 %v2145_v51  ;;  %v2071_v4 = vadd.f32 %v5437_v54, %v5434_v5  ;;  %v5485_v32 = vadd.f32 1e-05, %v5463_v33  ;;  %v2161_v14 = vsub.f32 %v2157_v8, %v5450_v55  ;;  %v2626_v10 = vpop.f32.mrf.mxu0  ;;  %v3921_v51 = vld [vmem:[%s6241_s3 + $0x40] sm:$0xff] }
 0x5c9   : > { %v3680_v57 = vpop.eup %3679  ;;  %v2671_v9 = vsub.f32 %v2665_v26, %v2669_v24  ;;  %v2698_v44 = vadd.f32 %v3676_v1, %v2690_v12  ;;  %v2806_v41 = vmul.f32 2.0, %v2800_v60  ;;  %v1268_v5 = vsub.f32 %v3921_v51, %v1241_v20  ;;  %v1999_v24 = vpop.f32.mrf.mxu2 }
 0x5ca   : > { %v3682_v13 = vpop.eup %3681  ;;  %v2184_v7 = vadd.f32 %v3680_v57, %v2168_v28  ;;  %3691 = vrcp.f32 %v2161_v14  ;;  %v2173_v47 = vmul.f32 2.0, %v2161_v14  ;;  %v5494_v40 = vmul.f32 0.25, %v2071_v4 }
 0x5cb   : > { %v3684_v62 = vpop.eup %3683  ;;  %v5492_v54 = vadd.f32 %v2671_v9, %v5485_v32  ;;  %v2074_v25 = vadd.f32 %v2073_v2, %v1996_v34  ;;  %v2659_v19 = vadd.f32 %v2658_v6, %v2626_v10  ;;  %v2718_v1 = vsub.f32 %v2716_v49, %v5335_v43 }
 0x5cc   : > { %v3686_v28 = vpop.eup %3685  ;;  %3693 = vrcp.f32 %v5447_v31  ;;  %v2177_v26 = vsub.f32 %v2173_v47, %v5450_v55  ;;  %v2076_v20 = vpop.f32.mrf.mxu3  ;;  %v5502_v9 = vadd.f32 %v3678_v18, %v2698_v44  ;;  %v2788_v4 = vadd.f32 %v3684_v62, %v3682_v13 }
 0x5cd   : > { %v3688_v12 = vpop.eup %3687  ;;  %v5498_v8 = vadd.f32 %v3686_v28, %v2184_v7  ;;  %v2677_v57 = vmul.f32 2.0, %v5492_v54  ;;  %v2808_v34 = vsub.f32 %v2806_v41, %v5410_v50  ;;  %3695 = vrcp.f32 %v2710_v36  ;;  %1386 = vperm.xlu0 %3549, %v1268_v5  }
 0x5ce   : > { %v3690_v14 = vpop.eup %3689  ;;  %3697 = vrcp.f32 %v2177_v26  ;;  %v2189_v49 = vmul.f32 2.0, %v2177_v26  ;;  %v5507_v7 = vmul.f32 0.25, %v2074_v25  ;;  %v2759_v6 = vmul.f32 2.0, %v2659_v19  ;;  %v2661_v26 = vpop.f32.mrf.mxu1 }
 0x5cf   : > { %v2153_v2 = vadd.f32 %v3690_v14, %v3688_v12  ;;  %v2679_v10 = vsub.f32 %v2677_v57, %v5485_v32  ;;  %v2724_v47 = vmul.f32 2.0, %v2718_v1  ;;  %3699 = vrcp.f32 %v2800_v60 }
 0x5d0   : > { %v3692_v51 = vpop.eup %3691  ;;  %v2193_v18 = vsub.f32 %v2189_v49, %v5450_v55  ;;  %v2077_v62 = vadd.f32 %v2076_v20, %v1999_v24  ;;  %v2814_v44 = vmul.f32 2.0, %v2808_v34  ;;  %v2302_v41 = vmul.f32 2.0, %v5494_v40  ;;  %v2629_v12 = vpop.f32.mrf.mxu0 }
 0x5d1   : > { %v2685_v13 = vmul.f32 2.0, %v2679_v10  ;;  %v2169_v36 = vadd.f32 %v3692_v51, %v2153_v2  ;;  %v2753_v28 = vsub.f32 4.0, %v2659_v19  ;;  %v2662_v14 = vadd.f32 %v2661_v26, %v2629_v12  ;;  %v3922_v12 = vld [vmem:[%s6241_s3 + $0x48] sm:$0xff] }
 0x5d2   : > { %v3694_v5 = vpop.eup %3693  ;;  %3701 = vrcp.f32 %v2193_v18  ;;  %v2205_v57 = vmul.f32 2.0, %v2193_v18  ;;  %v2303_v60 = vmul.f32 2.0, %v5507_v7  ;;  %v2761_v35 = vsub.f32 4.0, %v2759_v6 }
 0x5d3   : > { %v2687_v25 = vsub.f32 %v2685_v13, %v5485_v32  ;;  %v3696_v31 = vpop.eup %3695  ;;  %3703 = vrcp.f32 %v2718_v1  ;;  %v2726_v24 = vsub.f32 %v2724_v47, %v5335_v43  ;;  %v5517_v49 = vmul.f32 0.25, %v2077_v62  ;;  %v2002_v1 = vpop.f32.mrf.mxu2 }
 0x5d4   : > { %v3698_v20 = vpop.eup %3697  ;;  %v5515_v2 = vsub.f32 %v2205_v57, %v5450_v55  ;;  %v2755_v51 = vsub.f32 %v2753_v28, %v2662_v14  ;;  %3705 = vrcp.f32 %v2679_v10  ;;  %v2765_v13 = vmul.f32 2.0, %v2662_v14  ;;  %v2079_v26 = vpop.f32.mrf.mxu3 }
 0x5d5   : > { %v2693_v19 = vmul.f32 2.0, %v2687_v25  ;;  %v2185_v18 = vadd.f32 %v3698_v20, %v2169_v36  ;;  %v1269_v6 = vsub.f32 %v3922_v12, %v1243_v29  ;;  %v3700_v47 = vpop.eup %3699  ;;  %v2796_v48 = vadd.f32 %v3694_v5, %v2788_v4 }
 0x5d6   : > { %3707 = vrcp.f32 %v2808_v34  ;;  %v2306_v57 = vsub.f32 16.0, %v2302_v41  ;;  %v2307_v62 = vsub.f32 16.0, %v2303_v60  ;;  %v2757_v36 = vadd.f32 %v2755_v51, %v5463_v33 }
 0x5d7   : > { %v2695_v23 = vsub.f32 %v2693_v19, %v5485_v32  ;;  %3709 = vrcp.f32 %v5492_v54  ;;  %v2767_v10 = vsub.f32 4.0, %v2765_v13  ;;  %1391 = vperm.xlu1 %3548, %v1269_v6   ;;  %v2304_v20 = vmul.f32 2.0, %v5517_v49 }
 0x5d8   : > { %v3702_v28 = vpop.eup %3701  ;;  %3711 = vrcp.f32 %v2726_v24  ;;  %v2816_v29 = vsub.f32 %v2814_v44, %v5410_v50  ;;  %v2763_v34 = vadd.f32 %v2761_v35, %v5470_v63  ;;  %v2732_v54 = vmul.f32 2.0, %v2726_v24 }
 0x5d9   : > { %v2701_v14 = vmul.f32 2.0, %v2695_v23  ;;  %v3704_v12 = vpop.eup %3703  ;;  %v5527_v4 = vadd.f32 %v3702_v28, %v2185_v18  ;;  %v2769_v41 = vadd.f32 %v2767_v10, %v5467_v39  ;;  %v2804_v5 = vadd.f32 %v3700_v47, %v2796_v48 }
 0x5da   : > { %v5532_v33 = vadd.f32 %v2306_v57, %v5337_v22  ;;  %v2714_v19 = vadd.f32 %v3696_v31, %v5502_v9  ;;  %v3706_v51 = vpop.eup %3705  ;;  %v2291_v13 = vsub.f32 16.0, %v5507_v7  ;;  %v2775_v6 = vmul.f32 2.0, %v2757_v36 }
 0x5db   : > { %v2703_v60 = vsub.f32 %v2701_v14, %v5485_v32  ;;  %v2771_v44 = vadd.f32 %v2769_v41, %v2763_v34  ;;  %v2734_v18 = vsub.f32 %v2732_v54, %v5335_v43  ;;  %v5539_v39 = vadd.f32 %v2307_v62, %v5358_v59  ;;  %v2005_v31 = vpop.f32.mrf.mxu2 }
 0x5dc   : > { %v3708_v28 = vpop.eup %3707  ;;  %v2308_v48 = vsub.f32 16.0, %v2304_v20  ;;  %v2822_v63 = vmul.f32 2.0, %v2816_v29  ;;  %3713 = vrcp.f32 %v2687_v25  ;;  %v5542_v47 = vadd.f32 1e-05, %v2757_v36  ;;  %v2082_v57 = vpop.f32.mrf.mxu3 }
 0x5dd   : > { %v2709_v35 = vmul.f32 2.0, %v2703_v60  ;;  %v3710_v22 = vpop.eup %3709  ;;  %v2777_v9 = vsub.f32 %v2771_v44, %v2775_v6  ;;  %v2080_v34 = vadd.f32 %v2079_v26, %v2002_v1  ;;  %v2083_v41 = vadd.f32 %v2082_v57, %v2005_v31 }
 0x5de   : > { %v3712_v10 = vpop.eup %3711  ;;  %v2683_v14 = vadd.f32 %v3710_v22, %v3706_v51  ;;  %v2722_v54 = vadd.f32 %v3704_v12, %v2714_v19  ;;  %3715 = vrcp.f32 %v2695_v23  ;;  %v2740_v20 = vmul.f32 2.0, %v2734_v18 }
 0x5df   : > { %v2711_v59 = vsub.f32 %v2709_v35, %v5485_v32  ;;  %v2779_v62 = vadd.f32 %v2777_v9, %v5542_v47  ;;  %v5547_v25 = vadd.f32 %v2308_v48, %v5382_v58  ;;  %v2110_v24 = vmul.f32 0.25, %v2083_v41 }
 0x5e0   : > { %v2824_v36 = vsub.f32 %v2822_v63, %v5410_v50  ;;  %3717 = vrcp.f32 %v5432_v27  ;;  %v2730_v6 = vadd.f32 %v3712_v10, %v2722_v54  ;;  %v2742_v1 = vsub.f32 %v2740_v20, %v5335_v43 }
 0x5e1   : > { %v2783_v44 = vmul.f32 2.0, %v2779_v62  ;;  %3719 = vrcp.f32 %v2734_v18  ;;  %v5552_v26 = vmul.f32 0.25, %v2080_v34  ;;  %v6302_v23 = vsub.f32 16.0, %v5494_v40 }
 0x5e2   : > { %v2314_v19 = vmul.f32 2.0, %v2110_v24  ;;  %3721 = vrcp.f32 %v2816_v29  ;;  %v3714_v51 = vpop.eup %3713  ;;  %v2717_v58 = vmul.f32 2.0, %v2711_v59  ;;  %v2830_v48 = vmul.f32 2.0, %v2824_v36 }
 0x5e3   : > { %v2294_v12 = vsub.f32 %v6302_v23, %v2110_v24  ;;  %3723 = vrcp.f32 %v2703_v60  ;;  %v2785_v35 = vsub.f32 %v2783_v44, %v5542_v47  ;;  %v2250_v18 = vmul.f32 2.0, %v5432_v27  ;;  %v2008_v44 = vpop.f32.mrf.mxu2 }
 0x5e4   : > { %v2318_v22 = vsub.f32 16.0, %v2314_v19  ;;  %3725 = vrcp.f32 %v2742_v1  ;;  %v3716_v9 = vpop.eup %3715  ;;  %v2812_v57 = vadd.f32 %v3708_v28, %v2804_v5  ;;  %v2832_v40 = vsub.f32 %v2830_v48, %v5410_v50  ;;  %v2085_v1 = vpop.f32.mrf.mxu3 }
 0x5e5   : > { %v2298_v63 = vadd.f32 %v2294_v12, %v5332_v37  ;;  %3727 = vrcp.f32 %v2779_v62  ;;  %v2791_v31 = vmul.f32 2.0, %v2785_v35  ;;  %v2691_v29 = vadd.f32 %v3714_v51, %v2683_v14 }
 0x5e6   : > { %v3718_v24 = vpop.eup %3717  ;;  %v2305_v60 = vmul.f32 2.0, %v5552_v26  ;;  %v2322_v10 = vadd.f32 %v2318_v22, %v5339_v15  ;;  %3729 = vrcp.f32 %v2824_v36  ;;  %v2838_v41 = vmul.f32 2.0, %v2832_v40 }
 0x5e7   : > { %v3720_v34 = vpop.eup %3719  ;;  %v2793_v37 = vsub.f32 %v2791_v31, %v5542_v47  ;;  %3731 = vrcp.f32 %v2711_v59  ;;  %v2719_v27 = vsub.f32 %v2717_v58, %v5485_v32  ;;  %v2334_v5 = vmul.f32 2.0, %v2298_v63 }
 0x5e8   : > { %v3722_v54 = vpop.eup %3721  ;;  %v2326_v62 = vadd.f32 %v2322_v10, %v5532_v33  ;;  %v5566_v28 = vadd.f32 %v3718_v24, %v5453_v52  ;;  %v5569_v14 = vsub.f32 %v2250_v18, %v5348_v0  ;;  %v2293_v36 = vsub.f32 16.0, %v5552_v26 }
 0x5e9   : > { %v5571_v20 = vpop.eup %3723  ;;  %v2799_v15 = vmul.f32 2.0, %v2793_v37  ;;  %3733 = vrcp.f32 %v2832_v40  ;;  %v2840_v59 = vsub.f32 %v2838_v41, %v5410_v50  ;;  %v5575_v12 = vadd.f32 1e-05, %v2298_v63 }
 0x5ea   : > { %v3726_v23 = vpop.eup %3725  ;;  %v2338_v33 = vsub.f32 %v2326_v62, %v2334_v5  ;;  %v2086_v19 = vadd.f32 %v2085_v1, %v2008_v44  ;;  %v2738_v52 = vadd.f32 %v3720_v34, %v2730_v6  ;;  %v2725_v22 = vmul.f32 2.0, %v2719_v27 }
 0x5eb   : > { %v5577_v51 = vpop.eup %3727  ;;  %v2801_v58 = vsub.f32 %v2799_v15, %v5542_v47  ;;  %3735 = vrcp.f32 %v2840_v59  ;;  %v2846_v48 = vmul.f32 2.0, %v2840_v59  ;;  %v2309_v31 = vsub.f32 16.0, %v2305_v60 }
 0x5ec   : > { %v3730_v18 = vpop.eup %3729  ;;  %3737 = vrcp.f32 %v2785_v35  ;;  %v2342_v40 = vadd.f32 %v2338_v33, %v5575_v12  ;;  %v2111_v24 = vmul.f32 0.25, %v2086_v19  ;;  %v2746_v63 = vadd.f32 %v3726_v23, %v2738_v52 }
 0x5ed   : > { %v5581_v10 = vpop.eup %3731  ;;  %v2820_v41 = vadd.f32 %v3722_v54, %v2812_v57  ;;  %v2848_v62 = vsub.f32 %v2846_v48, %v5410_v50  ;;  %3739 = vrcp.f32 %v2719_v27  ;;  %v5586_v44 = vadd.f32 %v3716_v9, %v2691_v29  ;;  %v2088_v9 = vpop.f32.mrf.mxu3 }
 0x5ee   : > { %3741 = vrcp.f32 %v2793_v37  ;;  %v2350_v6 = vmul.f32 2.0, %v2342_v40  ;;  %v2295_v34 = vsub.f32 %v2291_v13, %v2111_v24  ;;  %v2315_v5 = vmul.f32 2.0, %v2111_v24  ;;  %v2011_v13 = vpop.f32.mrf.mxu2 }
 0x5ef   : > { %v3734_v15 = vpop.eup %3733  ;;  %v2807_v35 = vmul.f32 2.0, %v2801_v58  ;;  %3743 = vrcp.f32 %v2848_v62  ;;  %v2727_v60 = vsub.f32 %v2725_v22, %v5485_v32  ;;  %v2828_v59 = vadd.f32 %v3730_v18, %v2820_v41 }
 0x5f0   : > { %v2354_v1 = vsub.f32 %v2350_v6, %v5575_v12  ;;  %v2299_v57 = vadd.f32 %v2295_v34, %v5352_v38  ;;  %v2319_v54 = vsub.f32 16.0, %v2315_v5  ;;  %v5592_v37 = vadd.f32 %v2309_v31, %v5427_v56 }
 0x5f1   : > { %v3736_v27 = vpop.eup %3735  ;;  %3745 = vrcp.f32 %v2342_v40  ;;  %v2748_v7 = vmul.f32 %v2746_v63, %v5335_v43  ;;  %v5596_v29 = vmul.f32 2.0, %v5569_v14  ;;  %v2836_v19 = vadd.f32 %v3734_v15, %v2828_v59 }
 0x5f2   : > { %v5598_v23 = vpop.eup %3737  ;;  %3747 = vrcp.f32 %v2354_v1  ;;  %v2366_v33 = vmul.f32 2.0, %v2354_v1  ;;  %v2323_v38 = vadd.f32 %v2319_v54, %v5360_v42  ;;  %v5604_v56 = vsub.f32 %v2807_v35, %v5542_v47 }
 0x5f3   : > { %v5601_v52 = vpop.eup %3739  ;;  %3749 = vrcp.f32 %v2801_v58  ;;  %v2089_v48 = vadd.f32 %v2088_v9, %v2011_v13  ;;  %v2733_v43 = vmul.f32 2.0, %v2727_v60  ;;  %v2335_v40 = vmul.f32 2.0, %v2299_v57 }
 0x5f4   : > { %v5606_v22 = vpop.eup %3741  ;;  %v2370_v18 = vsub.f32 %v2366_v33, %v5575_v12  ;;  %v2327_v31 = vadd.f32 %v2323_v38, %v5539_v39  ;;  %v2844_v24 = vadd.f32 %v3736_v27, %v2836_v19  ;;  %v5610_v41 = vadd.f32 1e-05, %v2299_v57 }
 0x5f5   : > { %v3744_v63 = vpop.eup %3743  ;;  %v2750_v42 = vmul.f32 0.1, %v2748_v7  ;;  %v2112_v62 = vmul.f32 0.25, %v2089_v48  ;;  %v2270_v58 = vsub.f32 %v5596_v29, %v5348_v0  ;;  %v2815_v35 = vmul.f32 2.0, %v5604_v56 }
 0x5f6   : > { %3751 = vrcp.f32 %v2370_v18  ;;  %v2382_v6 = vmul.f32 2.0, %v2370_v18  ;;  %v2339_v34 = vsub.f32 %v2327_v31, %v2335_v40  ;;  %v2852_v5 = vadd.f32 %v3744_v63, %v2844_v24  ;;  %v2014_v48 = vpop.f32.mrf.mxu2 }
 0x5f7   : > { %v3746_v15 = vpop.eup %3745  ;;  %v6303_v1 = vsub.f32 16.0, %v5517_v49  ;;  %v2316_v54 = vmul.f32 2.0, %v2112_v62  ;;  %v2735_v59 = vsub.f32 %v2733_v43, %v5485_v32  ;;  %3753 = vrcp.f32 %v2727_v60  ;;  %v2091_v49 = vpop.f32.mrf.mxu3 }
 0x5f8   : > { %v3748_v57 = vpop.eup %3747  ;;  %v2386_v27 = vsub.f32 %v2382_v6, %v5575_v12  ;;  %v2343_v7 = vadd.f32 %v2339_v34, %v5610_v41  ;;  %v2854_v13 = vmul.f32 %v2852_v5, %v5410_v50  ;;  %3755 = vrcp.f32 %v5569_v14 }
 0x5f9   : > { %v2296_v39 = vsub.f32 %v6303_v1, %v2112_v62  ;;  %v5621_v9 = vpop.eup %3749  ;;  %v2362_v33 = vadd.f32 %v3748_v57, %v3746_v15  ;;  %v2320_v19 = vsub.f32 16.0, %v2316_v54  ;;  %v2741_v24 = vmul.f32 2.0, %v2735_v59 }
 0x5fa   : > { %3757 = vrcp.f32 %v2386_v27  ;;  %v2398_v43 = vmul.f32 2.0, %v2386_v27  ;;  %v2351_v18 = vmul.f32 2.0, %v2343_v7  ;;  %v2856_v31 = vmul.f32 0.1, %v2854_v13 }
 0x5fb   : > { %v2300_v38 = vadd.f32 %v2296_v39, %v5363_v17  ;;  %v2324_v40 = vadd.f32 %v2320_v19, %v5387_v45  ;;  %3759 = vrcp.f32 %v2735_v59  ;;  %v5627_v50 = vsub.f32 %v2815_v35, %v5542_v47 }
 0x5fc   : > { %v3752_v60 = vpop.eup %3751  ;;  %v2402_v63 = vsub.f32 %v2398_v43, %v5575_v12  ;;  %v2355_v17 = vsub.f32 %v2351_v18, %v5610_v41  ;;  %v2858_v62 = vadd.f32 %v2856_v31, %v2750_v42  ;;  %v2092_v6 = vadd.f32 %v2091_v49, %v2014_v48 }
 0x5fd   : > { %v2378_v34 = vadd.f32 %v3752_v60, %v2362_v33  ;;  %3761 = vrcp.f32 %v2343_v7  ;;  %v2328_v14 = vadd.f32 %v2324_v40, %v5547_v25  ;;  %v2336_v5 = vmul.f32 2.0, %v2300_v38  ;;  %v5632_v15 = vpop.eup %3753  ;;  %v5641_v25 = vld [vmem:[%s6246_s8] sm:$0xff] }
 0x5fe   : > { %3763 = vrcp.f32 %v2402_v63  ;;  %v2414_v45 = vmul.f32 2.0, %v2402_v63  ;;  %v2367_v1 = vmul.f32 2.0, %v2355_v17  ;;  %v2860_v39 = vmul.f32 0.5, %v2858_v62  ;;  %v3756_v35 = vpop.eup %3755 }
 0x5ff   : > { %3765 = vrcp.f32 %v2355_v17  ;;  %v5634_v54 = vadd.f32 1e-05, %v2300_v38  ;;  %v2340_v59 = vsub.f32 %v2328_v14, %v2336_v5  ;;  %v2113_v57 = vmul.f32 0.25, %v2092_v6  ;;  %v5662_v5 = vld [vmem:[%s6246_s8 + $0x8] sm:$0xff] }
 0x600   : > { %v3758_v27 = vpop.eup %3757  ;;  %v2418_v42 = vsub.f32 %v2414_v45, %v5575_v12  ;;  %v2371_v7 = vsub.f32 %v2367_v1, %v5610_v41  ;;  %2894 = vmatpush.msrb.mxu0 %v2860_v39  ;;  %v2743_v13 = vsub.f32 %v2741_v24, %v5485_v32  ;;  %v2707_v43 = vadd.f32 %v5571_v20, %v5586_v44 }
 0x601   : > { %v3760_v33 = vpop.eup %3759  ;;  %v2394_v19 = vadd.f32 %v3758_v27, %v2378_v34  ;;  %v2344_v38 = vadd.f32 %v2340_v59, %v5634_v54  ;;  %v2297_v48 = vsub.f32 %v2293_v36, %v2113_v57  ;;  %v2317_v49 = vmul.f32 2.0, %v2113_v57  ;;  %3496 = vmatmul.msk.f32.vlgmr.msrb.gmra.mxu0 %vm2866_vm7, %v5641_v25 }
 0x602   : > { %3767 = vrcp.f32 %v2418_v42  ;;  %v2430_v18 = vmul.f32 2.0, %v2418_v42  ;;  %v2383_v31 = vmul.f32 2.0, %v2371_v7  ;;  %v2823_v62 = vmul.f32 2.0, %v5627_v50 }
 0x603   : > { %v3762_v40 = vpop.eup %3761  ;;  %3769 = vrcp.f32 %v2371_v7  ;;  %v2352_v24 = vmul.f32 2.0, %v2344_v38  ;;  %v2301_v60 = vadd.f32 %v2297_v48, %v5402_v61  ;;  %v2321_v63 = vsub.f32 16.0, %v2317_v49 }
 0x604   : > { %v3764_v17 = vpop.eup %3763  ;;  %v5653_v26 = vsub.f32 %v2430_v18, %v5575_v12  ;;  %v2387_v36 = vsub.f32 %v2383_v31, %v5610_v41  ;;  %3771 = vrcp.f32 %v2743_v13  ;;  %v2715_v45 = vadd.f32 %v5581_v10, %v2707_v43 }
 0x605   : > { %v3766_v6 = vpop.eup %3765  ;;  %v2410_v20 = vadd.f32 %v3764_v17, %v2394_v19  ;;  %3773 = vrcp.f32 %v2344_v38  ;;  %v2356_v44 = vsub.f32 %v2352_v24, %v5634_v54  ;;  %v2325_v34 = vadd.f32 %v2321_v63, %v5424_v11 }
 0x606   : > { %v2363_v14 = vadd.f32 %v3766_v6, %v3762_v40  ;;  %3775 = vrcp.f32 %v2387_v36  ;;  %v2399_v61 = vmul.f32 2.0, %v2387_v36  ;;  %v2337_v59 = vmul.f32 2.0, %v2301_v60 }
 0x607   : > { %3777 = vrcp.f32 %v2356_v44  ;;  %v2368_v1 = vmul.f32 2.0, %v2356_v44  ;;  %v2329_v39 = vadd.f32 %v2325_v34, %v5592_v37  ;;  %v5669_v11 = vadd.f32 1e-05, %v2301_v60 }
 0x608   : > { %v3768_v57 = vpop.eup %3767  ;;  %v5667_v27 = vsub.f32 %v2399_v61, %v5610_v41  ;;  %v2723_v42 = vadd.f32 %v5601_v52, %v2715_v45  ;;  %v2825_v7 = vsub.f32 %v2823_v62, %v5542_v47  ;;  %v5679_v37 = vadd.f32 %v3756_v35, %v5566_v28 }
 0x609   : > { %v3770_v13 = vpop.eup %3769  ;;  %v5673_v19 = vadd.f32 %v3768_v57, %v2410_v20  ;;  %v2372_v10 = vsub.f32 %v2368_v1, %v5634_v54  ;;  %v2341_v38 = vsub.f32 %v2329_v39, %v2337_v59  ;;  %3497 = vmatmul.msk.f32.gmra.mxu0 %vm2866_vm7, %v5662_v5  ;;  %3779 = vrcp.f32 %v5604_v56 }
 0x60a   : > { %v3772_v48 = vpop.eup %3771  ;;  %v2379_v49 = vadd.f32 %v3770_v13, %v2363_v14  ;;  %v2731_v52 = vadd.f32 %v5632_v15, %v2723_v42  ;;  %v2219_v18 = vmul.f32 2.0, %v5444_v3  ;;  %v2220_v60 = vmul.f32 2.0, %v5480_v30  ;;  %v2510_v42 = vld [vmem:[%s6244_s6] sm:$0xff] }
 0x60b   : > { %v3774_v43 = vpop.eup %3773  ;;  %3781 = vrcp.f32 %v2372_v10  ;;  %v2384_v31 = vmul.f32 2.0, %v2372_v10  ;;  %v2345_v40 = vadd.f32 %v2341_v38, %v5669_v11  ;;  %v2789_v28 = vadd.f32 %v5598_v23, %v5577_v51  ;;  %v5697_v51 = vld [vmem:[%s6246_s8 + $0x10] sm:$0xff]  ;;  %2938 = vst [vmem:[#allocation1] ss:$2 sm:$0xff] %v2510_v42 }
 0x60c   : > { %v3776_v24 = vpop.eup %3775  ;;  %v2739_v35 = vadd.f32 %v3760_v33, %v2731_v52  ;;  %v2831_v63 = vmul.f32 2.0, %v2825_v7  ;;  %3783 = vrcp.f32 %v5627_v50  ;;  %v5701_v50 = vsub.f32 %v2219_v18, %v5370_v53 }
 0x60d   : > { %v3778_v17 = vpop.eup %3777  ;;  %v5688_v56 = vadd.f32 %v3776_v24, %v2379_v49  ;;  %v2388_v15 = vsub.f32 %v2384_v31, %v5634_v54  ;;  %v2353_v36 = vmul.f32 2.0, %v2345_v40  ;;  %v2797_v62 = vadd.f32 %v5606_v22, %v2789_v28 }
 0x60e   : > { %v2364_v6 = vadd.f32 %v3778_v17, %v3774_v43  ;;  %3785 = vrcp.f32 %v2825_v7  ;;  %v2833_v20 = vsub.f32 %v2831_v63, %v5542_v47  ;;  %v2747_v44 = vadd.f32 %v3772_v48, %v2739_v35  ;;  %v5731_v35 = vld [vmem:[%s6246_s8 + $0x18] sm:$0xff] }
 0x60f   : > { %3787 = vrcp.f32 %v2388_v15  ;;  %v2400_v23 = vmul.f32 2.0, %v2388_v15  ;;  %v2357_v33 = vsub.f32 %v2353_v36, %v5669_v11  ;;  %v3780_v34 = vpop.eup %3779  ;;  %v5704_v22 = vsub.f32 %v2220_v60, %v5373_v46 }
 0x610   : > { %3789 = vrcp.f32 %v2345_v40  ;;  %v2839_v14 = vmul.f32 2.0, %v2833_v20  ;;  %v2805_v45 = vadd.f32 %v5621_v9, %v2797_v62  ;;  %v2221_v13 = vmul.f32 2.0, %v5515_v2 }
 0x611   : > { %v3782_v61 = vpop.eup %3781  ;;  %v5708_v1 = vsub.f32 %v2400_v23, %v5634_v54  ;;  %3791 = vrcp.f32 %v2357_v33  ;;  %v2369_v39 = vmul.f32 2.0, %v2357_v33  ;;  %3498 = vmatmul.msk.f32.gmra.mxu0 %vm2866_vm7, %v5697_v51  ;;  %v2446_v48 = vmul.f32 2.0, %v5653_v26 }
 0x612   : > { %v2380_v59 = vadd.f32 %v3782_v61, %v2364_v6  ;;  %3793 = vrcp.f32 %v2833_v20  ;;  %v2841_v57 = vsub.f32 %v2839_v14, %v5542_v47  ;;  %v3784_v7 = vpop.eup %3783  ;;  %v2813_v10 = vadd.f32 %v3780_v34, %v2805_v45  ;;  %v2939_v14 = vld.sshfl [vmem:[#allocation1] sm:$0xff pattern:$0x75316420] }
 0x613   : > { %3795 = vrcp.f32 %v5667_v27  ;;  %v2373_v9 = vsub.f32 %v2369_v39, %v5669_v11  ;;  %v2749_v49 = vmul.f32 %v2747_v44, %v5485_v32  ;;  %v5722_v18 = vmul.f32 2.0, %v5667_v27  ;;  %3504 = vmatpush.msk.msra.mxu0 %vm2954_vm8, %v2939_v14 }
 0x614   : > { %v3786_v38 = vpop.eup %3785  ;;  %3797 = vrcp.f32 %v2841_v57  ;;  %v2847_v52 = vmul.f32 2.0, %v2841_v57  ;;  %v2235_v40 = vmul.f32 2.0, %v5701_v50  ;;  %v2236_v32 = vmul.f32 2.0, %v5704_v22 }
 0x615   : > { %v3788_v43 = vpop.eup %3787  ;;  %3799 = vrcp.f32 %v2373_v9  ;;  %v2385_v31 = vmul.f32 2.0, %v2373_v9  ;;  %v2821_v17 = vadd.f32 %v3784_v7, %v2813_v10  ;;  %v5743_v20 = vsub.f32 %v2221_v13, %v5450_v55 }
 0x616   : > { %v3790_v24 = vpop.eup %3789  ;;  %v5725_v60 = vadd.f32 %v3788_v43, %v2380_v59  ;;  %v2849_v28 = vsub.f32 %v2847_v52, %v5542_v47  ;;  %3801 = vrcp.f32 %v2270_v58  ;;  %v2239_v15 = vsub.f32 %v2235_v40, %v5370_v53 }
 0x617   : > { %v3792_v27 = vpop.eup %3791  ;;  %v2389_v63 = vsub.f32 %v2385_v31, %v5669_v11  ;;  %v5740_v6 = vsub.f32 %v2236_v32, %v5373_v46  ;;  %v2829_v23 = vadd.f32 %v3786_v38, %v2821_v17  ;;  %v2751_v34 = vmul.f32 0.1, %v2749_v49 }
 0x618   : > { %v3794_v36 = vpop.eup %3793  ;;  %v2365_v62 = vadd.f32 %v3792_v27, %v3790_v24  ;;  %3803 = vrcp.f32 %v2849_v28  ;;  %v2251_v33 = vmul.f32 2.0, %v2239_v15  ;;  %v2450_v61 = vsub.f32 %v2446_v48, %v5575_v12 }
 0x619   : > { %v3796_v29 = vpop.eup %3795  ;;  %3805 = vrcp.f32 %v2389_v63  ;;  %v2401_v58 = vmul.f32 2.0, %v2389_v63  ;;  %3499 = vmatmul.msk.f32.gmra.mxu0 %vm2866_vm7, %v5731_v35  ;;  %v2252_v45 = vmul.f32 2.0, %v5740_v6  ;;  %v2837_v57 = vadd.f32 %v3794_v36, %v2829_v23 }
 0x61a   : > { %v3798_v44 = vpop.eup %3797  ;;  %3807 = vrcp.f32 %v5708_v1  ;;  %v2255_v42 = vsub.f32 %v2251_v33, %v5370_v53  ;;  %v2462_v9 = vmul.f32 2.0, %v2450_v61  ;;  %v2237_v31 = vmul.f32 2.0, %v5743_v20 }
 0x61b   : > { %v3800_v39 = vpop.eup %3799  ;;  %v5751_v59 = vsub.f32 %v2401_v58, %v5669_v11  ;;  %3809 = vrcp.f32 %v5653_v26  ;;  %v5757_v10 = vsub.f32 %v2252_v45, %v5373_v46  ;;  %v2845_v38 = vadd.f32 %v3798_v44, %v2837_v57 }
 0x61c   : > { %v3802_v7 = vpop.eup %3801  ;;  %v2381_v13 = vadd.f32 %v3800_v39, %v2365_v62  ;;  %3811 = vrcp.f32 %v2450_v61  ;;  %v2267_v49 = vmul.f32 2.0, %v2255_v42  ;;  %v2466_v43 = vsub.f32 %v2462_v9, %v5575_v12 }
 0x61d   : > { %3813 = vrcp.f32 %v5751_v59  ;;  %v2278_v48 = vadd.f32 %v3802_v7, %v5679_v37  ;;  %v5764_v26 = vmul.f32 2.0, %v5757_v10  ;;  %v2416_v36 = vmul.f32 2.0, %v5708_v1 }
 0x61e   : > { %v3804_v52 = vpop.eup %3803  ;;  %3815 = vrcp.f32 %v5444_v3  ;;  %v2271_v37 = vsub.f32 %v2267_v49, %v5370_v53  ;;  %v2478_v63 = vmul.f32 2.0, %v2466_v43  ;;  %v2411_v33 = vadd.f32 %v3796_v29, %v5688_v56 }
 0x61f   : > { %v3806_v40 = vpop.eup %3805  ;;  %v2853_v24 = vadd.f32 %v3804_v52, %v2845_v38  ;;  %v5768_v28 = vmul.f32 %v2278_v48, %v5348_v0  ;;  %3817 = vrcp.f32 %v5701_v50  ;;  %v2272_v3 = vsub.f32 %v5764_v26, %v5373_v46  ;;  %v2940_v48 = vld.sshfl [vmem:[#allocation1 + $0x8] sm:$0xff pattern:$0x75316420] }
 0x620   : > { %v3808_v32 = vpop.eup %3807  ;;  %v5772_v27 = vadd.f32 %v3806_v40, %v2381_v13  ;;  %3819 = vrcp.f32 %v2466_v43  ;;  %v5779_v0 = vsub.f32 %v2237_v31, %v5450_v55  ;;  %v2482_v23 = vsub.f32 %v2478_v63, %v5575_v12 }
 0x621   : > { %v3810_v17 = vpop.eup %3809  ;;  %v2855_v62 = vmul.f32 %v2853_v24, %v5542_v47  ;;  %3821 = vrcp.f32 %v2239_v15  ;;  %v2419_v1 = vsub.f32 %v5722_v18, %v5610_v41  ;;  %v5790_v56 = vadd.f32 %v3808_v32, %v5725_v60 }
 0x622   : > { %v3812_v50 = vpop.eup %3811  ;;  %v2442_v58 = vadd.f32 %v3810_v17, %v5673_v19  ;;  %3823 = vrcp.f32 %v2255_v42  ;;  %v2253_v47 = vmul.f32 2.0, %v5779_v0  ;;  %v2420_v29 = vsub.f32 %v2416_v36, %v5634_v54 }
 0x623   : > { %v3814_v44 = vpop.eup %3813  ;;  %v2857_v14 = vmul.f32 0.1, %v2855_v62  ;;  %3825 = vrcp.f32 %v2271_v37  ;;  %v2431_v57 = vmul.f32 2.0, %v2419_v1  ;;  %v2417_v31 = vmul.f32 2.0, %v5751_v59 }
 0x624   : > { %v3816_v15 = vpop.eup %3815  ;;  %v2458_v61 = vadd.f32 %v3812_v50, %v2442_v58  ;;  %3827 = vrcp.f32 %v2482_v23  ;;  %v5794_v18 = vsub.f32 %v2253_v47, %v5450_v55  ;;  %v2432_v49 = vmul.f32 2.0, %v2420_v29 }
 0x625   : > { %v3818_v45 = vpop.eup %3817  ;;  %v2859_v39 = vadd.f32 %v2857_v14, %v2751_v34  ;;  %v2215_v19 = vadd.f32 %v3816_v15, %v5458_v16  ;;  %3829 = vrcp.f32 %v2419_v1  ;;  %v2435_v34 = vsub.f32 %v2431_v57, %v5610_v41 }
 0x626   : > { %v3820_v42 = vpop.eup %3819  ;;  %3831 = vrcp.f32 %v5480_v30  ;;  %v5799_v30 = vmul.f32 2.0, %v5794_v18  ;;  %v2436_v40 = vsub.f32 %v2432_v49, %v5634_v54  ;;  %v2286_v17 = vmul.f32 0.1, %v5768_v28 }
 0x627   : > { %v3822_v7 = vpop.eup %3821  ;;  %v2861_v13 = vmul.f32 0.5, %v2859_v39  ;;  %v2474_v9 = vadd.f32 %v3820_v42, %v2458_v61  ;;  %v2231_v38 = vadd.f32 %v3818_v45, %v2215_v19  ;;  %3833 = vrcp.f32 %v5704_v22 }
 0x628   : > { %v3824_v16 = vpop.eup %3823  ;;  %3835 = vrcp.f32 %v2435_v34  ;;  %v2447_v43 = vmul.f32 2.0, %v2435_v34  ;;  %v2273_v22 = vsub.f32 %v5799_v30, %v5450_v55  ;;  %v5816_v1 = vadd.f32 %v3814_v44, %v5772_v27 }
 0x629   : > { %v3826_v60 = vpop.eup %3825  ;;  %2923 = vmatpush.msrb.mxu1 %v2861_v13  ;;  %v2247_v52 = vadd.f32 %v3822_v7, %v2231_v38  ;;  %3837 = vrcp.f32 %v5740_v6  ;;  %v2448_v6 = vmul.f32 2.0, %v2436_v40  ;;  %v2421_v19 = vsub.f32 %v2417_v31, %v5669_v11 }
 0x62a   : > { %v3828_v26 = vpop.eup %3827  ;;  %3500 = vmatmul.msk.f32.vlgmr.msrb.gmra.mxu1 %vm2866_vm7, %v5641_v25  ;;  %v2451_v63 = vsub.f32 %v2447_v43, %v5610_v41  ;;  %3839 = vrcp.f32 %v5757_v10 }
 0x62b   : > { %v3830_v24 = vpop.eup %3829  ;;  %v2490_v37 = vadd.f32 %v3828_v26, %v2474_v9  ;;  %v2263_v32 = vadd.f32 %v3824_v16, %v2247_v52  ;;  %3509 = vmatpush.msk.msra.mxu1 %vm2954_vm8, %v2940_v48  ;;  %3841 = vrcp.f32 %v2272_v3  ;;  %v2452_v14 = vsub.f32 %v2448_v6, %v5634_v54 }
 0x62c   : > { %v3832_v59 = vpop.eup %3831  ;;  %v2427_v25 = vadd.f32 %v3830_v24, %v2411_v33  ;;  %3843 = vrcp.f32 %v2451_v63  ;;  %v2463_v50 = vmul.f32 2.0, %v2451_v63  ;;  %v2433_v34 = vmul.f32 2.0, %v2421_v19 }
 0x62d   : > { %v2494_v36 = vmul.f32 %v2490_v37, %v5575_v12  ;;  %v2279_v62 = vadd.f32 %v3826_v60, %v2263_v32  ;;  %v3834_v58 = vpop.eup %3833  ;;  %v2216_v23 = vadd.f32 %v3832_v59, %v5498_v8  ;;  %3845 = vrcp.f32 %v2420_v29 }
 0x62e   : > { %v3836_v10 = vpop.eup %3835  ;;  %v2467_v3 = vsub.f32 %v2463_v50, %v5610_v41  ;;  %3847 = vrcp.f32 %v2436_v40  ;;  %v2464_v61 = vmul.f32 2.0, %v2452_v14  ;;  %v2437_v52 = vsub.f32 %v2433_v34, %v5669_v11  ;;  %v1314_v34 = vpop.permute.xlu0 %1313 }
 0x62f   : > { %v2498_v47 = vmul.f32 0.1, %v2494_v36  ;;  %v5819_v28 = vmul.f32 %v2279_v62, %v5370_v53  ;;  %v3838_v12 = vpop.eup %3837  ;;  %v2443_v33 = vadd.f32 %v3836_v10, %v2427_v25  ;;  %v2232_v15 = vadd.f32 %v3834_v58, %v2216_v23 }
 0x630   : > { %3849 = vrcp.f32 %v2452_v14  ;;  %v3840_v8 = vpop.eup %3839  ;;  %v2479_v39 = vmul.f32 2.0, %v2467_v3  ;;  %v2468_v53 = vsub.f32 %v2464_v61, %v5634_v54 }
 0x631   : > { %v2502_v45 = vadd.f32 %v2498_v47, %v2286_v17  ;;  %3851 = vrcp.f32 %v2467_v3  ;;  %v3842_v27 = vpop.eup %3841  ;;  %v2248_v44 = vadd.f32 %v3838_v12, %v2232_v15 }
 0x632   : > { %3501 = vmatmul.msk.f32.gmra.mxu1 %vm2866_vm7, %v5662_v5  ;;  %3853 = vrcp.f32 %v5515_v2  ;;  %v3844_v57 = vpop.eup %3843  ;;  %v2483_v29 = vsub.f32 %v2479_v39, %v5610_v41  ;;  %v2480_v38 = vmul.f32 2.0, %v2468_v53 }
 0x633   : > { %v5827_v42 = vmul.f32 0.5, %v2502_v45  ;;  %3855 = vrcp.f32 %v5743_v20  ;;  %v3846_v7 = vpop.eup %3845  ;;  %v2459_v13 = vadd.f32 %v3844_v57, %v2443_v33  ;;  %v2264_v9 = vadd.f32 %v3840_v8, %v2248_v44 }
 0x634   : > { %3857 = vrcp.f32 %v2468_v53  ;;  %v3848_v5 = vpop.eup %3847  ;;  %v2428_v2 = vadd.f32 %v3846_v7, %v5790_v56  ;;  %v2484_v49 = vsub.f32 %v2480_v38, %v5634_v54 }
 0x635   : > { %3505 = vmatmul.msk.f32.vlgmr.msra.gmra.mxu0 %vm2941_vm9, %v5827_v42  ;;  %3859 = vrcp.f32 %v2483_v29  ;;  %v2280_v48 = vadd.f32 %v3842_v27, %v2264_v9 }
 0x636   : > { %v3850_v16 = vpop.eup %3849  ;;  %3861 = vrcp.f32 %v5779_v0  ;;  %v2444_v60 = vadd.f32 %v3848_v5, %v2428_v2  ;;  %v2449_v0 = vmul.f32 2.0, %v2437_v52 }
 0x637   : > { %v3852_v20 = vpop.eup %3851  ;;  %3863 = vrcp.f32 %v5794_v18  ;;  %v2284_v31 = vmul.f32 %v2280_v48, %v5373_v46  ;;  %v6304_v48 = vld [vmem:[#allocation4_spill] sm:$0xff] }
 0x638   : > { %v3854_v43 = vpop.eup %3853  ;;  %v2475_v26 = vadd.f32 %v3852_v20, %v2459_v13  ;;  %3865 = vrcp.f32 %v2484_v49  ;;  %v2460_v56 = vadd.f32 %v3850_v16, %v2444_v60  ;;  %v2453_v46 = vsub.f32 %v2449_v0, %v5669_v11  ;;  %v1402_v60 = vpop.permute.xlu2 %1401 }
 0x639   : > { %v3856_v40 = vpop.eup %3855  ;;  %v2217_v24 = vadd.f32 %v3854_v43, %v5527_v4  ;;  %3867 = vrcp.f32 %v2273_v22  ;;  %v2287_v22 = vmul.f32 0.1, %v5819_v28  ;;  %v2288_v12 = vmul.f32 0.1, %v2284_v31  ;;  %v6305_v43 = vld [vmem:[#allocation7_spill] sm:$0xff]  ;;  %v1397_v31 = vpop.permute.xlu0 %1396 }
 0x63a   : > { %v3858_v37 = vpop.eup %3857  ;;  %3502 = vmatmul.msk.f32.gmra.mxu1 %vm2866_vm7, %v5697_v51  ;;  %3869 = vrcp.f32 %v2421_v19  ;;  %v2465_v62 = vmul.f32 2.0, %v2453_v46 }
 0x63b   : > { %v3860_v18 = vpop.eup %3859  ;;  %v2476_v32 = vadd.f32 %v3858_v37, %v2460_v56  ;;  %v2233_v63 = vadd.f32 %v3856_v40, %v2217_v24  ;;  %3871 = vrcp.f32 %v2437_v52  ;;  %v6306_v40 = vld [vmem:[#allocation5_spill] sm:$0xff] }
 0x63c   : > { %v3862_v59 = vpop.eup %3861  ;;  %v2491_v17 = vadd.f32 %v3860_v18, %v2475_v26  ;;  %3873 = vrcp.f32 %v2453_v46  ;;  %v2469_v23 = vsub.f32 %v2465_v62, %v5669_v11  ;;  %v1340_v56 = vmul.f32 %v1314_v34, %v6306_v40 }
 0x63d   : > { %v3864_v25 = vpop.eup %3863  ;;  %v2249_v6 = vadd.f32 %v3862_v59, %v2233_v63 }
 0x63e   : > { %v3866_v4 = vpop.eup %3865  ;;  %v2495_v36 = vmul.f32 %v2491_v17, %v5610_v41  ;;  %3875 = vrcp.f32 %v2469_v23  ;;  %v2481_v41 = vmul.f32 2.0, %v2469_v23  ;;  %v1424_v59 = vadd.f32 %v1397_v31, %v1340_v56 }
 0x63f   : > { %v2492_v51 = vadd.f32 %v3866_v4, %v2476_v32  ;;  %v2265_v50 = vadd.f32 %v3864_v25, %v2249_v6  ;;  %v3868_v30 = vpop.eup %3867  ;;  %v6307_v32 = vld [vmem:[#allocation6_spill] sm:$0xff]  ;;  %v6308_v25 = vld [vmem:[#allocation8_spill] sm:$0xff] }
 0x640   : > { %v2499_v58 = vmul.f32 0.1, %v2495_v36  ;;  %v3870_v47 = vpop.eup %3869  ;;  %v2485_v8 = vsub.f32 %v2481_v41, %v5669_v11  ;;  %v1341_v63 = vmul.f32 %v1314_v34, %v6307_v32  ;;  %v3482_v4 = vmul.f32 -1.442695, %v1424_v59 }
 0x641   : > { %v2496_v14 = vmul.f32 %v2492_v51, %v5634_v54  ;;  %v2281_v10 = vadd.f32 %v3868_v30, %v2265_v50  ;;  %v2429_v28 = vadd.f32 %v3870_v47, %v5816_v1  ;;  %v3872_v45 = vpop.eup %3871  ;;  %v1306_v51 = vpop.permute.xlu2 %1305 }
 0x642   : > { %3503 = vmatmul.msk.f32.gmra.mxu1 %vm2866_vm7, %v5731_v35  ;;  %v2503_v3 = vadd.f32 %v2499_v58, %v2287_v22  ;;  %v3874_v54 = vpop.eup %3873  ;;  %3877 = vrcp.f32 %v2485_v8  ;;  %v1425_v46 = vadd.f32 %v1397_v31, %v1341_v63 }
 0x643   : > { %v2500_v33 = vmul.f32 0.1, %v2496_v14  ;;  %v2285_v15 = vmul.f32 %v2281_v10, %v5450_v55  ;;  %v2445_v27 = vadd.f32 %v3872_v45, %v2429_v28  ;;  %v1387_v14 = vpop.permute.xlu0 %1386  ;;  %v6309_v10 = vld [vmem:[#allocation2_spill] sm:$0xff] }
 0x644   : > { %v2507_v61 = vmul.f32 0.5, %v2503_v3  ;;  %v3876_v44 = vpop.eup %3875  ;;  %v3483_v62 = vmul.f32 -1.442695, %v1425_v46  ;;  %v1336_v47 = vmul.f32 %v1306_v51, %v6309_v10 }
 0x645   : > { %v2504_v39 = vadd.f32 %v2500_v33, %v2288_v12  ;;  %v2461_v35 = vadd.f32 %v3874_v54, %v2445_v27  ;;  %v2289_v29 = vmul.f32 0.1, %v2285_v15  ;;  %v6310_v12 = vld [vmem:[#allocation3_spill] sm:$0xff] }
 0x646   : > { %3506 = vmatmul.msk.f32.gmra.mxu0 %vm2941_vm9, %v2507_v61  ;;  %v1337_v33 = vmul.f32 %v1306_v51, %v6310_v12  ;;  %v1420_v15 = vadd.f32 %v1387_v14, %v1336_v47 }
 0x647   : > { %v2508_v53 = vmul.f32 0.5, %v2504_v39  ;;  %v2477_v19 = vadd.f32 %v3876_v44, %v2461_v35 }
 0x648   : > { %v3878_v55 = vpop.eup %3877  ;;  %v1421_v8 = vadd.f32 %v1387_v14, %v1337_v33  ;;  %v3478_v54 = vmul.f32 -1.442695, %v1420_v15 }
 0x649   : > { %v2493_v1 = vadd.f32 %v3878_v55, %v2477_v19 }
 0x64a   : > { %3510 = vmatmul.msk.f32.vlgmr.msra.gmra.mxu1 %vm2941_vm9, %v5827_v42  ;;  %v1318_v42 = vpop.permute.xlu1 %1317  ;;  %v3479_v35 = vmul.f32 -1.442695, %v1421_v8 }
 0x64b   : > { %v2497_v57 = vmul.f32 %v2493_v1, %v5669_v11  ;;  %v1342_v26 = vmul.f32 %v1318_v42, %v6305_v43  ;;  %v1343_v6 = vmul.f32 %v1318_v42, %v6308_v25 }
 0x64d   : > { %v2501_v7 = vmul.f32 0.1, %v2497_v57  ;;  %v1426_v24 = vadd.f32 %v1402_v60, %v1342_v26  ;;  %v1427_v36 = vadd.f32 %v1402_v60, %v1343_v6 }
 0x64e   : > { %3507 = vmatmul.msk.f32.gmra.mxu0 %vm2941_vm9, %v2508_v53 }
 0x64f   : > { %v2505_v13 = vadd.f32 %v2501_v7, %v2289_v29  ;;  %v3485_v23 = vmul.f32 -1.442695, %v1427_v36 }
 0x651   : > { %v2509_v9 = vmul.f32 0.5, %v2505_v13 }
 0x652   : > { %3511 = vmatmul.msk.f32.gmra.mxu1 %vm2941_vm9, %v2507_v61  ;;  %v1310_v5 = vpop.permute.xlu1 %1309 }
 0x653   : > { %v1338_v16 = vmul.f32 %v1310_v5, %v4141_v21  ;;  %v1339_v49 = vmul.f32 %v1310_v5, %v6304_v48  ;;  %v3484_v21 = vmul.f32 -1.442695, %v1426_v24 }
 0x656   : > { %3508 = vmatmul.msk.f32.gmra.mxu0 %vm2941_vm9, %v2509_v9 }
 0x65a   : > { %3512 = vmatmul.msk.f32.gmra.mxu1 %vm2941_vm9, %v2508_v53  ;;  %v1392_v11 = vpop.permute.xlu1 %1391 }
 0x65b   : > { %v1422_v20 = vadd.f32 %v1392_v11, %v1338_v16  ;;  %v1423_v52 = vadd.f32 %v1392_v11, %v1339_v49 }
 0x65d   : > { %v3480_v37 = vmul.f32 -1.442695, %v1422_v20  ;;  %v3481_v18 = vmul.f32 -1.442695, %v1423_v52 }
 0x65f   : > { %3879 = vpow2.f32 %v3480_v37 }
 0x660   : > { %3881 = vpow2.f32 %v3481_v18 }
 0x661   : > { %3883 = vpow2.f32 %v3484_v21 }
 0x662   : > { %3513 = vmatmul.msk.f32.gmra.mxu1 %vm2941_vm9, %v2509_v9  ;;  %3885 = vpow2.f32 %v3482_v4 }
 0x663   : > { %3887 = vpow2.f32 %v3483_v62 }
 0x664   : > { %3889 = vpow2.f32 %v3485_v23 }
 0x665   : > { %v3880_v50 = vpop.eup %3879 }
 0x666   : > { %v3882_v58 = vpop.eup %3881  ;;  %v5883_v3 = vadd.f32 1.0, %v3880_v50 }
 0x667   : > { %v3884_v41 = vpop.eup %3883  ;;  %v5886_v28 = vadd.f32 1.0, %v3882_v58 }
 0x668   : > { %v3886_v61 = vpop.eup %3885  ;;  %v5888_v45 = vadd.f32 1.0, %v3884_v41  ;;  %3891 = vrcp.f32 %v5883_v3  ;;  %vm1799_vm12 = vweird.f32 %v5883_v3  ;;  %v1805_v36 = vand.u32 2147483648, %v5883_v3 }
 0x669   : > { %v3888_v39 = vpop.eup %3887  ;;  %3893 = vrcp.f32 %v5886_v28  ;;  %v5894_v44 = vadd.f32 1.0, %v3886_v61  ;;  %v1820_v50 = vand.u32 2147483648, %v5886_v28  ;;  %v1803_v23 = vand.u32 2147483647, %v5883_v3 }
 0x66a   : > { %v3890_v19 = vpop.eup %3889  ;;  %3895 = vrcp.f32 %v5888_v45  ;;  %v5899_v55 = vadd.f32 1.0, %v3888_v39  ;;  %v1863_v32 = vand.u32 2147483647, %v5888_v45  ;;  %v1865_v21 = vand.u32 2147483648, %v5888_v45 }
 0x66b   : > { %3897 = vpow2.f32 %v3478_v54  ;;  %v5906_v29 = vadd.f32 1.0, %v3890_v19  ;;  %vm1814_vm14 = vweird.f32 %v5886_v28  ;;  %vm1829_vm3 = vweird.f32 %v5894_v44 }
 0x66c   : > { %3899 = vrcp.f32 %v5894_v44  ;;  %v1833_v47 = vand.u32 2147483647, %v5894_v44  ;;  %v1806_v54 = vor.u32 1.1754944e-38, %v1805_v36  ;;  %v1821_v19 = vor.u32 1.1754944e-38, %v1820_v50 }
 0x66d   : > { %3901 = vpow2.f32 %v3479_v35  ;;  %vm1804_vm4 = vcmp.eq.f32.partialorder %v1803_v23, 8.507059e+37  ;;  %vm1859_vm5 = vweird.f32 %v5888_v45  ;;  %v1880_v50 = vand.u32 2147483648, %v5906_v29 }
 0x66e   : > { %v5901_v1 = vpop.eup %3891  ;;  %3903 = vrcp.f32 %v5899_v55 }
 0x66f   : > { %v5904_v57 = vpop.eup %3893  ;;  %v1795_v9 = vmul.f32 %v5901_v1, %v5883_v3  ;;  %3905 = vrcp.f32 %v5906_v29  ;;  %vm1800_vm10 = vweird.f32 %v5901_v1 }
 0x670   : > { %v5911_v13 = vpop.eup %3895  ;;  %v1810_v42 = vmul.f32 %v5904_v57, %v5886_v28  ;;  %vm1815_vm11 = vweird.f32 %v5904_v57  ;;  %vm5955_vm13 = vmor %vm1799_vm12, %vm1800_vm10  ;;  %vm1844_vm10 = vweird.f32 %v5899_v55 }
 0x671   : > { %v3898_v5 = vpop.eup %3897  ;;  %v1796_v49 = vsub.f32 1.0, %v1795_v9  ;;  %v1855_v40 = vmul.f32 %v5911_v13, %v5888_v45  ;;  %vm5970_vm15 = vmor %vm1814_vm14, %vm1815_vm11  ;;  %vm1860_vm11 = vweird.f32 %v5911_v13 }
 0x672   : > { %v5918_v34 = vpop.eup %3899  ;;  %v1811_v20 = vsub.f32 1.0, %v1810_v42  ;;  %v5922_v60 = vadd.f32 1.0, %v3898_v5  ;;  %v1835_v5 = vand.u32 2147483648, %v5894_v44 }
 0x673   : > { %v3902_v11 = vpop.eup %3901  ;;  %v1825_v52 = vmul.f32 %v5918_v34, %v5894_v44  ;;  %v1797_v24 = vmul.f32 %v5901_v1, %v1796_v49  ;;  %v1856_v59 = vsub.f32 1.0, %v1855_v40  ;;  %vm1830_vm2 = vweird.f32 %v5918_v34 }
 0x674   : > { %v5920_v48 = vpop.eup %3903  ;;  %v5926_v43 = vadd.f32 1.0, %v3902_v11  ;;  %v1812_v37 = vmul.f32 %v5904_v57, %v1811_v20  ;;  %3907 = vrcp.f32 %v5922_v60  ;;  %vm6003_vm9 = vmor %vm1829_vm3, %vm1830_vm2  ;;  %v1878_v40 = vand.u32 2147483647, %v5906_v29 }
 0x675   : > { %v5928_v26 = vpop.eup %3905  ;;  %v1840_v56 = vmul.f32 %v5920_v48, %v5899_v55  ;;  %v1826_v18 = vsub.f32 1.0, %v1825_v52  ;;  %v1798_v25 = vadd.f32 %v5901_v1, %v1797_v24  ;;  %v1857_v41 = vmul.f32 %v5911_v13, %v1856_v59  ;;  %vm6037_vm3 = vmor %vm1859_vm5, %vm1860_vm11 }
 0x676   : > { %3909 = vrcp.f32 %v5926_v43  ;;  %v5943_v63 = vmul.f32 %v5928_v26, %v5906_v29  ;;  %v1813_v4 = vadd.f32 %v5904_v57, %v1812_v37  ;;  %vm1845_vm8 = vweird.f32 %v5920_v48 }
 0x677   : > { %v1841_v46 = vsub.f32 1.0, %v1840_v56  ;;  %v1827_v62 = vmul.f32 %v5918_v34, %v1826_v18  ;;  %v1850_v52 = vand.u32 2147483648, %v5899_v55  ;;  %v1848_v37 = vand.u32 2147483647, %v5899_v55  ;;  %vm6020_vm12 = vmor %vm1844_vm10, %vm1845_vm8 }
 0x678   : > { %v1871_v14 = vsub.f32 1.0, %v5943_v63  ;;  %v1817_v8 = vsel %vm5970_vm15, %v5904_v57, %v1813_v4  ;;  %v1836_v18 = vor.u32 1.1754944e-38, %v1835_v5  ;;  %v1858_v63 = vadd.f32 %v5911_v13, %v1857_v41 }
 0x679   : > { %v1842_v33 = vmul.f32 %v5920_v48, %v1841_v46  ;;  %v1828_v35 = vadd.f32 %v5918_v34, %v1827_v62  ;;  %vm1849_vm14 = vcmp.eq.f32.partialorder %v1848_v37, 8.507059e+37  ;;  %vm1874_vm15 = vweird.f32 %v5906_v29 }
 0x67a   : > { %v5963_v10 = vpop.eup %3907  ;;  %vm1875_vm2 = vweird.f32 %v5928_v26  ;;  %vm6055_vm5 = vcmp.eq.f32.partialorder %v1878_v40, 8.507059e+37  ;;  %vm1784_vm8 = vweird.f32 %v5926_v43  ;;  %v1790_v5 = vand.u32 2147483648, %v5926_v43 }
 0x67b   : > { %v1843_v49 = vadd.f32 %v5920_v48, %v1842_v33  ;;  %v1832_v56 = vsel %vm6003_vm9, %v5918_v34, %v1828_v35  ;;  %v1872_v34 = vmul.f32 %v5928_v26, %v1871_v14  ;;  %v1881_v33 = vor.u32 1.1754944e-38, %v1880_v50 }
 0x67c   : > { %v5975_v15 = vpop.eup %3909  ;;  %vm1770_vm10 = vweird.f32 %v5963_v10  ;;  %vm1769_vm11 = vweird.f32 %v5922_v60  ;;  %v1791_v40 = vor.u32 1.1754944e-38, %v1790_v5  ;;  %v6189_v5 = vld [vmem:[%s6242_s4 + $0x18] sm:$0xff] }
 0x67d   : > { %v1780_v57 = vmul.f32 %v5975_v15, %v5926_v43  ;;  %v1873_v14 = vadd.f32 %v5928_v26, %v1872_v34  ;;  %vm1785_vm9 = vweird.f32 %v5975_v15 }
 0x67e   : > { %v5864_v38 = vpop.f32.mrf.mxu0 }
 0x67f   : > { %v1781_v55 = vsub.f32 1.0, %v1780_v57 }
 0x686   : > { %v5866_v2 = vpop.f32.mrf.mxu0 }
 0x68e   : > { %v5872_v0 = vpop.f32.mrf.mxu0 }
 0x696   : > { %v5878_v30 = vpop.f32.mrf.mxu0 }
 0x6a7   : > { %v5875_v17 = vpop.f32.mrf.mxu1 }
 0x6af   : > { %v5880_v22 = vpop.f32.mrf.mxu1 }
 0x6b2   : > { %v5896_v53 = vpop.f32.mrf.mxu0 }
 0x6b7   : > { %v5892_v27 = vpop.f32.mrf.mxu1 }
 0x6bf   : > { %v5909_v7 = vpop.f32.mrf.mxu1 }
 0x6c3   : > { %v2979_v16 = vpop.f32.mrf.mxu0 }
 0x6c4   : > { %v2980_v6 = vadd.f32 %v2979_v16, %v5866_v2  ;;  %v1818_v2 = vand.u32 2147483647, %v5886_v28  ;;  %v1802_v28 = vsel %vm5955_vm13, %v5901_v1, %v1798_v25  ;;  %vm1834_vm13 = vcmp.eq.f32.partialorder %v1833_v47, 8.507059e+37 }
 0x6c5   : > { %v1807_v42 = vsel %vm1804_vm4, %v1806_v54, %v1802_v28  ;;  %v1837_v62 = vsel %vm1834_vm13, %v1836_v18, %v1832_v56  ;;  %v1782_v47 = vmul.f32 %v5975_v15, %v1781_v55  ;;  %vm1864_vm4 = vcmp.eq.f32.partialorder %v1863_v32, 8.507059e+37  ;;  %vm6101_vm13 = vmor %vm1769_vm11, %vm1770_vm10 }
 0x6c6   : > { %v3019_v61 = vmul.f32 0.5, %v2980_v6  ;;  %vm1819_vm6 = vcmp.eq.f32.partialorder %v1818_v2, 8.507059e+37  ;;  %v1847_v6 = vsel %vm6020_vm12, %v5920_v48, %v1843_v49  ;;  %vm6095_vm12 = vmor %vm1784_vm8, %vm1785_vm9 }
 0x6c7   : > { %v5930_v31 = vpop.f32.mrf.mxu1  ;;  %v1822_v11 = vsel %vm1819_vm6, %v1821_v19, %v1817_v8  ;;  %vm6059_vm6 = vmor %vm1874_vm15, %vm1875_vm2  ;;  %v1783_v54 = vadd.f32 %v5975_v15, %v1782_v47 }
 0x6c8   : > { %v1877_v8 = vsel %vm6059_vm6, %v5928_v26, %v1873_v14  ;;  %v3006_v35 = vadd.f32 %v5930_v31, %v5875_v17  ;;  %v2977_v26 = vadd.f32 %v5896_v53, %v5864_v38  ;;  %v1775_v31 = vand.u32 2147483648, %v5922_v60 }
 0x6c9   : > { %v1882_v38 = vsel %vm6055_vm5, %v1881_v33, %v1877_v8 }
 0x6ca   : > { %v3017_v56 = vmul.f32 0.5, %v2977_v26  ;;  %v6199_v26 = vld [vmem:[%s6242_s4 + $0x8] sm:$0xff] }
 0x6cb   : > { %v2982_v51 = vpop.f32.mrf.mxu0 }
 0x6cc   : > { %v2983_v9 = vadd.f32 %v2982_v51, %v5872_v0  ;;  %v1765_v0 = vmul.f32 %v5963_v10, %v5922_v60  ;;  %v1851_v51 = vor.u32 1.1754944e-38, %v1850_v52 }
 0x6ce   : > { %v3021_v24 = vmul.f32 0.5, %v2983_v9  ;;  %v1766_v36 = vsub.f32 1.0, %v1765_v0  ;;  %v1787_v0 = vsel %vm6095_vm12, %v5975_v15, %v1783_v54 }
 0x6cf   : > { %v3008_v3 = vpop.f32.mrf.mxu1 }
 0x6d0   : > { %v3009_v39 = vadd.f32 %v3008_v3, %v5880_v22  ;;  %v5990_v22 = vmul.f32 %v3019_v61, %v1807_v42  ;;  %v6030_v58 = vmul.f32 %v3021_v24, %v1837_v62  ;;  %v1767_v12 = vmul.f32 %v5963_v10, %v1766_v36  ;;  %v3039_v61 = vld [vmem:[%s6248_s10 + $0x8] sm:$0xff] }
 0x6d1   : > { %v1866_v3 = vor.u32 1.1754944e-38, %v1865_v21  ;;  %v1788_v42 = vand.u32 2147483647, %v5926_v43 }
 0x6d2   : > { %v3020_v1 = vmul.f32 0.5, %v3009_v39  ;;  %v3058_v32 = vmul.f32 %v6030_v58, %v6030_v58  ;;  %v3056_v43 = vmul.f32 %v5990_v22, %v5990_v22 }
 0x6d3   : > { %v2985_v59 = vpop.f32.mrf.mxu0 }
 0x6d4   : > { %v5994_v16 = vmul.f32 %v3020_v1, %v1822_v11  ;;  %v2986_v23 = vadd.f32 %v2985_v59, %v5878_v30  ;;  %v1862_v30 = vsel %vm6037_vm3, %v5911_v13, %v1858_v63  ;;  %v1768_v1 = vadd.f32 %v5963_v10, %v1767_v12  ;;  %v3037_v12 = vld [vmem:[%s6247_s9] sm:$0xff] }
 0x6d5   : > { %v1867_v21 = vsel %vm1864_vm4, %v1866_v3, %v1862_v30 }
 0x6d6   : > { %v3045_v44 = vadd.f32 %v5994_v16, %v5990_v22  ;;  %v3023_v28 = vmul.f32 0.5, %v2986_v23  ;;  %v3057_v17 = vmul.f32 %v5994_v16, %v5994_v16  ;;  %v1772_v52 = vsel %vm6101_vm13, %v5963_v10, %v1768_v1  ;;  %v6182_v1 = vld [vmem:[%s6242_s4 + $0x10] sm:$0xff] }
 0x6d7   : > { %v3011_v25 = vpop.f32.mrf.mxu1 }
 0x6d8   : > { %v3012_v4 = vadd.f32 %v3011_v25, %v5892_v27  ;;  %3046 = vadd.xlane.f32.xlu1 %v3045_v44  ;;  %v1852_v27 = vsel %vm1849_vm14, %v1851_v51, %v1847_v6  ;;  %v6084_v11 = vmul.f32 %v3023_v28, %v1867_v21  ;;  %vm1789_vm14 = vcmp.eq.f32.partialorder %v1788_v42, 8.507059e+37  ;;  %v3038_v28 = vld [vmem:[%s6248_s10] sm:$0xff] }
 0x6d9   : > { %v3065_v24 = vadd.f32 %v3057_v17, %v3056_v43  ;;  %v1776_v44 = vor.u32 1.1754944e-38, %v1775_v31  ;;  %v1792_v18 = vsel %vm1789_vm14, %v1791_v40, %v1787_v0 }
 0x6da   : > { %v3022_v2 = vmul.f32 0.5, %v3012_v4  ;;  %v3060_v37 = vmul.f32 %v6084_v11, %v6084_v11 }
 0x6dc   : > { %v6050_v41 = vmul.f32 %v3022_v2, %v1852_v27 }
 0x6de   : > { %v3048_v13 = vadd.f32 %v6050_v41, %v6030_v58  ;;  %v3059_v45 = vmul.f32 %v6050_v41, %v6050_v41 }
 0x6df   : > { %v3014_v39 = vpop.f32.mrf.mxu1 }
 0x6e0   : > { %v3015_v19 = vadd.f32 %v3014_v39, %v5909_v7  ;;  %3049 = vadd.xlane.f32.xlu0 %v3048_v13  ;;  %v3068_v9 = vadd.f32 %v3059_v45, %v3058_v32  ;;  %v1773_v7 = vand.u32 2147483647, %v5922_v60  ;;  %v3018_v60 = vmul.f32 0.5, %v3006_v35  ;;  %v3040_v13 = vld [vmem:[%s6248_s10 + $0x10] sm:$0xff]  ;;  %v3041_v32 = vld [vmem:[%s6248_s10 + $0x18] sm:$0xff]  ;;  %v6170_v35 = vld [vmem:[%s6242_s4] sm:$0xff] }
 0x6e2   : > { %v3024_v57 = vmul.f32 0.5, %v3015_v19  ;;  %3069 = vadd.xlane.f32.xlu2 %v3068_v9  ;;  %vm1774_vm3 = vcmp.eq.f32.partialorder %v1773_v7, 8.507059e+37  ;;  %v6119_v63 = vmul.f32 %v3018_v60, %v1792_v18 }
 0x6e3   : > { %v1777_v46 = vsel %vm1774_vm3, %v1776_v44, %v1772_v52 }
 0x6e4   : > { %v6108_v20 = vmul.f32 %v3024_v57, %v1882_v38  ;;  %v6123_v25 = vmul.f32 %v3017_v56, %v1777_v46  ;;  %v3055_v34 = vmul.f32 %v6119_v63, %v6119_v63 }
 0x6e6   : > { %v3061_v15 = vmul.f32 %v6108_v20, %v6108_v20  ;;  %v3051_v10 = vadd.f32 %v6108_v20, %v6084_v11  ;;  %v3054_v55 = vmul.f32 %v6123_v25, %v6123_v25  ;;  %v3042_v4 = vadd.f32 %v6119_v63, %v6123_v25 }
 0x6e8   : > { %3066 = vadd.xlane.f32.xlu0 %v3065_v24  ;;  %v3071_v59 = vadd.f32 %v3061_v15, %v3060_v37  ;;  %v3062_v6 = vadd.f32 %v3055_v34, %v3054_v55 }
 0x6ea   : > { %3072 = vadd.xlane.f32.xlu1 %v3071_v59  ;;  %3052 = vadd.xlane.f32.xlu2 %v3051_v10 }
 0x6f2   : > { %3063 = vadd.xlane.f32.xlu1 %v3062_v6  ;;  %3043 = vadd.xlane.f32.xlu2 %v3042_v4 }
 0x74b   : > { %v3047_v36 = vpop.xlane.xlu1 %3046 }
 0x753   : > { %v3050_v62 = vpop.xlane.xlu0 %3049 }
 0x755   : > { %v3070_v51 = vpop.xlane.xlu2 %3069 }
 0x756   : > { %v3076_v27 = vsel %vm746_vm1, %v3050_v62, %v3070_v51 }
 0x75b   : > { %v3067_v48 = vpop.xlane.xlu0 %3066 }
 0x75c   : > { %v3075_v14 = vsel %vm746_vm1, %v3047_v36, %v3067_v48 }
 0x75d   : > { %v3073_v50 = vpop.xlane.xlu1 %3072  ;;  %v3053_v23 = vpop.xlane.xlu2 %3052 }
 0x75e   : > { %v3077_v2 = vsel %vm746_vm1, %v3053_v23, %v3073_v50 }
 0x75f   : > { %3093 = vmatpush.msra.mxu2 %v3077_v2 }
 0x761   : > { %3094 = vmatpush.msra.mxu2 %v3076_v27 }
 0x763   : > { %3095 = vmatpush.msra.mxu2 %v3075_v14 }
 0x765   : > { %v3064_v47 = vpop.xlane.xlu1 %3063  ;;  %v3044_v30 = vpop.xlane.xlu2 %3043 }
 0x766   : > { %v3074_v3 = vsel %vm746_vm1, %v3044_v30, %v3064_v47 }
 0x767   : > { %3096 = vmatpush.msra.mxu2 %v3074_v3 }
 0x768   : > { %3514 = vmatmul.msk.f32.vlgmr.msra.gmra.mxu2 %vm526_vm0, %v3037_v12 }
 0x7eb   : > { %v3098_v29 = vpop.f32.mrf.mxu2 }
 0x7ec   : > { %v3101_v33 = vmul.f32 0.0009765625, %v3098_v29 }
 0x7ee   : > { %3129 = vmatpush.msrb.mxu2 %v3101_v33 }
 0x7ef   : > { %3515 = vmatmul.msk.f32.vlgmr.msrb.gmra.mxu2 %vm2866_vm7, %v3038_v28 }
 0x7f7   : > { %3516 = vmatmul.msk.f32.gmra.mxu2 %vm2866_vm7, %v3039_v61 }
 0x7ff   : > { %3517 = vmatmul.msk.f32.gmra.mxu2 %vm2866_vm7, %v3040_v13 }
 0x807   : > { %3518 = vmatmul.msk.f32.gmra.mxu2 %vm2866_vm7, %v3041_v32 }
 0x872   : > { %v6155_v45 = vpop.f32.mrf.mxu2 }
 0x873   : > { %v3143_v21 = vmul.f32 %v6155_v45, %v6155_v45 }
 0x875   : > { %3151 = vrot.lane.b32.xlu0 %v3143_v21, %s3932_s30 }
 0x87a   : > { %v6160_v8 = vpop.f32.mrf.mxu2 }
 0x87b   : > { %v3144_v39 = vmul.f32 %v6160_v8, %v6160_v8 }
 0x87d   : > { %3153 = vrot.lane.b32.xlu2 %v3144_v39, %s3932_s30 }
 0x882   : > { %v6165_v54 = vpop.f32.mrf.mxu2 }
 0x883   : > { %v3145_v19 = vmul.f32 %v6165_v54, %v6165_v54 }
 0x885   : > { %3155 = vrot.lane.b32.xlu1 %v3145_v19, %s3932_s30  ;;  %3215 = vrot.lane.b32.xlu2 %v6170_v35, %s3932_s30 }
 0x88a   : > { %v6177_v9 = vpop.f32.mrf.mxu2 }
 0x88b   : > { %v3146_v42 = vmul.f32 %v6177_v9, %v6177_v9 }
 0x88d   : > { %3157 = vrot.lane.b32.xlu0 %v3146_v42, %s3932_s30  ;;  %3219 = vrot.lane.b32.xlu1 %v6182_v1, %s3932_s30 }
 0x88e   : > { %3221 = vrot.lane.b32.xlu2 %v6189_v5, %s3932_s30 }
 0x895   : > { %3217 = vrot.lane.b32.xlu0 %v6199_v26, %s3932_s30 }
 0x8d7   : > { %v3154_v57 = vpop.permute.xlu2 %3153 }
 0x8d8   : > { %v3164_v17 = vsub.f32 %v6160_v8, %v3154_v57 }
 0x8da   : > { %v3168_v7 = vadd.f32 1e-05, %v3164_v17 }
 0x8dc   : > { %3911 = vrsqrt.f32 %v3168_v7  ;;  %vm3187_vm2 = vweird.f32 %v3168_v7 }
 0x8df   : > { %v3216_v10 = vpop.permute.xlu2 %3215 }
 0x8e2   : > { %v3912_v53 = vpop.eup %3911 }
 0x8e3   : > { %v3182_v43 = vmul.f32 %v3912_v53, %v3168_v7  ;;  %vm3188_vm15 = vweird.f32 %v3912_v53 }
 0x8e4   : > { %vm3189_vm4 = vmor %vm3187_vm2, %vm3188_vm15 }
 0x8e5   : > { %v3183_v56 = vmul.f32 %v3912_v53, %v3182_v43 }
 0x8e7   : > { %v3152_v31 = vpop.permute.xlu0 %3151  ;;  %v3184_v18 = vmul.f32 0.5, %v3183_v56 }
 0x8e8   : > { %v3163_v49 = vsub.f32 %v6155_v45, %v3152_v31  ;;  %v3222_v21 = vpop.permute.xlu2 %3221 }
 0x8e9   : > { %v3185_v6 = vsub.f32 1.5, %v3184_v18 }
 0x8ea   : > { %v3167_v38 = vadd.f32 1e-05, %v3163_v49 }
 0x8eb   : > { %v3186_v50 = vmul.f32 %v3912_v53, %v3185_v6 }
 0x8ec   : > { %3913 = vrsqrt.f32 %v3167_v38  ;;  %vm3177_vm1 = vweird.f32 %v3167_v38 }
 0x8ed   : > { %v3190_v48 = vsel %vm3189_vm4, %v3912_v53, %v3186_v50 }
 0x8f2   : > { %v3914_v0 = vpop.eup %3913 }
 0x8f3   : > { %v3172_v60 = vmul.f32 %v3914_v0, %v3167_v38  ;;  %vm3178_vm0 = vweird.f32 %v3914_v0 }
 0x8f4   : > { %vm3179_vm7 = vmor %vm3177_vm1, %vm3178_vm0 }
 0x8f5   : > { %v3173_v52 = vmul.f32 %v3914_v0, %v3172_v60 }
 0x8f7   : > { %v3174_v40 = vmul.f32 0.5, %v3173_v52  ;;  %v3156_v24 = vpop.permute.xlu1 %3155 }
 0x8f8   : > { %v3165_v37 = vsub.f32 %v6165_v54, %v3156_v24 }
 0x8f9   : > { %v3175_v15 = vsub.f32 1.5, %v3174_v40 }
 0x8fa   : > { %v3169_v44 = vadd.f32 1e-05, %v3165_v37 }
 0x8fb   : > { %v3176_v59 = vmul.f32 %v3914_v0, %v3175_v15 }
 0x8fc   : > { %3915 = vrsqrt.f32 %v3169_v44  ;;  %vm3197_vm6 = vweird.f32 %v3169_v44 }
 0x8fd   : > { %v3180_v46 = vsel %vm3179_vm7, %v3914_v0, %v3176_v59 }
 0x8fe   : > { %v3227_v34 = vmul.f32 %v3216_v10, %v3180_v46 }
 0x8ff   : > { %v3158_v55 = vpop.permute.xlu0 %3157  ;;  %v3220_v29 = vpop.permute.xlu1 %3219 }
 0x900   : > { %v3166_v4 = vsub.f32 %v6177_v9, %v3158_v55  ;;  %3235 = vrot.lane.b32.xlu0 %v3227_v34, %s3933_s12 }
 0x902   : > { %v3916_v36 = vpop.eup %3915  ;;  %v3170_v62 = vadd.f32 1e-05, %v3166_v4 }
 0x903   : > { %v3192_v51 = vmul.f32 %v3916_v36, %v3169_v44  ;;  %vm3198_vm5 = vweird.f32 %v3916_v36 }
 0x904   : > { %3917 = vrsqrt.f32 %v3170_v62  ;;  %vm3199_vm8 = vmor %vm3197_vm6, %vm3198_vm5  ;;  %vm3207_vm10 = vweird.f32 %v3170_v62 }
 0x905   : > { %v3193_v23 = vmul.f32 %v3916_v36, %v3192_v51 }
 0x907   : > { %v3194_v2 = vmul.f32 0.5, %v3193_v23  ;;  %v3218_v27 = vpop.permute.xlu0 %3217 }
 0x908   : > { %v3228_v14 = vmul.f32 %v3218_v27, %v3190_v48 }
 0x909   : > { %v3195_v47 = vsub.f32 1.5, %v3194_v2 }
 0x90a   : > { %v3918_v30 = vpop.eup %3917  ;;  %3237 = vrot.lane.b32.xlu1 %v3228_v14, %s3933_s12 }
 0x90b   : > { %v3202_v12 = vmul.f32 %v3918_v30, %v3170_v62  ;;  %v3196_v3 = vmul.f32 %v3916_v36, %v3195_v47  ;;  %vm3208_vm9 = vweird.f32 %v3918_v30 }
 0x90c   : > { %vm3209_vm11 = vmor %vm3207_vm10, %vm3208_vm9 }
 0x90d   : > { %v3203_v33 = vmul.f32 %v3918_v30, %v3202_v12  ;;  %v3200_v28 = vsel %vm3199_vm8, %v3916_v36, %v3196_v3 }
 0x90e   : > { %v3229_v61 = vmul.f32 %v3220_v29, %v3200_v28 }
 0x90f   : > { %v3204_v13 = vmul.f32 0.5, %v3203_v33 }
 0x910   : > { %3239 = vrot.lane.b32.xlu2 %v3229_v61, %s3933_s12 }
 0x911   : > { %v3205_v32 = vsub.f32 1.5, %v3204_v13 }
 0x913   : > { %v3206_v39 = vmul.f32 %v3918_v30, %v3205_v32 }
 0x915   : > { %v3210_v19 = vsel %vm3209_vm11, %v3918_v30, %v3206_v39 }
 0x916   : > { %v3230_v42 = vmul.f32 %v3222_v21, %v3210_v19 }
 0x918   : > { %3241 = vrot.lane.b32.xlu0 %v3230_v42, %s3933_s12 }
 0x96a   : > { %v3240_v57 = vpop.permute.xlu2 %3239 }
 0x96b   : > { %v3249_v17 = vmul.f32 %v3240_v57, %v6165_v54 }
 0x96d   : > { %3259 = vrot.lane.b32.xlu0 %v3249_v17, %s3932_s30 }
 0x972   : > { %v3236_v7 = vpop.permute.xlu0 %3235 }
 0x973   : > { %v3247_v31 = vmul.f32 %v3236_v7, %v6155_v45 }
 0x975   : > { %3276 = vperm.xlu0 %3549, %v3228_v14   ;;  %3255 = vrot.lane.b32.xlu1 %v3247_v31, %s3932_s30 }
 0x97c   : > { %v3238_v49 = vpop.permute.xlu1 %3237 }
 0x97d   : > { %v3248_v38 = vmul.f32 %v3238_v49, %v6160_v8 }
 0x97f   : > { %3257 = vrot.lane.b32.xlu2 %v3248_v38, %s3932_s30 }
 0x987   : > { %3272 = vperm.xlu2 %3550, %v3227_v34  }
 0x98a   : > { %v3242_v53 = vpop.permute.xlu0 %3241 }
 0x98b   : > { %v3250_v0 = vmul.f32 %v3242_v53, %v6177_v9 }
 0x98d   : > { %3261 = vrot.lane.b32.xlu1 %v3250_v0, %s3932_s30  ;;  %s3522_s30 = sshll.u32 %s6330_s18, 6 }
 0x98e   : > { %s386_s15 = scalar_lea.vmem %s6249_s11, %s3522_s30 }
 0x98f   : > { %3284 = vperm.xlu2 %3550, %v3230_v42  }
 0x995   : > { %3280 = vperm.xlu1 %3548, %v3229_v61  }
 0x9d9   : > { %v3258_v54 = vpop.permute.xlu2 %3257 }
 0x9da   : > { %v3268_v45 = vsub.f32 %v6199_v26, %v3258_v54 }
 0x9dc   : > { %3302 = vperm.xlu1 %3548, %v3268_v45  }
 0x9df   : > { %v3260_v60 = vpop.permute.xlu0 %3259 }
 0x9e0   : > { %v3269_v43 = vsub.f32 %v6182_v1, %v3260_v60 }
 0x9e1   : > { %v3273_v56 = vpop.permute.xlu2 %3272 }
 0x9e2   : > { %3307 = vperm.xlu2 %3550, %v3269_v43  }
 0x9e7   : > { %v3256_v8 = vpop.permute.xlu1 %3255  ;;  %v3277_v18 = vpop.permute.xlu0 %3276 }
 0x9e8   : > { %v3267_v52 = vsub.f32 %v6170_v35, %v3256_v8  ;;  %v3290_v59 = vmul.f32 %v3277_v18, %v5994_v16 }
 0x9e9   : > { %v3285_v24 = vpop.permute.xlu2 %3284 }
 0x9ea   : > { %3297 = vperm.xlu0 %3549, %v3267_v52   ;;  %v3293_v36 = vmul.f32 %v3285_v24, %v6084_v11 }
 0x9ff   : > { %v3262_v40 = vpop.permute.xlu1 %3261 }
 0xa00   : > { %v3270_v9 = vsub.f32 %v6189_v5, %v3262_v40  ;;  %v3289_v5 = vmul.f32 %v3277_v18, %v5990_v22  ;;  %v3294_v22 = vmul.f32 %v3285_v24, %v6108_v20 }
 0xa02   : > { %3312 = vperm.xlu0 %3549, %v3270_v9  }
 0xa07   : > { %v3281_v37 = vpop.permute.xlu1 %3280 }
 0xa08   : > { %v3291_v15 = vmul.f32 %v3281_v37, %v6030_v58  ;;  %v3292_v26 = vmul.f32 %v3281_v37, %v6050_v41  ;;  %v3287_v58 = vmul.f32 %v3273_v56, %v6123_v25  ;;  %v3288_v41 = vmul.f32 %v3273_v56, %v6119_v63 }
 0xa3c   : > { %v3308_v1 = vpop.permute.xlu2 %3307 }
 0xa3d   : > { %v3319_v44 = vadd.f32 %v3308_v1, %v3291_v15  ;;  %v3320_v35 = vadd.f32 %v3308_v1, %v3292_v26 }
 0xa3f   : > { %3327 = vst [vmem:[%s386_s15 + $0x20] sm:$0xff] %v3319_v44 }
 0xa40   : > { %3328 = vst [vmem:[%s386_s15 + $0x28] sm:$0xff] %v3320_v35 }
 0xa4e   : > { %v3303_v10 = vpop.permute.xlu1 %3302 }
 0xa4f   : > { %v3317_v46 = vadd.f32 %v3303_v10, %v3289_v5  ;;  %v3318_v34 = vadd.f32 %v3303_v10, %v3290_v59 }
 0xa51   : > { %3325 = vst [vmem:[%s386_s15 + $0x10] sm:$0xff] %v3317_v46 }
 0xa52   : > { %3326 = vst [vmem:[%s386_s15 + $0x18] sm:$0xff] %v3318_v34 }
 0xa5c   : > { %v3298_v55 = vpop.permute.xlu0 %3297 }
 0xa5d   : > { %v3315_v6 = vadd.f32 %v3298_v55, %v3287_v58  ;;  %v3316_v4 = vadd.f32 %v3298_v55, %v3288_v41 }
 0xa5f   : > { %3323 = vst [vmem:[%s386_s15] sm:$0xff] %v3315_v6 }
 0xa60   : > { %3324 = vst [vmem:[%s386_s15 + $0x8] sm:$0xff] %v3316_v4 }
 0xa74   : > { %v3313_v62 = vpop.permute.xlu0 %3312 }
 0xa75   : > { %v3321_v16 = vadd.f32 %v3313_v62, %v3293_v36  ;;  %v3322_v51 = vadd.f32 %v3313_v62, %v3294_v22 }
 0xa77   : > { %3329 = vst [vmem:[%s386_s15 + $0x30] sm:$0xff] %v3321_v16 }
 0xa78   : > { %3330 = vst [vmem:[%s386_s15 + $0x38] sm:$0xff] %v3322_v51 }
 0xa79 PF: > { %s21_s17 = sadd.s32 1, %s3929_s17  }
 0xa7a   : > { %p18_p4 = scmp.ge.s32.totalorder %s21_s17, 4  }
 0xa7c   :  { %20 = sbr.rel (!%p18_p4) target bundleno = 1 (0x1), region = 94 }

</bundles_post_ra>
